<compile_context>
chip_gen: v5e
topology: v5e:2x2
jax: 0.10.0
libtpu: 0.0.40
codegen_flags: <defaults>
</compile_context>

<pallas_src>
import functools

import jax
import jax.numpy as jnp
import numpy as np
from jax import lax
from jax.experimental import pallas as pl
from jax.experimental.pallas import tpu as pltpu

_LN_EPS = 1e-5
_SQRT_2_OVER_PI = 0.7978845608028654


def _gelu(x):
    # TODO(synk): torch nn.GELU() defaults to the exact erf form; the tanh
    # approximation is used here for guaranteed Mosaic lowering.
    return 0.5 * x * (1.0 + jnp.tanh(_SQRT_2_OVER_PI * (x + 0.044715 * x * x * x)))


# ----------------------------------------------------------------------------
# Kernel 1: fused window attention block
#   LayerNorm1 -> QKV -> per-head softmax(QK^T + bias + mask) V -> proj
#   -> residual add with the (shifted) input window.
# One grid step == one window; grid = (B, H/ws, W/ws), all parallel.
# ----------------------------------------------------------------------------
def _attn_block_kernel(x_ref, g1_ref, b1_ref, wqkv_ref, bqkv_ref,
                       wproj_ref, bproj_ref, rbias_ref, mask_ref, o_ref,
                       *, num_heads, head_dim, scale):
    ws0, ws1, C = x_ref.shape[1], x_ref.shape[2], x_ref.shape[3]
    N = ws0 * ws1
    xw = x_ref[...].reshape(N, C)                         # window tokens, f32

    # ---- LayerNorm1 (f32, VPU/EUP) ----
    mu = jnp.mean(xw, axis=-1, keepdims=True)
    xc = xw - mu
    var = jnp.mean(xc * xc, axis=-1, keepdims=True)
    xn = xc * lax.rsqrt(var + _LN_EPS) * g1_ref[...] + b1_ref[...]

    # ---- QKV projection (bf16 MXU, f32 accumulation) ----
    qkv = jnp.dot(xn.astype(jnp.bfloat16), wqkv_ref[...],
                  preferred_element_type=jnp.float32) + bqkv_ref[...]   # (N, 3C)

    mask = mask_ref[0]                                    # (N, N) f32 (zeros if no shift)

    # ---- per-head attention (static unroll over heads) ----
    heads = []
    for h in range(num_heads):
        q = qkv[:, h * head_dim:(h + 1) * head_dim] * scale            # (N, hd)
        k = qkv[:, C + h * head_dim:C + (h + 1) * head_dim]            # (N, hd)
        v = qkv[:, 2 * C + h * head_dim:2 * C + (h + 1) * head_dim]    # (N, hd)
        s = lax.dot_general(q.astype(jnp.bfloat16), k.astype(jnp.bfloat16),
                            (((1,), (1,)), ((), ())),
                            preferred_element_type=jnp.float32)        # (N, N)
        s = s + rbias_ref[h] + mask
        s = s - jnp.max(s, axis=-1, keepdims=True)
        p = jnp.exp(s)
        p = p / jnp.sum(p, axis=-1, keepdims=True)
        heads.append(jnp.dot(p.astype(jnp.bfloat16), v.astype(jnp.bfloat16),
                             preferred_element_type=jnp.float32))      # (N, hd)
    ctx = jnp.concatenate(heads, axis=-1)                               # (N, C)

    # ---- output projection + residual with the (shifted) raw input window ----
    out = jnp.dot(ctx.astype(jnp.bfloat16), wproj_ref[...],
                  preferred_element_type=jnp.float32) + bproj_ref[...]
    o_ref[...] = (xw + out).reshape(1, ws0, ws1, C)


def window_attention_block(x4, params, rel_bias, attn_mask, *,
                           window_size, num_heads):
    B, H, W, C = x4.shape
    ws = window_size
    nWh, nWw = H // ws, W // ws
    N = ws * ws
    head_dim = C // num_heads
    scale = head_dim ** (-0.5)

    if attn_mask is None:
        attn_mask = jnp.zeros((1, N, N), jnp.float32)
        mask_map = lambda b, i, j: (0, 0, 0)
    else:
        mask_map = lambda b, i, j: (i * nWw + j, 0, 0)

    kernel = functools.partial(_attn_block_kernel, num_heads=num_heads,
                               head_dim=head_dim, scale=scale)
    const2 = lambda b, i, j: (0, 0)
    const3 = lambda b, i, j: (0, 0, 0)
    win_map = lambda b, i, j: (b, i, j, 0)

    return pl.pallas_call(
        kernel,
        grid=(B, nWh, nWw),
        out_shape=jax.ShapeDtypeStruct((B, H, W, C), jnp.float32),
        in_specs=[
            pl.BlockSpec((1, ws, ws, C), win_map),          # x window
            pl.BlockSpec((1, C), const2),                   # gamma1
            pl.BlockSpec((1, C), const2),                   # beta1
            pl.BlockSpec((C, 3 * C), const2),               # W_qkv (bf16)
            pl.BlockSpec((1, 3 * C), const2),               # b_qkv
            pl.BlockSpec((C, C), const2),                   # W_proj (bf16)
            pl.BlockSpec((1, C), const2),                   # b_proj
            pl.BlockSpec((num_heads, N, N), const3),        # relative pos bias
            pl.BlockSpec((1, N, N), mask_map),              # per-window mask
        ],
        out_specs=pl.BlockSpec((1, ws, ws, C), win_map),
        compiler_params=pltpu.CompilerParams(
            dimension_semantics=("parallel", "parallel", "parallel")),
    )(x4,
      params["gamma1"], params["beta1"],
      params["wqkv"].astype(jnp.bfloat16), params["bqkv"],
      params["wproj"].astype(jnp.bfloat16), params["bproj"],
      rel_bias, attn_mask)


# ----------------------------------------------------------------------------
# Kernel 2: fused MLP block
#   LayerNorm2 -> Linear -> GELU -> Linear -> residual add.
# Grid over row blocks of the flattened (B*L, C) token matrix, all parallel.
# ----------------------------------------------------------------------------
def _mlp_block_kernel(x_ref, g2_ref, b2_ref, w1_ref, bb1_ref, w2_ref, bb2_ref,
                      o_ref):
    x = x_ref[...]                                        # (tm, C) f32
    mu = jnp.mean(x, axis=-1, keepdims=True)
    xc = x - mu
    var = jnp.mean(xc * xc, axis=-1, keepdims=True)
    xn = xc * lax.rsqrt(var + _LN_EPS) * g2_ref[...] + b2_ref[...]

    h = jnp.dot(xn.astype(jnp.bfloat16), w1_ref[...],
                preferred_element_type=jnp.float32) + bb1_ref[...]     # (tm, hidden)
    h = _gelu(h)
    y = jnp.dot(h.astype(jnp.bfloat16), w2_ref[...],
                preferred_element_type=jnp.float32) + bb2_ref[...]     # (tm, C)
    o_ref[...] = x + y


def mlp_block(x2d, params, *, block_rows=256):
    M, C = x2d.shape
    hidden = params["w1"].shape[1]
    tm = min(block_rows, M)
    grid_m = pl.cdiv(M, tm)
    const = lambda i: (0, 0)

    return pl.pallas_call(
        _mlp_block_kernel,
        grid=(grid_m,),
        out_shape=jax.ShapeDtypeStruct((M, C), jnp.float32),
        in_specs=[
            pl.BlockSpec((tm, C), lambda i: (i, 0)),        # tokens
            pl.BlockSpec((1, C), const),                    # gamma2
            pl.BlockSpec((1, C), const),                    # beta2
            pl.BlockSpec((C, hidden), const),               # W1 (bf16)
            pl.BlockSpec((1, hidden), const),               # b1
            pl.BlockSpec((hidden, C), const),               # W2 (bf16)
            pl.BlockSpec((1, C), const),                    # b2
        ],
        out_specs=pl.BlockSpec((tm, C), lambda i: (i, 0)),
        compiler_params=pltpu.CompilerParams(
            dimension_semantics=("parallel",)),
    )(x2d,
      params["gamma2"], params["beta2"],
      params["w1"].astype(jnp.bfloat16), params["b1_mlp"],
      params["w2"].astype(jnp.bfloat16), params["b2_mlp"])


# ----------------------------------------------------------------------------
# Host-side helpers (tiny, parameter-style precompute; mirror the torch code)
# ----------------------------------------------------------------------------
def _relative_position_bias(table, ws, num_heads):
    coords = np.stack(np.meshgrid(np.arange(ws), np.arange(ws), indexing="ij"))
    cf = coords.reshape(2, -1)                              # (2, N)
    rel = cf[:, :, None] - cf[:, None, :]                   # (2, N, N)
    rel = rel.transpose(1, 2, 0).copy()                     # (N, N, 2)
    rel[:, :, 0] += ws - 1
    rel[:, :, 1] += ws - 1
    rel[:, :, 0] *= 2 * ws - 1
    idx = rel.sum(-1).reshape(-1).astype(np.int32)          # (N*N,)
    N = ws * ws
    bias = table[idx].reshape(N, N, num_heads)              # gather (tiny, XLA)
    return jnp.transpose(bias, (2, 0, 1)).astype(jnp.float32)   # (heads, N, N)


def _calculate_mask(H, W, ws, shift):
    img = np.zeros((1, H, W, 1), np.float32)
    cnt = 0
    for hs in (slice(0, -ws), slice(-ws, -shift), slice(-shift, None)):
        for wsl in (slice(0, -ws), slice(-ws, -shift), slice(-shift, None)):
            img[:, hs, wsl, :] = cnt
            cnt += 1
    mw = img.reshape(1, H // ws, ws, W // ws, ws, 1)
    mw = mw.transpose(0, 1, 3, 2, 4, 5).reshape(-1, ws * ws)          # (nW, N)
    am = mw[:, None, :] - mw[:, :, None]
    am = np.where(am != 0, -100.0, 0.0).astype(np.float32)
    return jnp.asarray(am)                                            # (nW, N, N)


# ----------------------------------------------------------------------------
# SwinTransformerBlock forward (Pallas)
# ----------------------------------------------------------------------------
def swin_transformer_block_forward(x, x_size, params, *, window_size,
                                   shift_size, num_heads):
    H, W = x_size
    B, L, C = x.shape
    ws = window_size
    if min(H, W) <= ws:            # mirror the module's constructor adjustment
        shift_size = 0
        ws = min(H, W)
    assert 0 <= shift_size < ws

    rel_bias = _relative_position_bias(params["rel_table"], ws, num_heads)
    attn_mask = _calculate_mask(H, W, ws, shift_size) if shift_size > 0 else None

    x4 = x.reshape(B, H, W, C)                 # free reshape (no transpose)
    if shift_size > 0:
        x4 = jnp.roll(x4, shift=(-shift_size, -shift_size), axis=(1, 2))
    # kernel output = (shifted) x + attention(LN1(x)); residual is fused
    y4 = window_attention_block(x4, params, rel_bias, attn_mask,
                                window_size=ws, num_heads=num_heads)
    if shift_size > 0:
        y4 = jnp.roll(y4, shift=(shift_size, shift_size), axis=(1, 2))

    x1 = y4.reshape(B * L, C)                  # == shortcut + attn branch
    x2 = mlp_block(x1, params)                 # == x1 + MLP(LN2(x1))
    return x2.reshape(B, L, C)


# ----------------------------------------------------------------------------
# Pure-JAX f32 reference (same math as the PyTorch module)
# ----------------------------------------------------------------------------
def _layernorm_ref(x, g, b, eps=_LN_EPS):
    mu = jnp.mean(x, axis=-1, keepdims=True)
    var = jnp.mean((x - mu) ** 2, axis=-1, keepdims=True)
    return (x - mu) * lax.rsqrt(var + eps) * g + b


def swin_block_reference(x, x_size, params, *, window_size, shift_size,
                         num_heads):
    H, W = x_size
    B, L, C = x.shape
    ws = window_size
    if min(H, W) <= ws:
        shift_size = 0
        ws = min(H, W)
    N = ws * ws
    hd = C // num_heads
    scale = hd ** (-0.5)
    nWh, nWw = H // ws, W // ws
    rel_bias = _relative_position_bias(params["rel_table"], ws, num_heads)

    shortcut = x
    xn = _layernorm_ref(x, params["gamma1"], params["beta1"])
    x4 = xn.reshape(B, H, W, C)
    if shift_size > 0:
        x4 = jnp.roll(x4, shift=(-shift_size, -shift_size), axis=(1, 2))
    xw = x4.reshape(B, nWh, ws, nWw, ws, C).transpose(0, 1, 3, 2, 4, 5)
    xw = xw.reshape(B * nWh * nWw, N, C)

    qkv = xw @ params["wqkv"] + params["bqkv"]
    qkv = qkv.reshape(-1, N, 3, num_heads, hd).transpose(2, 0, 3, 1, 4)
    q, k, v = qkv[0] * scale, qkv[1], qkv[2]
    attn = jnp.einsum("bhnd,bhmd->bhnm", q, k) + rel_bias[None]
    if shift_size > 0:
        mask = _calculate_mask(H, W, ws, shift_size)
        nW = mask.shape[0]
        attn = attn.reshape(B, nW, num_heads, N, N) + mask[None, :, None]
        attn = attn.reshape(-1, num_heads, N, N)
    attn = jax.nn.softmax(attn, axis=-1)
    ctx = jnp.einsum("bhnm,bhmd->bhnd", attn, v)
    ctx = ctx.transpose(0, 2, 1, 3).reshape(-1, N, C)
    proj = ctx @ params["wproj"] + params["bproj"]

    y4 = proj.reshape(B, nWh, nWw, ws, ws, C).transpose(0, 1, 3, 2, 4, 5)
    y4 = y4.reshape(B, H, W, C)
    if shift_size > 0:
        y4 = jnp.roll(y4, shift=(shift_size, shift_size), axis=(1, 2))
    x1 = shortcut + y4.reshape(B, L, C)

    h = _layernorm_ref(x1, params["gamma2"], params["beta2"])
    h = _gelu(h @ params["w1"] + params["b1_mlp"])
    return x1 + (h @ params["w2"] + params["b2_mlp"])


# ----------------------------------------------------------------------------
if __name__ == "__main__":
    B, H, W, C = 2, 16, 16, 32
    num_heads, window_size, mlp_ratio = 4, 8, 4.0
    L = H * W
    hidden = int(C * mlp_ratio)

    key = jax.random.PRNGKey(0)
    ks = jax.random.split(key, 14)

    def nrm(k, shape, s=0.1):
        return jax.random.normal(k, shape, jnp.float32) * s

    params = {
        "gamma1": 1.0 + nrm(ks[0], (1, C)),
        "beta1": nrm(ks[1], (1, C)),
        "wqkv": nrm(ks[2], (C, 3 * C)),
        "bqkv": nrm(ks[3], (1, 3 * C)),
        "wproj": nrm(ks[4], (C, C)),
        "bproj": nrm(ks[5], (1, C)),
        "rel_table": nrm(ks[6], ((2 * window_size - 1) ** 2, num_heads), 0.02),
        "gamma2": 1.0 + nrm(ks[7], (1, C)),
        "beta2": nrm(ks[8], (1, C)),
        "w1": nrm(ks[9], (C, hidden)),
        "b1_mlp": nrm(ks[10], (1, hidden)),
        "w2": nrm(ks[11], (hidden, C)),
        "b2_mlp": nrm(ks[12], (1, C)),
    }
    x = jax.random.normal(ks[13], (B, L, C), jnp.float32)

    ok = True
    # Exercise both the W-MSA (shift=0) and SW-MSA (shift=ws//2, masked) paths.
    for shift in (0, window_size // 2):
        y = swin_transformer_block_forward(
            x, (H, W), params, window_size=window_size,
            shift_size=shift, num_heads=num_heads)
        y = jax.block_until_ready(y)
        y_ref = swin_block_reference(
            x, (H, W), params, window_size=window_size,
            shift_size=shift, num_heads=num_heads)
        y_ref = jax.block_until_ready(y_ref)
        # bf16 MXU operands (f32 accumulation) vs a pure-f32 reference.
        ok = ok and np.allclose(np.asarray(y), np.asarray(y_ref),
                                rtol=3e-2, atol=3e-2)

    assert ok
    print("KERNEL_OK")
</pallas_src>

<mosaic_0001>
module attributes {stable_mosaic.version = 11 : i64} {
  func.func @_attn_block_kernel(%arg0: i32, %arg1: i32, %arg2: i32, %arg3: memref<1x8x8x32xf32, #tpu.memory_space<vmem>>, %arg4: memref<1x32xf32, #tpu.memory_space<vmem>>, %arg5: memref<1x32xf32, #tpu.memory_space<vmem>>, %arg6: memref<32x96xbf16, #tpu.memory_space<vmem>>, %arg7: memref<1x96xf32, #tpu.memory_space<vmem>>, %arg8: memref<32x32xbf16, #tpu.memory_space<vmem>>, %arg9: memref<1x32xf32, #tpu.memory_space<vmem>>, %arg10: memref<4x64x64xf32, #tpu.memory_space<vmem>>, %arg11: memref<1x64x64xf32, #tpu.memory_space<vmem>>, %arg12: memref<1x8x8x32xf32, #tpu.memory_space<vmem>>) attributes {dimension_semantics = [#tpu.dimension_semantics<parallel>, #tpu.dimension_semantics<parallel>, #tpu.dimension_semantics<parallel>], iteration_bounds = array<i64: 2, 2, 2>, scalar_prefetch = 0 : i64, scratch_operands = 0 : i64, tpu.core_type = #tpu.core_type<tc>, window_params = [{transform_indices = @transform_0, window_bounds = array<i64: 1, 8, 8, 32>}, {pipeline_mode = #tpu.pipeline_mode<synchronous>, transform_indices = @transform_1, window_bounds = array<i64: 1, 32>}, {pipeline_mode = #tpu.pipeline_mode<synchronous>, transform_indices = @transform_2, window_bounds = array<i64: 1, 32>}, {pipeline_mode = #tpu.pipeline_mode<synchronous>, transform_indices = @transform_3, window_bounds = array<i64: 32, 96>}, {pipeline_mode = #tpu.pipeline_mode<synchronous>, transform_indices = @transform_4, window_bounds = array<i64: 1, 96>}, {pipeline_mode = #tpu.pipeline_mode<synchronous>, transform_indices = @transform_5, window_bounds = array<i64: 32, 32>}, {pipeline_mode = #tpu.pipeline_mode<synchronous>, transform_indices = @transform_6, window_bounds = array<i64: 1, 32>}, {pipeline_mode = #tpu.pipeline_mode<synchronous>, transform_indices = @transform_7, window_bounds = array<i64: 4, 64, 64>}, {pipeline_mode = #tpu.pipeline_mode<synchronous>, transform_indices = @transform_8, window_bounds = array<i64: 1, 64, 64>}, {transform_indices = @transform_9, window_bounds = array<i64: 1, 8, 8, 32>}]} {
    %c0 = arith.constant 0 : index
    %c0_0 = arith.constant 0 : index
    %c0_1 = arith.constant 0 : index
    %c0_2 = arith.constant 0 : index
    %0 = vector.load %arg3[%c0, %c0_0, %c0_1, %c0_2] : memref<1x8x8x32xf32, #tpu.memory_space<vmem>>, vector<1x8x8x32xf32>
    %1 = vector.shape_cast %0 : vector<1x8x8x32xf32> to vector<64x32xf32>
    %cst = arith.constant dense<0.000000e+00> : vector<64xf32>
    %2 = vector.multi_reduction <add>, %1, %cst [1] : vector<64x32xf32> to vector<64xf32>
    %3 = vector.shape_cast %2 : vector<64xf32> to vector<64x1xf32>
    %cst_3 = arith.constant 3.200000e+01 : f32
    %4 = vector.broadcast %cst_3 : f32 to vector<64x1xf32>
    %5 = arith.divf %3, %4 : vector<64x1xf32>
    %6 = vector.broadcast %5 : vector<64x1xf32> to vector<64x32xf32>
    %7 = arith.subf %1, %6 : vector<64x32xf32>
    %8 = arith.mulf %7, %7 : vector<64x32xf32>
    %cst_4 = arith.constant dense<0.000000e+00> : vector<64xf32>
    %9 = vector.multi_reduction <add>, %8, %cst_4 [1] : vector<64x32xf32> to vector<64xf32>
    %10 = vector.shape_cast %9 : vector<64xf32> to vector<64x1xf32>
    %cst_5 = arith.constant 3.200000e+01 : f32
    %11 = vector.broadcast %cst_5 : f32 to vector<64x1xf32>
    %12 = arith.divf %10, %11 : vector<64x1xf32>
    %cst_6 = arith.constant 9.99999974E-6 : f32
    %13 = vector.broadcast %cst_6 : f32 to vector<64x1xf32>
    %14 = arith.addf %12, %13 : vector<64x1xf32>
    %15 = math.rsqrt %14 : vector<64x1xf32>
    %16 = vector.broadcast %15 : vector<64x1xf32> to vector<64x32xf32>
    %17 = arith.mulf %7, %16 : vector<64x32xf32>
    %c0_7 = arith.constant 0 : index
    %c0_8 = arith.constant 0 : index
    %18 = vector.load %arg4[%c0_7, %c0_8] : memref<1x32xf32, #tpu.memory_space<vmem>>, vector<1x32xf32>
    %19 = vector.broadcast %18 : vector<1x32xf32> to vector<64x32xf32>
    %20 = arith.mulf %17, %19 : vector<64x32xf32>
    %c0_9 = arith.constant 0 : index
    %c0_10 = arith.constant 0 : index
    %21 = vector.load %arg5[%c0_9, %c0_10] : memref<1x32xf32, #tpu.memory_space<vmem>>, vector<1x32xf32>
    %22 = vector.broadcast %21 : vector<1x32xf32> to vector<64x32xf32>
    %23 = arith.addf %20, %22 : vector<64x32xf32>
    %24 = arith.truncf %23 : vector<64x32xf32> to vector<64x32xbf16>
    %c0_11 = arith.constant 0 : index
    %c0_12 = arith.constant 0 : index
    %25 = vector.load %arg6[%c0_11, %c0_12] : memref<32x96xbf16, #tpu.memory_space<vmem>>, vector<32x96xbf16>
    %cst_13 = arith.constant dense<0.000000e+00> : vector<64x96xf32>
    %26 = tpu.matmul %24, %25, %cst_13 {dimension_numbers = #tpu.dot_dimension_numbers<[1], [0], [0], [1], [0, 0, 1, 1], [], []>} : vector<64x32xbf16>, vector<32x96xbf16>, vector<64x96xf32> -> vector<64x96xf32>
    %c0_14 = arith.constant 0 : index
    %c0_15 = arith.constant 0 : index
    %27 = vector.load %arg7[%c0_14, %c0_15] : memref<1x96xf32, #tpu.memory_space<vmem>>, vector<1x96xf32>
    %28 = vector.broadcast %27 : vector<1x96xf32> to vector<64x96xf32>
    %29 = arith.addf %26, %28 : vector<64x96xf32>
    %c0_16 = arith.constant 0 : index
    %c0_17 = arith.constant 0 : index
    %c0_18 = arith.constant 0 : index
    %30 = vector.load %arg11[%c0_16, %c0_17, %c0_18] : memref<1x64x64xf32, #tpu.memory_space<vmem>>, vector<1x64x64xf32>
    %31 = vector.shape_cast %30 : vector<1x64x64xf32> to vector<64x64xf32>
    %32 = vector.extract_strided_slice %29 {offsets = [0, 0], sizes = [64, 8], strides = [1, 1]} : vector<64x96xf32> to vector<64x8xf32>
    %cst_19 = arith.constant 0.353553385 : f32
    %33 = vector.broadcast %cst_19 : f32 to vector<64x8xf32>
    %34 = arith.mulf %32, %33 : vector<64x8xf32>
    %35 = vector.extract_strided_slice %29 {offsets = [0, 32], sizes = [64, 8], strides = [1, 1]} : vector<64x96xf32> to vector<64x8xf32>
    %36 = vector.extract_strided_slice %29 {offsets = [0, 64], sizes = [64, 8], strides = [1, 1]} : vector<64x96xf32> to vector<64x8xf32>
    %37 = arith.truncf %34 : vector<64x8xf32> to vector<64x8xbf16>
    %38 = arith.truncf %35 : vector<64x8xf32> to vector<64x8xbf16>
    %cst_20 = arith.constant dense<0.000000e+00> : vector<64x64xf32>
    %39 = tpu.matmul %37, %38, %cst_20 {dimension_numbers = #tpu.dot_dimension_numbers<[1], [1], [0], [0], [0, 0, 1, 0], [], []>} : vector<64x8xbf16>, vector<64x8xbf16>, vector<64x64xf32> -> vector<64x64xf32>
    %c0_21 = arith.constant 0 : index
    %c0_22 = arith.constant 0 : index
    %c0_23 = arith.constant 0 : index
    %40 = vector.load %arg10[%c0_21, %c0_22, %c0_23] : memref<4x64x64xf32, #tpu.memory_space<vmem>>, vector<1x64x64xf32>
    %41 = vector.shape_cast %40 : vector<1x64x64xf32> to vector<64x64xf32>
    %42 = arith.addf %39, %41 : vector<64x64xf32>
    %43 = arith.addf %42, %31 : vector<64x64xf32>
    %cst_24 = arith.constant dense<0xFF800000> : vector<64xf32>
    %44 = vector.multi_reduction <maximumf>, %43, %cst_24 [1] : vector<64x64xf32> to vector<64xf32>
    %45 = vector.shape_cast %44 : vector<64xf32> to vector<64x1xf32>
    %46 = vector.broadcast %45 : vector<64x1xf32> to vector<64x64xf32>
    %47 = arith.subf %43, %46 : vector<64x64xf32>
    %48 = math.exp %47 : vector<64x64xf32>
    %cst_25 = arith.constant dense<0.000000e+00> : vector<64xf32>
    %49 = vector.multi_reduction <add>, %48, %cst_25 [1] : vector<64x64xf32> to vector<64xf32>
    %50 = vector.shape_cast %49 : vector<64xf32> to vector<64x1xf32>
    %51 = vector.broadcast %50 : vector<64x1xf32> to vector<64x64xf32>
    %52 = arith.divf %48, %51 : vector<64x64xf32>
    %53 = arith.truncf %52 : vector<64x64xf32> to vector<64x64xbf16>
    %54 = arith.truncf %36 : vector<64x8xf32> to vector<64x8xbf16>
    %cst_26 = arith.constant dense<0.000000e+00> : vector<64x8xf32>
    %55 = tpu.matmul %53, %54, %cst_26 {dimension_numbers = #tpu.dot_dimension_numbers<[1], [0], [0], [1], [0, 0, 1, 1], [], []>} : vector<64x64xbf16>, vector<64x8xbf16>, vector<64x8xf32> -> vector<64x8xf32>
    %56 = vector.extract_strided_slice %29 {offsets = [0, 8], sizes = [64, 8], strides = [1, 1]} : vector<64x96xf32> to vector<64x8xf32>
    %cst_27 = arith.constant 0.353553385 : f32
    %57 = vector.broadcast %cst_27 : f32 to vector<64x8xf32>
    %58 = arith.mulf %56, %57 : vector<64x8xf32>
    %59 = vector.extract_strided_slice %29 {offsets = [0, 40], sizes = [64, 8], strides = [1, 1]} : vector<64x96xf32> to vector<64x8xf32>
    %60 = vector.extract_strided_slice %29 {offsets = [0, 72], sizes = [64, 8], strides = [1, 1]} : vector<64x96xf32> to vector<64x8xf32>
    %61 = arith.truncf %58 : vector<64x8xf32> to vector<64x8xbf16>
    %62 = arith.truncf %59 : vector<64x8xf32> to vector<64x8xbf16>
    %cst_28 = arith.constant dense<0.000000e+00> : vector<64x64xf32>
    %63 = tpu.matmul %61, %62, %cst_28 {dimension_numbers = #tpu.dot_dimension_numbers<[1], [1], [0], [0], [0, 0, 1, 0], [], []>} : vector<64x8xbf16>, vector<64x8xbf16>, vector<64x64xf32> -> vector<64x64xf32>
    %c1 = arith.constant 1 : index
    %c0_29 = arith.constant 0 : index
    %c0_30 = arith.constant 0 : index
    %64 = vector.load %arg10[%c1, %c0_29, %c0_30] : memref<4x64x64xf32, #tpu.memory_space<vmem>>, vector<1x64x64xf32>
    %65 = vector.shape_cast %64 : vector<1x64x64xf32> to vector<64x64xf32>
    %66 = arith.addf %63, %65 : vector<64x64xf32>
    %67 = arith.addf %66, %31 : vector<64x64xf32>
    %cst_31 = arith.constant dense<0xFF800000> : vector<64xf32>
    %68 = vector.multi_reduction <maximumf>, %67, %cst_31 [1] : vector<64x64xf32> to vector<64xf32>
    %69 = vector.shape_cast %68 : vector<64xf32> to vector<64x1xf32>
    %70 = vector.broadcast %69 : vector<64x1xf32> to vector<64x64xf32>
    %71 = arith.subf %67, %70 : vector<64x64xf32>
    %72 = math.exp %71 : vector<64x64xf32>
    %cst_32 = arith.constant dense<0.000000e+00> : vector<64xf32>
    %73 = vector.multi_reduction <add>, %72, %cst_32 [1] : vector<64x64xf32> to vector<64xf32>
    %74 = vector.shape_cast %73 : vector<64xf32> to vector<64x1xf32>
    %75 = vector.broadcast %74 : vector<64x1xf32> to vector<64x64xf32>
    %76 = arith.divf %72, %75 : vector<64x64xf32>
    %77 = arith.truncf %76 : vector<64x64xf32> to vector<64x64xbf16>
    %78 = arith.truncf %60 : vector<64x8xf32> to vector<64x8xbf16>
    %cst_33 = arith.constant dense<0.000000e+00> : vector<64x8xf32>
    %79 = tpu.matmul %77, %78, %cst_33 {dimension_numbers = #tpu.dot_dimension_numbers<[1], [0], [0], [1], [0, 0, 1, 1], [], []>} : vector<64x64xbf16>, vector<64x8xbf16>, vector<64x8xf32> -> vector<64x8xf32>
    %80 = vector.extract_strided_slice %29 {offsets = [0, 16], sizes = [64, 8], strides = [1, 1]} : vector<64x96xf32> to vector<64x8xf32>
    %cst_34 = arith.constant 0.353553385 : f32
    %81 = vector.broadcast %cst_34 : f32 to vector<64x8xf32>
    %82 = arith.mulf %80, %81 : vector<64x8xf32>
    %83 = vector.extract_strided_slice %29 {offsets = [0, 48], sizes = [64, 8], strides = [1, 1]} : vector<64x96xf32> to vector<64x8xf32>
    %84 = vector.extract_strided_slice %29 {offsets = [0, 80], sizes = [64, 8], strides = [1, 1]} : vector<64x96xf32> to vector<64x8xf32>
    %85 = arith.truncf %82 : vector<64x8xf32> to vector<64x8xbf16>
    %86 = arith.truncf %83 : vector<64x8xf32> to vector<64x8xbf16>
    %cst_35 = arith.constant dense<0.000000e+00> : vector<64x64xf32>
    %87 = tpu.matmul %85, %86, %cst_35 {dimension_numbers = #tpu.dot_dimension_numbers<[1], [1], [0], [0], [0, 0, 1, 0], [], []>} : vector<64x8xbf16>, vector<64x8xbf16>, vector<64x64xf32> -> vector<64x64xf32>
    %c2 = arith.constant 2 : index
    %c0_36 = arith.constant 0 : index
    %c0_37 = arith.constant 0 : index
    %88 = vector.load %arg10[%c2, %c0_36, %c0_37] : memref<4x64x64xf32, #tpu.memory_space<vmem>>, vector<1x64x64xf32>
    %89 = vector.shape_cast %88 : vector<1x64x64xf32> to vector<64x64xf32>
    %90 = arith.addf %87, %89 : vector<64x64xf32>
    %91 = arith.addf %90, %31 : vector<64x64xf32>
    %cst_38 = arith.constant dense<0xFF800000> : vector<64xf32>
    %92 = vector.multi_reduction <maximumf>, %91, %cst_38 [1] : vector<64x64xf32> to vector<64xf32>
    %93 = vector.shape_cast %92 : vector<64xf32> to vector<64x1xf32>
    %94 = vector.broadcast %93 : vector<64x1xf32> to vector<64x64xf32>
    %95 = arith.subf %91, %94 : vector<64x64xf32>
    %96 = math.exp %95 : vector<64x64xf32>
    %cst_39 = arith.constant dense<0.000000e+00> : vector<64xf32>
    %97 = vector.multi_reduction <add>, %96, %cst_39 [1] : vector<64x64xf32> to vector<64xf32>
    %98 = vector.shape_cast %97 : vector<64xf32> to vector<64x1xf32>
    %99 = vector.broadcast %98 : vector<64x1xf32> to vector<64x64xf32>
    %100 = arith.divf %96, %99 : vector<64x64xf32>
    %101 = arith.truncf %100 : vector<64x64xf32> to vector<64x64xbf16>
    %102 = arith.truncf %84 : vector<64x8xf32> to vector<64x8xbf16>
    %cst_40 = arith.constant dense<0.000000e+00> : vector<64x8xf32>
    %103 = tpu.matmul %101, %102, %cst_40 {dimension_numbers = #tpu.dot_dimension_numbers<[1], [0], [0], [1], [0, 0, 1, 1], [], []>} : vector<64x64xbf16>, vector<64x8xbf16>, vector<64x8xf32> -> vector<64x8xf32>
    %104 = vector.extract_strided_slice %29 {offsets = [0, 24], sizes = [64, 8], strides = [1, 1]} : vector<64x96xf32> to vector<64x8xf32>
    %cst_41 = arith.constant 0.353553385 : f32
    %105 = vector.broadcast %cst_41 : f32 to vector<64x8xf32>
    %106 = arith.mulf %104, %105 : vector<64x8xf32>
    %107 = vector.extract_strided_slice %29 {offsets = [0, 56], sizes = [64, 8], strides = [1, 1]} : vector<64x96xf32> to vector<64x8xf32>
    %108 = vector.extract_strided_slice %29 {offsets = [0, 88], sizes = [64, 8], strides = [1, 1]} : vector<64x96xf32> to vector<64x8xf32>
    %109 = arith.truncf %106 : vector<64x8xf32> to vector<64x8xbf16>
    %110 = arith.truncf %107 : vector<64x8xf32> to vector<64x8xbf16>
    %cst_42 = arith.constant dense<0.000000e+00> : vector<64x64xf32>
    %111 = tpu.matmul %109, %110, %cst_42 {dimension_numbers = #tpu.dot_dimension_numbers<[1], [1], [0], [0], [0, 0, 1, 0], [], []>} : vector<64x8xbf16>, vector<64x8xbf16>, vector<64x64xf32> -> vector<64x64xf32>
    %c3 = arith.constant 3 : index
    %c0_43 = arith.constant 0 : index
    %c0_44 = arith.constant 0 : index
    %112 = vector.load %arg10[%c3, %c0_43, %c0_44] : memref<4x64x64xf32, #tpu.memory_space<vmem>>, vector<1x64x64xf32>
    %113 = vector.shape_cast %112 : vector<1x64x64xf32> to vector<64x64xf32>
    %114 = arith.addf %111, %113 : vector<64x64xf32>
    %115 = arith.addf %114, %31 : vector<64x64xf32>
    %cst_45 = arith.constant dense<0xFF800000> : vector<64xf32>
    %116 = vector.multi_reduction <maximumf>, %115, %cst_45 [1] : vector<64x64xf32> to vector<64xf32>
    %117 = vector.shape_cast %116 : vector<64xf32> to vector<64x1xf32>
    %118 = vector.broadcast %117 : vector<64x1xf32> to vector<64x64xf32>
    %119 = arith.subf %115, %118 : vector<64x64xf32>
    %120 = math.exp %119 : vector<64x64xf32>
    %cst_46 = arith.constant dense<0.000000e+00> : vector<64xf32>
    %121 = vector.multi_reduction <add>, %120, %cst_46 [1] : vector<64x64xf32> to vector<64xf32>
    %122 = vector.shape_cast %121 : vector<64xf32> to vector<64x1xf32>
    %123 = vector.broadcast %122 : vector<64x1xf32> to vector<64x64xf32>
    %124 = arith.divf %120, %123 : vector<64x64xf32>
    %125 = arith.truncf %124 : vector<64x64xf32> to vector<64x64xbf16>
    %126 = arith.truncf %108 : vector<64x8xf32> to vector<64x8xbf16>
    %cst_47 = arith.constant dense<0.000000e+00> : vector<64x8xf32>
    %127 = tpu.matmul %125, %126, %cst_47 {dimension_numbers = #tpu.dot_dimension_numbers<[1], [0], [0], [1], [0, 0, 1, 1], [], []>} : vector<64x64xbf16>, vector<64x8xbf16>, vector<64x8xf32> -> vector<64x8xf32>
    %128 = tpu.concatenate %55, %79, %103, %127 in 1 : vector<64x8xf32>, vector<64x8xf32>, vector<64x8xf32>, vector<64x8xf32> -> vector<64x32xf32>
    %129 = arith.truncf %128 : vector<64x32xf32> to vector<64x32xbf16>
    %c0_48 = arith.constant 0 : index
    %c0_49 = arith.constant 0 : index
    %130 = vector.load %arg8[%c0_48, %c0_49] : memref<32x32xbf16, #tpu.memory_space<vmem>>, vector<32x32xbf16>
    %cst_50 = arith.constant dense<0.000000e+00> : vector<64x32xf32>
    %131 = tpu.matmul %129, %130, %cst_50 {dimension_numbers = #tpu.dot_dimension_numbers<[1], [0], [0], [1], [0, 0, 1, 1], [], []>} : vector<64x32xbf16>, vector<32x32xbf16>, vector<64x32xf32> -> vector<64x32xf32>
    %c0_51 = arith.constant 0 : index
    %c0_52 = arith.constant 0 : index
    %132 = vector.load %arg9[%c0_51, %c0_52] : memref<1x32xf32, #tpu.memory_space<vmem>>, vector<1x32xf32>
    %133 = vector.broadcast %132 : vector<1x32xf32> to vector<64x32xf32>
    %134 = arith.addf %131, %133 : vector<64x32xf32>
    %135 = arith.addf %1, %134 : vector<64x32xf32>
    %136 = vector.shape_cast %135 : vector<64x32xf32> to vector<1x8x8x32xf32>
    %c0_53 = arith.constant 0 : index
    %c0_54 = arith.constant 0 : index
    %c0_55 = arith.constant 0 : index
    %c0_56 = arith.constant 0 : index
    %137 = vector.load %arg12[%c0_53, %c0_54, %c0_55, %c0_56] : memref<1x8x8x32xf32, #tpu.memory_space<vmem>>, vector<1x8x8x32xf32>
    tpu.vector_store %arg12[%c0_53, %c0_54, %c0_55, %c0_56], %136 {strides = array<i32>} : memref<1x8x8x32xf32, #tpu.memory_space<vmem>>, vector<1x8x8x32xf32>,
    return
  }
  func.func @transform_0(%arg0: i32, %arg1: i32, %arg2: i32) -> (i32, i32, i32, i32) {
    %c0_i32 = arith.constant 0 : i32
    %c0_i32_0 = arith.constant 0 : i32
    return %arg0, %arg1, %arg2, %c0_i32 : i32, i32, i32, i32
  }
  func.func @transform_1(%arg0: i32, %arg1: i32, %arg2: i32) -> (i32, i32) {
    %c0_i32 = arith.constant 0 : i32
    %c0_i32_0 = arith.constant 0 : i32
    %c0_i32_1 = arith.constant 0 : i32
    return %c0_i32, %c0_i32_0 : i32, i32
  }
  func.func @transform_2(%arg0: i32, %arg1: i32, %arg2: i32) -> (i32, i32) {
    %c0_i32 = arith.constant 0 : i32
    %c0_i32_0 = arith.constant 0 : i32
    %c0_i32_1 = arith.constant 0 : i32
    return %c0_i32, %c0_i32_0 : i32, i32
  }
  func.func @transform_3(%arg0: i32, %arg1: i32, %arg2: i32) -> (i32, i32) {
    %c0_i32 = arith.constant 0 : i32
    %c0_i32_0 = arith.constant 0 : i32
    %c0_i32_1 = arith.constant 0 : i32
    return %c0_i32, %c0_i32_0 : i32, i32
  }
  func.func @transform_4(%arg0: i32, %arg1: i32, %arg2: i32) -> (i32, i32) {
    %c0_i32 = arith.constant 0 : i32
    %c0_i32_0 = arith.constant 0 : i32
    %c0_i32_1 = arith.constant 0 : i32
    return %c0_i32, %c0_i32_0 : i32, i32
  }
  func.func @transform_5(%arg0: i32, %arg1: i32, %arg2: i32) -> (i32, i32) {
    %c0_i32 = arith.constant 0 : i32
    %c0_i32_0 = arith.constant 0 : i32
    %c0_i32_1 = arith.constant 0 : i32
    return %c0_i32, %c0_i32_0 : i32, i32
  }
  func.func @transform_6(%arg0: i32, %arg1: i32, %arg2: i32) -> (i32, i32) {
    %c0_i32 = arith.constant 0 : i32
    %c0_i32_0 = arith.constant 0 : i32
    %c0_i32_1 = arith.constant 0 : i32
    return %c0_i32, %c0_i32_0 : i32, i32
  }
  func.func @transform_7(%arg0: i32, %arg1: i32, %arg2: i32) -> (i32, i32, i32) {
    %c0_i32 = arith.constant 0 : i32
    %c0_i32_0 = arith.constant 0 : i32
    %c0_i32_1 = arith.constant 0 : i32
    %c0_i32_2 = arith.constant 0 : i32
    return %c0_i32, %c0_i32_0, %c0_i32_1 : i32, i32, i32
  }
  func.func @transform_8(%arg0: i32, %arg1: i32, %arg2: i32) -> (i32, i32, i32) {
    %c0_i32 = arith.constant 0 : i32
    %c0_i32_0 = arith.constant 0 : i32
    %c0_i32_1 = arith.constant 0 : i32
    %c0_i32_2 = arith.constant 0 : i32
    return %c0_i32, %c0_i32_0, %c0_i32_1 : i32, i32, i32
  }
  func.func @transform_9(%arg0: i32, %arg1: i32, %arg2: i32) -> (i32, i32, i32, i32) {
    %c0_i32 = arith.constant 0 : i32
    %c0_i32_0 = arith.constant 0 : i32
    return %arg0, %arg1, %arg2, %c0_i32 : i32, i32, i32, i32
  }
}

</mosaic_0001>

<bundles_post_ra>
// kernel: tpu_custom_call.1
= control target key start
LH: loop header
LB: loop body
LE: loop exit
PB: predicated region body
PF: predicated region fallthrough
CT: control target
= control target key end

     0   :  { %s4655_s0 = inlined_call_operand.hbm [shape: f32[2,16,16,32], index: 0, kind: input, shape index: {}]   ;;  %s4656_s1 = inlined_call_operand.hbm [shape: f32[1,32], index: 1, kind: input, shape index: {}]   ;;  %s4657_s2 = inlined_call_operand.vmem [shape: f32[1,32], index: 2, kind: input, shape index: {}]   ;;  %s4658_s3 = inlined_call_operand.hbm [shape: bf16[32,96], index: 3, kind: input, shape index: {}]   ;;  %s4659_s4 = inlined_call_operand.vmem [shape: f32[1,96], index: 4, kind: input, shape index: {}]   ;;  %s4660_s5 = inlined_call_operand.hbm [shape: bf16[32,32], index: 5, kind: input, shape index: {}]   ;;  %s4661_s6 = inlined_call_operand.vmem [shape: f32[1,32], index: 6, kind: input, shape index: {}]   ;;  %s4662_s7 = inlined_call_operand.hbm [shape: f32[4,64,64], index: 7, kind: input, shape index: {}]   ;;  %s4663_s8 = inlined_call_operand.hbm [shape: f32[1,64,64], index: 8, kind: input, shape index: {}]   ;;  %s4664_s9 = inlined_call_operand.hbm [shape: f32[2,16,16,32], index: 9, kind: output, shape index: {}]  }
   0x1   :  { %4675 = sst [smem:[#allocation28_spill]] %s4656_s1 }
   0x2   :  { %4676 = sst [smem:[#allocation29_spill]] %s4657_s2 }
   0x3   :  { %4677 = sst [smem:[#allocation30_spill]] %s4658_s3 }
   0x4   :  { %4678 = sst [smem:[#allocation31_spill]] %s4659_s4 }
   0x5   :  { %4679 = sst [smem:[#allocation32_spill]] %s4660_s5 }
   0x6   :  { %4680 = sst [smem:[#allocation33_spill]] %s4661_s6 }
   0x7   :  { %4681 = sst [smem:[#allocation34_spill]] %s4662_s7 }
   0x8   :  { %4682 = sst [smem:[#allocation35_spill]] %s4663_s8 }
   0x9   :  { %4683 = sst [smem:[#allocation36_spill]] %s4664_s9 }
   0xa   :  { %14 = vsyncpa [#allocation3], 0 }
   0xb   :  { %16 = vsyncpa [#allocation3 + $0x1], 0 }
   0xc   :  { %17 = vsyncpa [#allocation6], 0 }
   0xd   :  { %18 = vsyncpa [#allocation9], 0 }
   0xe   :  { %19 = vsyncpa [#allocation12], 0 }
   0xf   :  { %20 = vsyncpa [#allocation4], 0 }
  0x10   :  { %22 = vsyncpa [#allocation4 + $0x1], 0  ;;  %s3358_s30 = smov 0   ;;  %s3360_s10 = smov 0  }
  0x11   :  { %s3362_s11 = smov 0   ;;  %s3364_s12 = smov 0  }
  0x12   :  { %s3366_s13 = smov 0   ;;  %s3368_s14 = smov 0  }
  0x13   :  { %s3370_s15 = smov 0   ;;  %s3372_s16 = smov 0  }
  0x14   :  { %s3374_s17 = smov 0   ;;  %s3376_s18 = smov 0  }
  0x15 LB: > { %4684 = sst [smem:[#allocation19_spill]] %s3243_s30  ;;  %s2483_s19 = sadd.s32 4294967295, %s3279_s18   ;;  %s3279_s18 = sphi %s3376_s18, %s28_s18   ;;  %s3275_s17 = sphi %s3374_s17, %s4752_s17   ;;  %s3271_s16 = sphi %s3372_s16, %s4744_s16   ;;  %s3267_s15 = sphi %s3370_s15, %s4751_s15   ;;  %s3263_s14 = sphi %s3368_s14, %s4750_s14   ;;  %s3259_s13 = sphi %s3366_s13, %s4742_s13   ;;  %s3255_s12 = sphi %s3364_s12, %s4749_s12   ;;  %s3251_s11 = sphi %s3362_s11, %s4748_s11   ;;  %s3247_s10 = sphi %s3360_s10, %s4747_s10   ;;  %s3243_s30 = sphi %s3358_s30, %s4746_s30  }
  0x16   : > { %4685 = sst [smem:[#allocation20_spill]] %s3255_s12  ;;  %s2484_s20 = sadd.s32 4294967294, %s3279_s18  }
  0x17   : > { %4686 = sst [smem:[#allocation21_spill]] %s3259_s13  ;;  %p71_p0 = scmp.ne.s32.totalorder %s3247_s10, %s3243_s30 }
  0x18   : > { %4687 = sst [smem:[#allocation22_spill]] %s3263_s14  ;;  %p3412_p1 = scmp.eq.s32.totalorder %s2483_s19, 0 }
  0x19   : > { %4688 = sst [smem:[#allocation23_spill]] %s3271_s16  ;;  %p3416_p2 = scmp.eq.s32.totalorder %s2483_s19, 7 }
  0x1a   : > { %p273_p3 = scmp.eq.s32.totalorder %s2484_s20, 7  ;;  %p3422_p4 = por %p3412_p1, %p71_p0 }
  0x1b   : > { %p2485_p5 = scmp.ge.s32.totalorder %s3279_s18, 1  ;;  %p280_p7 = scmp.lt.s32.totalorder %s3279_s18, 9 }
  0x1c   : > { %p3427_p6 = por %p273_p3, %p71_p0  ;;  %s4694_s1 = sld [smem:[#allocation28_spill]] }
  0x1d   : > { %p3435_p8 = pnand %p2485_p5, %p280_p7  ;;  %s3281_s29 = smov [#allocation5]  }
  0x1e   : > { %s4692_s24 = scalar_select %p3427_p6, 1, 0 }
  0x1f   : > { %p2608_p9 = pneg %p3435_p8  ;;  %s294_s19 = sshll.u32 %s3281_s29, 4  ;;  %s295_s19 = int_to_ptr.vmem [resolvable:$true] %s294_s19 }
  0x20   : > { %4693 = sst [smem:[#allocation24_spill]] %s4692_s24  ;;  %s3282_s26 = smov [#allocation8]  }
  0x21   : > { %p3443_p10 = pnand %p2608_p9, %p3412_p1  ;;  %s4697_s5 = sld [smem:[#allocation32_spill]] }
  0x22   : > { %s292_s27 = sshll.u32 %s4694_s1, 4  ;;  %s325_s1 = sshll.u32 %s3282_s26, 4  ;;  %s293_s27 = int_to_ptr.hbm [resolvable:$true] %s292_s27  ;;  %s326_s1 = int_to_ptr.vmem [resolvable:$true] %s325_s1 }
  0x23   : > { %2611 = dma.hbm_to_vmem [thread:$0]  (!%p3443_p10), %s293_s27, 16, %s295_s19, [#allocation6]  }
  0x24   : > { %s4698_s3 = sld [smem:[#allocation30_spill]]  ;;  %s3283_s12 = smov 64  }
  0x25   : > { %s3284_s13 = smov 4   ;;  %s4699_s7 = sld [smem:[#allocation34_spill]] }
  0x26   : > { %s3285_s6 = smov [#allocation7]   ;;  %s3286_s9 = smov [#allocation10]  }
  0x27   : > { %s323_s25 = sshll.u32 %s4697_s5, 4  ;;  %s308_s27 = sshll.u32 %s3285_s6, 4  ;;  %s324_s25 = int_to_ptr.hbm [resolvable:$true] %s323_s25  ;;  %s309_s27 = int_to_ptr.vmem [resolvable:$true] %s308_s27 }
  0x28   : > { %2617 = dma.hbm_to_vmem [thread:$0]  (!%p3443_p10), %s324_s25, 256, %s326_s1, [#allocation9], %s3283_s12, %s3283_s12, %s3284_s13  }
  0x29   : > { %s342_s19 = sshll.u32 %s3286_s9, 4  ;;  %s4668_s1 = smov 128   ;;  %s343_s19 = int_to_ptr.vmem [resolvable:$true] %s342_s19 }
  0x2a   : > { %s306_s14 = sshll.u32 %s4698_s3, 4  ;;  %s4669_s25 = smov 8   ;;  %s307_s14 = int_to_ptr.hbm [resolvable:$true] %s306_s14 }
  0x2b   : > { %s340_s5 = sshll.u32 %s4699_s7, 4  ;;  %s4700_s8 = sld [smem:[#allocation35_spill]]  ;;  %s341_s5 = int_to_ptr.hbm [resolvable:$true] %s340_s5 }
  0x2c   : > { %2614 = dma.hbm_to_vmem [thread:$0]  (!%p3443_p10), %s307_s14, 256, %s309_s27, [#allocation6], %s3283_s12, %s3283_s12, %s3284_s13  }
  0x2d   : > { %2620 = dma.hbm_to_vmem [thread:$0]  (!%p3443_p10), %s341_s5, 4096, %s343_s19, [#allocation9], %s4668_s1, %s4668_s1, %s4669_s25  }
  0x2e   : > { %s3289_s13 = smov [#allocation11]   ;;  %s40_s29 = sadd.s32 1, %s3267_s15 }
  0x2f   : > { %s356_s14 = sshll.u32 %s3289_s13, 4  ;;  %p41_p11 = scmp.ge.s32.totalorder %s40_s29, 2  ;;  %s357_s14 = int_to_ptr.vmem [resolvable:$true] %s356_s14 }
  0x30   : > { %s43_s5 = sadd.s32 1, %s3271_s16  ;;  %s47_s30 = sadd.s32 1, %s3275_s17 }
  0x31   : > { %s354_s12 = sshll.u32 %s4700_s8, 4  ;;  %s4754_s29 = smov (%p41_p11, %s40_s29), 0  ;;  %s355_s12 = int_to_ptr.hbm [resolvable:$true] %s354_s12 }
  0x32   : > { %2623 = dma.hbm_to_vmem [thread:$0]  (!%p3443_p10), %s355_s12, 1024, %s357_s14, [#allocation12], %s4668_s1, %s4668_s1, %s4669_s25  }
  0x33   : > { %4701 = sst [smem:[#allocation25_spill]] %s4754_s29  ;;  %s4756_s5 = smov (!%p41_p11, %s43_s5), %s3271_s16 }
  0x34   : > { %s54_s27 = ssub.s32 %s3267_s15, %s4754_s29  ;;  %p65_p12 = scmp.ne.s32.totalorder %s3251_s11, %s3247_s10 }
  0x35   : > { %p45_p13 = scmp.ge.s32.totalorder %s4756_s5, 2  ;;  %p66_p0 = scmp.eq.s32.totalorder %s3279_s18, 0 }
  0x36   : > { %p3489_p3 = por %p3416_p2, %p65_p12  ;;  %p2637_p5 = scmp.lt.s32.totalorder %s3279_s18, 8 }
  0x37   : > { %s4758_s5 = smov (%p45_p13, %s4756_s5), 0  ;;  %s4760_s30 = smov (!%p45_p13, %s47_s30), %s3275_s17 }
  0x38   : > { %s4702_s20 = scalar_select %p3489_p3, 1, 0 }
  0x39   : > { %4704 = sst [smem:[#allocation27_spill]] %s4758_s5  ;;  %s52_s9 = ssub.s32 %s3271_s16, %s4758_s5 }
  0x3a   : > { %4703 = sst [smem:[#allocation26_spill]] %s4702_s20  ;;  %p3499_p7 = por %p66_p0, %p65_p12 }
  0x3b   : > { %p49_p9 = scmp.ge.s32.totalorder %s4760_s30, 2  ;;  %s370_s6 = sand.u32 1, %s3251_s11  }
  0x3c   : > { %s2492_s26 = sshll.u32 %s370_s6, 6  ;;  %s2568_s22 = sshll.u32 %s3271_s16, 4 }
  0x3d   : > { %s4762_s30 = smov (%p49_p9, %s4760_s30), 0  ;;  %s379_s13 = sadd.s32 %s3267_s15, %s2568_s22 }
  0x3e   : > { %s51_s12 = ssub.s32 %s3275_s17, %s4762_s30  ;;  %s2495_s1 = sshll.u32 %s3275_s17, 5 }
  0x3f   : > { %s53_s14 = sor.u32 %s52_s9, %s51_s12  ;;  %s381_s24 = sadd.s32 %s2495_s1, %s379_s13 }
  0x40   : > { %s55_s25 = sor.u32 %s54_s27, %s53_s14  ;;  %s2496_s3 = sshll.u32 %s381_s24, 3 }
  0x41   : > { %p56_p2 = scmp.eq.s32.totalorder %s55_s25, 0  ;;  %s383_s5 = scalar_lea.hbm %s4655_s0, %s2496_s3 }
  0x42   : > { %s374_s29 = scalar_lea.vmem [#allocation2], %s2492_s26  ;;  %s4706_s4 = sadd.s32 1, %s3251_s11 }
  0x43   : > { %s386_s20 = sshll.u32 %s374_s29, 4  ;;  %s384_s16 = sshll.u32 %s383_s5, 4  ;;  %s387_s20 = int_to_ptr.vmem [resolvable:$true] %s386_s20  ;;  %s385_s16 = int_to_ptr.hbm [resolvable:$true] %s384_s16 }
  0x44   : > { %s3517_s2 = scalar_select %p56_p2, %s3251_s11, %s4706_s4  }
  0x45   : > { %p2625_p10 = pnand %p2637_p5, %p3499_p7  ;;  %s371_s9 = scalar_lea.sflag [#allocation3], %s370_s6 }
  0x46   : > { %s3290_s27 = smov 256   ;;  %s4707_s1 = smov 8  }
  0x47   : > { %s4708_s25 = smov 128   ;;  %398 = sbr.rel (%p3435_p8) target bundleno = 2167 (0x877), region = 56 }
  0x48   : > { %2627 = dma.hbm_to_vmem [thread:$0]  (!%p2625_p10), %s385_s16, 1024, %s387_s20, %s371_s9, %s3290_s27, %s4708_s25, %s4707_s1  }
  0x49   : > { %s3528_s3 = sand.u32 (!%p3435_p8), 1, %s3247_s10  }
  0x4a   : > { %s2498_s4 = sshll.u32 (!%p3435_p8), %s3528_s3, 6  ;;  %s401_s7 = scalar_lea.sflag (!%p3435_p8), [#allocation3], %s3528_s3 }
  0x4b   : > { %s3534_s8 = scalar_lea.vmem (!%p3435_p8), [#allocation2], %s2498_s4 }
  0x4c   : > { %3222 = dma.done.wait (%p3422_p4), %s401_s7, 1024  }
  0x4d   : > { %3224 = vsyncadd (%p3422_p4), %s401_s7, 4294966272 }
  0x4e   : > { %3226 = dma.done.wait (%p3412_p1), [#allocation6], 272  }
  0x4f   : > { %3228 = vsyncadd (%p3412_p1), [#allocation6], 4294967024 }
  0x50   : > { %3230 = dma.done.wait (%p3412_p1), [#allocation9], 4352  }
  0x51   : > { %3232 = vsyncadd (%p3412_p1), [#allocation9], 4294962944 }
  0x52   : > { %3234 = dma.done.wait (%p3412_p1), [#allocation12], 1024  }
  0x53   : > { %3236 = vsyncadd (%p3412_p1), [#allocation12], 4294966272  ;;  %vm476_vm0 = vcmask 261120   ;;  %v474_v0 = vld [vmem:[%s3534_s8 + $0x30] sm:$0xff]  ;;  %v472_v1 = vld [vmem:[%s3534_s8 + $0x20] sm:$0xff]  ;;  %v3291_v14 = vmov 32.0  }
  0x54   : > { %v470_v2 = vld [vmem:[%s3534_s8 + $0x10] sm:$0xff]  ;;  %v495_v3 = vsel %vm476_vm0, %v474_v0, 0.0  ;;  %v489_v4 = vsel %vm476_vm0, %v472_v1, 0.0  ;;  %v475_v6 = vld [vmem:[%s3534_s8 + $0x38] sm:$0xff]  ;;  %v473_v7 = vld [vmem:[%s3534_s8 + $0x28] sm:$0xff]  ;;  %2815 = vrcp.f32 %v3291_v14  ;;  %s4709_s23 = sld [smem:[#allocation29_spill]] }
  0x55   : > { %v483_v5 = vsel %vm476_vm0, %v470_v2, 0.0  ;;  %496 = vadd.xlane.f32.xlu2 %v495_v3  ;;  %490 = vadd.xlane.f32.xlu1 %v489_v4  ;;  %v471_v8 = vld [vmem:[%s3534_s8 + $0x18] sm:$0xff]  ;;  %v498_v9 = vsel %vm476_vm0, %v475_v6, 0.0  ;;  %v492_v10 = vsel %vm476_vm0, %v473_v7, 0.0  ;;  %v468_v12 = vld [vmem:[%s3534_s8] sm:$0xff]  ;;  %v469_v36 = vld [vmem:[%s3534_s8 + $0x8] sm:$0xff] }
  0x56   : > { %484 = vadd.xlane.f32.xlu0 %v483_v5  ;;  %v486_v11 = vsel %vm476_vm0, %v471_v8, 0.0  ;;  %v477_v13 = vsel %vm476_vm0, %v468_v12, 0.0  ;;  %v480_v42 = vsel %vm476_vm0, %v469_v36, 0.0  ;;  %v2570_v58 = vld [vmem:[#allocation7 + $0x8] sm:$0xff]  ;;  %v2569_v62 = vld [vmem:[#allocation7] sm:$0xff]  ;;  %s4710_s5 = sld [smem:[#allocation31_spill]] }
  0x57   : > { %2574 = vmatpush.bf16.msra.mxu3 %v2570_v58  ;;  %726 = vmatpush.bf16.msra.mxu0 %v2570_v58  ;;  %s3292_s24 = smov 96   ;;  %s3293_s20 = smov 88  }
  0x58   : > { %s3294_s19 = smov 64   ;;  %s3295_s6 = smov 120  }
  0x59   : > { %s3296_s26 = smov 72   ;;  %s3297_s22 = smov 80  }
  0x5a   : > { %v2816_v15 = vpop.eup %2815  ;;  %s3298_s12 = smov 112   ;;  %s3299_s13 = smov 104  }
  0x5b   : > { %v502_v16 = vmul.f32 32.0, %v2816_v15  ;;  %vm506_vm1 = vweird.f32 %v2816_v15  ;;  %2575 = vmatpush.bf16.msra.mxu3 %v2569_v62  ;;  %727 = vmatpush.bf16.msra.mxu0 %v2569_v62  ;;  %s3300_s14 = smov 56   ;;  %s3301_s9 = smov 48  }
  0x5c   : > { %s3302_s27 = smov 40   ;;  %s3303_s1 = smov 8  }
  0x5d   : > { %499 = vadd.xlane.f32.xlu2 %v498_v9  ;;  %493 = vadd.xlane.f32.xlu1 %v492_v10  ;;  %v503_v17 = vsub.f32 1.0, %v502_v16  ;;  %s3304_s25 = smov 24   ;;  %s3305_s7 = smov 16  }
  0x5e   : > { %487 = vadd.xlane.f32.xlu0 %v486_v11  ;;  %s4577_s28 = scalar_lea.vmem [#allocation13], %s2498_s4  ;;  %s4734_s29 = sld [smem:[#allocation21_spill]] }
  0x5f   : > { %v504_v18 = vmul.f32 %v2816_v15, %v503_v17  ;;  %s4735_s4 = sld [smem:[#allocation20_spill]]  ;;  %s2318_s16 = scalar_lea.sflag [#allocation4], %s3528_s3 }
  0x61   : > { %v505_v19 = vadd.f32 %v2816_v15, %v504_v18 }
  0x63   : > { %v3566_v20 = vsel %vm506_vm1, %v2816_v15, %v505_v19 }
  0x65   : > { %478 = vadd.xlane.f32.xlu2 %v477_v13 }
  0xc8   : > { %v497_v21 = vpop.xlane.xlu2 %496  ;;  %v491_v22 = vpop.xlane.xlu1 %490 }
  0xc9   : > { %v485_v23 = vpop.xlane.xlu0 %484  ;;  %v514_v32 = vmul.f32 %v3566_v20, %v497_v21  ;;  %v512_v33 = vmul.f32 %v3566_v20, %v491_v22 }
  0xca   : > { %v510_v24 = vmul.f32 %v3566_v20, %v485_v23 }
  0xcb   : > { %v3585_v39 = vsub.f32 %v474_v0, %v514_v32  ;;  %v3587_v40 = vsub.f32 %v472_v1, %v512_v33 }
  0xcc   : > { %v3569_v25 = vsub.f32 %v470_v2, %v510_v24 }
  0xcd   : > { %v528_v48 = vmul.f32 %v3587_v40, %v3587_v40  ;;  %v530_v49 = vmul.f32 %v3585_v39, %v3585_v39 }
  0xce   : > { %v526_v26 = vmul.f32 %v3569_v25, %v3569_v25 }
  0xcf   : > { %v544_v53 = vsel %vm476_vm0, %v528_v48, 0.0  ;;  %v550_v54 = vsel %vm476_vm0, %v530_v49, 0.0 }
  0xd0   : > { %v500_v27 = vpop.xlane.xlu2 %499  ;;  %v494_v28 = vpop.xlane.xlu1 %493  ;;  %v538_v29 = vsel %vm476_vm0, %v526_v26, 0.0 }
  0xd1   : > { %v513_v30 = vmul.f32 %v3566_v20, %v494_v28  ;;  %539 = vadd.xlane.f32.xlu0 %v538_v29  ;;  %v488_v31 = vpop.xlane.xlu0 %487  ;;  %v515_v47 = vmul.f32 %v3566_v20, %v500_v27 }
  0xd2   : > { %v511_v34 = vmul.f32 %v3566_v20, %v488_v31 }
  0xd3   : > { %v3578_v35 = vsub.f32 %v473_v7, %v513_v30  ;;  %v3604_v52 = vsub.f32 %v475_v6, %v515_v47 }
  0xd4   : > { %v3581_v37 = vsub.f32 %v471_v8, %v511_v34 }
  0xd5   : > { %v529_v38 = vmul.f32 %v3578_v35, %v3578_v35  ;;  %v531_v56 = vmul.f32 %v3604_v52, %v3604_v52 }
  0xd6   : > { %v527_v41 = vmul.f32 %v3581_v37, %v3581_v37 }
  0xd7   : > { %v547_v43 = vsel %vm476_vm0, %v529_v38, 0.0  ;;  %v553_v57 = vsel %vm476_vm0, %v531_v56, 0.0 }
  0xd8   : > { %v541_v44 = vsel %vm476_vm0, %v527_v41, 0.0  ;;  %548 = vadd.xlane.f32.xlu2 %v547_v43  ;;  %v479_v45 = vpop.xlane.xlu2 %478 }
  0xd9   : > { %542 = vadd.xlane.f32.xlu1 %v541_v44  ;;  %481 = vadd.xlane.f32.xlu0 %v480_v42  ;;  %v508_v46 = vmul.f32 %v3566_v20, %v479_v45  ;;  %v3633_v44 = vld [vmem:[#allocation5] ss:$0 sm:$0xff] }
  0xdb   : > { %v3600_v50 = vsub.f32 %v468_v12, %v508_v46 }
  0xdd   : > { %v524_v51 = vmul.f32 %v3600_v50, %v3600_v50 }
  0xdf   : > { %v532_v55 = vsel %vm476_vm0, %v524_v51, 0.0 }
  0xe0   : > { %533 = vadd.xlane.f32.xlu2 %v532_v55 }
  0xe1   : > { %545 = vadd.xlane.f32.xlu1 %v544_v53  ;;  %551 = vadd.xlane.f32.xlu0 %v550_v54  ;;  %v3640_v53 = vld [vmem:[%s4709_s23] ss:$0 sm:$0xff]  ;;  %s4733_s23 = sld [smem:[#allocation33_spill]] }
  0xe9   : > { %554 = vadd.xlane.f32.xlu1 %v553_v57 }
 0x144   : > { %v540_v59 = vpop.xlane.xlu0 %539 }
 0x145   : > { %v558_v60 = vmul.f32 %v540_v59, %v3566_v20 }
 0x147   : > { %v566_v61 = vadd.f32 1e-05, %v558_v60 }
 0x149   : > { %2817 = vrsqrt.f32 %v566_v61  ;;  %vm598_vm3 = vweird.f32 %v566_v61 }
 0x14b   : > { %v549_v63 = vpop.xlane.xlu2 %548 }
 0x14c   : > { %v543_v0 = vpop.xlane.xlu1 %542  ;;  %v482_v1 = vpop.xlane.xlu0 %481  ;;  %v561_v2 = vmul.f32 %v549_v63, %v3566_v20 }
 0x14d   : > { %v559_v3 = vmul.f32 %v543_v0, %v3566_v20  ;;  %v509_v4 = vmul.f32 %v3566_v20, %v482_v1 }
 0x14e   : > { %v3616_v5 = vadd.f32 1e-05, %v561_v2 }
 0x14f   : > { %v2818_v6 = vpop.eup %2817  ;;  %v567_v7 = vadd.f32 1e-05, %v559_v3  ;;  %v3618_v8 = vsub.f32 %v469_v36, %v509_v4 }
 0x150   : > { %v593_v9 = vmul.f32 %v2818_v6, %v566_v61  ;;  %2819 = vrsqrt.f32 %v3616_v5  ;;  %vm599_vm2 = vweird.f32 %v2818_v6  ;;  %vm628_vm10 = vweird.f32 %v3616_v5 }
 0x151   : > { %2821 = vrsqrt.f32 %v567_v7  ;;  %v525_v10 = vmul.f32 %v3618_v8, %v3618_v8  ;;  %vm600_vm4 = vmor %vm598_vm3, %vm599_vm2  ;;  %vm608_vm5 = vweird.f32 %v567_v7 }
 0x152   : > { %v594_v11 = vmul.f32 %v2818_v6, %v593_v9 }
 0x153   : > { %v535_v12 = vsel %vm476_vm0, %v525_v10, 0.0 }
 0x154   : > { %v595_v13 = vmul.f32 0.5, %v594_v11  ;;  %v546_v14 = vpop.xlane.xlu1 %545  ;;  %536 = vadd.xlane.f32.xlu0 %v535_v12  ;;  %v552_v16 = vpop.xlane.xlu0 %551 }
 0x155   : > { %v560_v15 = vmul.f32 %v546_v14, %v3566_v20  ;;  %v562_v23 = vmul.f32 %v552_v16, %v3566_v20 }
 0x156   : > { %v3625_v17 = vpop.eup %2819  ;;  %v596_v18 = vsub.f32 1.5, %v595_v13 }
 0x157   : > { %v2822_v19 = vpop.eup %2821  ;;  %v568_v21 = vadd.f32 1e-05, %v560_v15  ;;  %v623_v26 = vmul.f32 %v3625_v17, %v3616_v5  ;;  %v570_v29 = vadd.f32 1e-05, %v562_v23  ;;  %vm629_vm11 = vweird.f32 %v3625_v17 }
 0x158   : > { %v603_v22 = vmul.f32 %v2822_v19, %v567_v7  ;;  %v597_v24 = vmul.f32 %v2818_v6, %v596_v18  ;;  %vm609_vm6 = vweird.f32 %v2822_v19  ;;  %vm630_vm13 = vmor %vm628_vm10, %vm629_vm11  ;;  %vm793_vm11 = vcmask 64512  }
 0x159   : > { %2823 = vrsqrt.f32 %v568_v21  ;;  %v624_v32 = vmul.f32 %v3625_v17, %v623_v26  ;;  %vm610_vm7 = vmor %vm608_vm5, %vm609_vm6  ;;  %vm618_vm8 = vweird.f32 %v568_v21  ;;  %vm638_vm1 = vweird.f32 %v570_v29 }
 0x15a   : > { %v604_v27 = vmul.f32 %v2822_v19, %v603_v22  ;;  %v601_v31 = vsel %vm600_vm4, %v2818_v6, %v597_v24  ;;  %2825 = vrsqrt.f32 %v570_v29 }
 0x15b   : > { %v654_v41 = vmul.f32 %v601_v31, %v3569_v25  ;;  %v625_v45 = vmul.f32 0.5, %v624_v32 }
 0x15c   : > { %v605_v28 = vmul.f32 0.5, %v604_v27  ;;  %v555_v30 = vpop.xlane.xlu1 %554  ;;  %v534_v27 = vpop.xlane.xlu2 %533 }
 0x15d   : > { %v563_v33 = vmul.f32 %v555_v30, %v3566_v20  ;;  %v666_v51 = vmul.f32 %v3633_v44, %v654_v41  ;;  %v626_v25 = vsub.f32 1.5, %v625_v45 }
 0x15e   : > { %v606_v34 = vsub.f32 1.5, %v605_v28  ;;  %v556_v28 = vmul.f32 %v534_v27, %v3566_v20 }
 0x15f   : > { %v2824_v36 = vpop.eup %2823  ;;  %v571_v38 = vadd.f32 1e-05, %v563_v33  ;;  %v678_v59 = vadd.f32 %v3640_v53, %v666_v51  ;;  %v627_v60 = vmul.f32 %v3625_v17, %v626_v25 }
 0x160   : > { %v607_v42 = vmul.f32 %v2822_v19, %v606_v34  ;;  %v613_v43 = vmul.f32 %v2824_v36, %v568_v21  ;;  %vm619_vm9 = vweird.f32 %v2824_v36  ;;  %v2826_v55 = vpop.eup %2825 }
 0x161   : > { %2827 = vrsqrt.f32 %v571_v38  ;;  %vm620_vm12 = vmor %vm618_vm8, %vm619_vm9  ;;  %v633_v61 = vmul.f32 %v2826_v55, %v570_v29  ;;  %v631_v2 = vsel %vm630_vm13, %v3625_v17, %v627_v60  ;;  %vm648_vm14 = vweird.f32 %v571_v38 }
 0x162   : > { %v611_v46 = vsel %vm610_vm7, %v2822_v19, %v607_v42  ;;  %v614_v47 = vmul.f32 %v2824_v36, %v613_v43  ;;  %v657_v6 = vmul.f32 %v631_v2, %v3578_v35  ;;  %vm639_vm2 = vweird.f32 %v2826_v55 }
 0x163   : > { %v655_v48 = vmul.f32 %v611_v46, %v3581_v37  ;;  %v634_v3 = vmul.f32 %v2826_v55, %v633_v61  ;;  %vm640_vm4 = vmor %vm638_vm1, %vm639_vm2  ;;  %v564_v29 = vadd.f32 1e-05, %v556_v28 }
 0x164   : > { %v615_v49 = vmul.f32 0.5, %v614_v47  ;;  %v669_v11 = vmul.f32 %v3633_v44, %v657_v6 }
 0x165   : > { %v667_v54 = vmul.f32 %v3633_v44, %v655_v48  ;;  %v635_v7 = vmul.f32 0.5, %v634_v3  ;;  %2829 = vrsqrt.f32 %v564_v29  ;;  %vm578_vm5 = vweird.f32 %v564_v29 }
 0x166   : > { %v616_v56 = vsub.f32 1.5, %v615_v49 }
 0x167   : > { %v679_v37 = vadd.f32 %v3640_v53, %v667_v54  ;;  %v2828_v57 = vpop.eup %2827  ;;  %v636_v12 = vsub.f32 1.5, %v635_v7 }
 0x168   : > { %v617_v58 = vmul.f32 %v2824_v36, %v616_v56  ;;  %v643_v62 = vmul.f32 %v2828_v57, %v571_v38  ;;  %vm649_vm15 = vweird.f32 %v2828_v57 }
 0x169   : > { %v685_v63 = vpack.c.bf16 %v679_v37, %v678_v59  ;;  %vm650_vm3 = vmor %vm648_vm14, %vm649_vm15  ;;  %v637_v15 = vmul.f32 %v2826_v55, %v636_v12 }
 0x16a   : > { %v621_v0 = vsel %vm620_vm12, %v2824_v36, %v617_v58  ;;  %v644_v1 = vmul.f32 %v2828_v57, %v643_v62  ;;  %vm855_vm12 = vcmask 523264  }
 0x16b   : > { %2514 = vmatmul.msk.bf16.vlgmr.msra.gmra.mxu3 %vm476_vm0, %v685_v63  ;;  %v656_v4 = vmul.f32 %v621_v0, %v3587_v40  ;;  %v681_v40 = vadd.f32 %v3640_v53, %v669_v11  ;;  %v641_v17 = vsel %vm640_vm4, %v2826_v55, %v637_v15  ;;  %v2830_v30 = vpop.eup %2829 }
 0x16c   : > { %v645_v5 = vmul.f32 0.5, %v644_v1  ;;  %v658_v19 = vmul.f32 %v641_v17, %v3585_v39  ;;  %vm579_vm6 = vweird.f32 %v2830_v30 }
 0x16d   : > { %v668_v9 = vmul.f32 %v3633_v44, %v656_v4  ;;  %vm580_vm7 = vmor %vm578_vm5, %vm579_vm6 }
 0x16e   : > { %v646_v10 = vsub.f32 1.5, %v645_v5  ;;  %v670_v22 = vmul.f32 %v3633_v44, %v658_v19 }
 0x16f   : > { %v680_v13 = vadd.f32 %v3640_v53, %v668_v9 }
 0x170   : > { %v647_v14 = vmul.f32 %v2828_v57, %v646_v10  ;;  %v682_v24 = vadd.f32 %v3640_v53, %v670_v22 }
 0x171   : > { %v686_v35 = vpack.c.bf16 %v681_v40, %v680_v13 }
 0x172   : > { %v651_v16 = vsel %vm650_vm3, %v2828_v57, %v647_v14 }
 0x173   : > { %v659_v18 = vmul.f32 %v651_v16, %v3604_v52  ;;  %v573_v52 = vmul.f32 %v2830_v30, %v564_v29 }
 0x175   : > { %v671_v21 = vmul.f32 %v3633_v44, %v659_v18  ;;  %v574_v31 = vmul.f32 %v2830_v30, %v573_v52 }
 0x177   : > { %v683_v23 = vadd.f32 %v3640_v53, %v671_v21  ;;  %v575_v34 = vmul.f32 0.5, %v574_v31 }
 0x179   : > { %v687_v26 = vpack.c.bf16 %v683_v23, %v682_v24  ;;  %v576_v36 = vsub.f32 1.5, %v575_v34 }
 0x17b   : > { %2515 = vmatmul.msk.bf16.gmra.mxu3 %vm476_vm0, %v686_v35  ;;  %v577_v41 = vmul.f32 %v2830_v30, %v576_v36 }
 0x17d   : > { %v581_v45 = vsel %vm580_vm7, %v2830_v30, %v577_v41 }
 0x17e   : > { %v652_v48 = vmul.f32 %v581_v45, %v3600_v50  ;;  %v2813_v50 = vld [vmem:[%s4710_s5] ss:$0 sm:$0xff]  ;;  %s4736_s5 = sld [smem:[#allocation22_spill]] }
 0x180   : > { %v664_v25 = vmul.f32 %v3633_v44, %v652_v48 }
 0x182   : > { %v676_v55 = vadd.f32 %v3640_v53, %v664_v25 }
 0x18b   : > { %2516 = vmatmul.msk.bf16.gmra.mxu3 %vm476_vm0, %v687_v26 }
 0x1c7   : > { %v537_v39 = vpop.xlane.xlu0 %536 }
 0x1c8   : > { %v557_v32 = vmul.f32 %v537_v39, %v3566_v20 }
 0x1ca   : > { %v565_v33 = vadd.f32 1e-05, %v557_v32 }
 0x1cc   : > { %2831 = vrsqrt.f32 %v565_v33  ;;  %vm588_vm9 = vweird.f32 %v565_v33 }
 0x1d2   : > { %v2832_v38 = vpop.eup %2831 }
 0x1d3   : > { %v583_v42 = vmul.f32 %v2832_v38, %v565_v33  ;;  %vm589_vm8 = vweird.f32 %v2832_v38 }
 0x1d4   : > { %vm590_vm10 = vmor %vm588_vm9, %vm589_vm8 }
 0x1d5   : > { %v584_v43 = vmul.f32 %v2832_v38, %v583_v42 }
 0x1d7   : > { %v585_v46 = vmul.f32 0.5, %v584_v43 }
 0x1d9   : > { %v586_v47 = vsub.f32 1.5, %v585_v46 }
 0x1db   : > { %v587_v49 = vmul.f32 %v2832_v38, %v586_v47 }
 0x1dd   : > { %v591_v20 = vsel %vm590_vm10, %v2832_v38, %v587_v49 }
 0x1de   : > { %v653_v51 = vmul.f32 %v591_v20, %v3618_v8 }
 0x1e0   : > { %v665_v54 = vmul.f32 %v3633_v44, %v653_v51 }
 0x1e2   : > { %v677_v56 = vadd.f32 %v3640_v53, %v665_v54 }
 0x1e4   : > { %v684_v37 = vpack.c.bf16 %v677_v56, %v676_v55 }
 0x1e6   : > { %2513 = vmatmul.msk.bf16.vlgmr.msra.gmra.mxu0 %vm476_vm0, %v684_v37 }
 0x1ee   : > { %v734_v57 = vpop.f32.mrf.mxu3 }
 0x1ef   : > { %v735_v58 = vadd.f32 %v2813_v50, %v734_v57 }
 0x1f1   : > { %v759_v8 = vmul.f32 0.35355338, %v735_v58 }
 0x1f6   : > { %v736_v59 = vpop.f32.mrf.mxu3 }
 0x1f7   : > { %v737_v60 = vadd.f32 %v2813_v50, %v736_v59 }
 0x1f9   : > { %v760_v61 = vmul.f32 0.35355338, %v737_v60  ;;  %v3676_v62 = vpack.c.bf16 %v737_v60, %v735_v58 }
 0x1fb   : > { %v3678_v44 = vpack.c.bf16 %v760_v61, %v759_v8  ;;  %787 = vrot.lane.b32.xlu0 %v3676_v62, %s3292_s24 }
 0x1fe   : > { %v739_v53 = vpop.f32.mrf.mxu3 }
 0x1ff   : > { %v740_v63 = vadd.f32 %v2813_v50, %v739_v53 }
 0x201   : > { %v761_v2 = vmul.f32 0.35355338, %v740_v63 }
 0x206   : > { %v741_v0 = vpop.f32.mrf.mxu3 }
 0x207   : > { %v742_v1 = vadd.f32 %v2813_v50, %v741_v0 }
 0x209   : > { %v762_v3 = vmul.f32 0.35355338, %v742_v1  ;;  %v3682_v4 = vpack.c.bf16 %v742_v1, %v740_v63 }
 0x20b   : > { %v3684_v5 = vpack.c.bf16 %v762_v3, %v761_v2  ;;  %1130 = vrot.lane.b32.xlu0 %v3682_v4, %s3293_s20  ;;  %789 = vrot.lane.b32.xlu2 %v3682_v4, %s3292_s24 }
 0x20e   : > { %v744_v6 = vpop.f32.mrf.mxu3 }
 0x20f   : > { %v745_v7 = vadd.f32 %v2813_v50, %v744_v6 }
 0x211   : > { %v763_v11 = vmul.f32 0.35355338, %v745_v7 }
 0x216   : > { %v746_v9 = vpop.f32.mrf.mxu3 }
 0x217   : > { %v747_v10 = vadd.f32 %v2813_v50, %v746_v9 }
 0x219   : > { %v764_v12 = vmul.f32 0.35355338, %v747_v10  ;;  %v3690_v13 = vpack.c.bf16 %v747_v10, %v745_v7  ;;  %v777_v10 = vld [vmem:[#allocation10 + $0x20] sm:$0xff] }
 0x21b   : > { %v3692_v14 = vpack.c.bf16 %v764_v12, %v763_v11  ;;  %791 = vrot.lane.b32.xlu1 %v3690_v13, %s3292_s24  ;;  %v3769_v12 = vld [vmem:[#allocation11 + $0x20] sm:$0xff] }
 0x223   : > { %1128 = vrot.lane.b32.xlu1 %v3676_v62, %s3293_s20 }
 0x263   : > { %v729_v40 = vpop.f32.mrf.mxu0 }
 0x264   : > { %v730_v15 = vadd.f32 %v2813_v50, %v729_v40 }
 0x265   : > { %v790_v24 = vpop.permute.xlu2 %789 }
 0x266   : > { %v757_v17 = vmul.f32 0.35355338, %v730_v15  ;;  %v813_v26 = vsel %vm793_vm11, %v790_v24, 0  ;;  %v779_v24 = vld [vmem:[#allocation10 + $0x30] sm:$0xff] }
 0x26b   : > { %v731_v35 = vpop.f32.mrf.mxu0 }
 0x26c   : > { %v732_v16 = vadd.f32 %v2813_v50, %v731_v35 }
 0x26d   : > { %v788_v27 = vpop.permute.xlu0 %787 }
 0x26e   : > { %v758_v18 = vmul.f32 0.35355338, %v732_v16  ;;  %v3698_v19 = vpack.c.bf16 %v732_v16, %v730_v15  ;;  %v810_v28 = vsel %vm793_vm11, %v788_v27, 0  ;;  %v778_v16 = vld [vmem:[#allocation10 + $0x28] sm:$0xff]  ;;  %v3777_v27 = vld [vmem:[#allocation11 + $0x30] sm:$0xff] }
 0x270   : > { %v765_v21 = vpack.c.bf16 %v758_v18, %v757_v17  ;;  %1052 = vrot.lane.b32.xlu1 %v3698_v19, %s3294_s19  ;;  %785 = vrot.lane.b32.xlu2 %v3698_v19, %s3292_s24  ;;  %v3773_v18 = vld [vmem:[#allocation11 + $0x28] sm:$0xff]  ;;  %s2573_s24 = sshll.u32 %s4734_s29, 4 }
 0x272   : > { %1118 = vrot.lane.b32.xlu0 %v765_v21, %s3295_s6 }
 0x278   : > { %1122 = vrot.lane.b32.xlu1 %v3684_v5, %s3295_s6  ;;  %1126 = vrot.lane.b32.xlu2 %v3698_v19, %s3293_s20 }
 0x27a   : > { %1800 = vrot.lane.b32.xlu0 %v3682_v4, %s3296_s26 }
 0x27d   : > { %v1131_v39 = vpop.permute.xlu0 %1130 }
 0x27e   : > { %v1153_v51 = vsel %vm793_vm11, %v1131_v39, 0  ;;  %v3781_v39 = vld [vmem:[#allocation11 + $0x38] sm:$0xff] }
 0x280   : > { %1465 = vrot.lane.b32.xlu1 %v3682_v4, %s3297_s22  ;;  %1120 = vrot.lane.b32.xlu2 %v3678_v44, %s3295_s6 }
 0x282   : > { %1798 = vrot.lane.b32.xlu0 %v3676_v62, %s3296_s26 }
 0x288   : > { %1461 = vrot.lane.b32.xlu1 %v3698_v19, %s3297_s22  ;;  %1056 = vrot.lane.b32.xlu2 %v3682_v4, %s3294_s19 }
 0x28a   : > { %1796 = vrot.lane.b32.xlu0 %v3698_v19, %s3296_s26 }
 0x28d   : > { %v792_v22 = vpop.permute.xlu1 %791 }
 0x28e   : > { %v816_v23 = vsel %vm793_vm11, %v792_v22, 0 }
 0x28f   : > { %822 = vmatpush.bf16.xpose.msra.mxu1 %v816_v23 }
 0x290   : > { %1054 = vrot.lane.b32.xlu2 %v3676_v62, %s3294_s19  ;;  %1453 = vrot.lane.b32.xlu1 %v765_v21, %s3298_s12 }
 0x292   : > { %1788 = vrot.lane.b32.xlu0 %v765_v21, %s3299_s13 }
 0x295   : > { %v1129_v45 = vpop.permute.xlu1 %1128 }
 0x296   : > { %v1150_v55 = vsel %vm793_vm11, %v1129_v45, 0 }
 0x297   : > { %823 = vmatpush.bf16.xpose.msra.mxu1 %v813_v26 }
 0x298   : > { %1463 = vrot.lane.b32.xlu2 %v3676_v62, %s3297_s22  ;;  %1124 = vrot.lane.b32.xlu1 %v3692_v14, %s3295_s6 }
 0x29a   : > { %1467 = vrot.lane.b32.xlu0 %v3690_v13, %s3297_s22 }
 0x29f   : > { %824 = vmatpush.bf16.xpose.msra.mxu1 %v810_v28 }
 0x2a0   : > { %1455 = vrot.lane.b32.xlu2 %v3678_v44, %s3298_s12 }
 0x2a2   : > { %1802 = vrot.lane.b32.xlu0 %v3690_v13, %s3296_s26 }
 0x2a8   : > { %1132 = vrot.lane.b32.xlu2 %v3690_v13, %s3293_s20  ;;  %s2329_s20 = sadd.s32 %s4735_s4, %s2573_s24 }
 0x2b0   : > { %1058 = vrot.lane.b32.xlu2 %v3690_v13, %s3294_s19  ;;  %s2564_s19 = sshll.u32 %s4736_s5, 5 }
 0x2b1   : > { %s2331_s6 = sadd.s32 %s2564_s19, %s2329_s20 }
 0x2b2   : > { %s2565_s26 = sshll.u32 %s2331_s6, 3 }
 0x2ca   : > { %v786_v29 = vpop.permute.xlu2 %785 }
 0x2cb   : > { %v807_v30 = vsel %vm793_vm11, %v786_v29, 0 }
 0x2cc   : > { %825 = vmatpush.bf16.xpose.msra.mxu1 %v807_v30 }
 0x2d2   : > { %v1127_v52 = vpop.permute.xlu2 %1126 }
 0x2d3   : > { %2517 = vmatmul.msk.bf16.vlgmr.msra.gmra.mxu1 %vm793_vm11, %v765_v21  ;;  %v1147_v57 = vsel %vm793_vm11, %v1127_v52, 0  ;;  %v780_v52 = vld [vmem:[#allocation10 + $0x38] sm:$0xff] }
 0x2da   : > { %v1121_v31 = vpop.permute.xlu2 %1120 }
 0x2e2   : > { %v1057_v32 = vpop.permute.xlu2 %1056  ;;  %v1053_v49 = vpop.permute.xlu1 %1052 }
 0x2e3   : > { %2518 = vmatmul.msk.bf16.gmra.mxu1 %vm793_vm11, %v3678_v44 }
 0x2e4   : > { %v1119_v33 = vpop.permute.xlu0 %1118 }
 0x2ea   : > { %v1055_v34 = vpop.permute.xlu2 %1054  ;;  %v1123_v54 = vpop.permute.xlu1 %1122 }
 0x2ec   : > { %v1801_v36 = vpop.permute.xlu0 %1800 }
 0x2ed   : > { %v1823_v60 = vsel %vm793_vm11, %v1801_v36, 0 }
 0x2f2   : > { %v1464_v38 = vpop.permute.xlu2 %1463  ;;  %v1466_v58 = vpop.permute.xlu1 %1465 }
 0x2f3   : > { %2519 = vmatmul.msk.bf16.gmra.mxu1 %vm793_vm11, %v3684_v5  ;;  %v1488_v59 = vsel %vm793_vm11, %v1466_v58, 0  ;;  %v1485_v8 = vsel %vm793_vm11, %v1464_v38, 0 }
 0x2f4   : > { %v1799_v41 = vpop.permute.xlu0 %1798 }
 0x2f5   : > { %v1820_v61 = vsel %vm793_vm11, %v1799_v41, 0 }
 0x2fa   : > { %v3738_v42 = vpop.permute.xlu2 %1455  ;;  %v1462_v53 = vpop.permute.xlu1 %1461 }
 0x2fb   : > { %v1482_v63 = vsel %vm793_vm11, %v1462_v53, 0 }
 0x2fc   : > { %v1797_v43 = vpop.permute.xlu0 %1796 }
 0x2fd   : > { %v1817_v0 = vsel %vm793_vm11, %v1797_v43, 0 }
 0x302   : > { %v1133_v46 = vpop.permute.xlu2 %1132  ;;  %v3757_v1 = vpop.permute.xlu1 %1453 }
 0x303   : > { %2520 = vmatmul.msk.bf16.gmra.mxu1 %vm793_vm11, %v3692_v14  ;;  %v1156_v47 = vsel %vm793_vm11, %v1133_v46, 0 }
 0x304   : > { %1162 = vmatpush.bf16.xpose.msrb.mxu3 %v1156_v47  ;;  %v1789_v48 = vpop.permute.xlu0 %1788 }
 0x30a   : > { %v1059_v20 = vpop.permute.xlu2 %1058  ;;  %v1125_v3 = vpop.permute.xlu1 %1124 }
 0x30b   : > { %1080 = vmatpush.bf16.msrb.mxu0 %v1059_v20  ;;  %2576 = vmatpush.bf16.msrb.mxu1 %v1059_v20 }
 0x30c   : > { %2577 = vmatpush.bf16.msra.mxu2 %v1059_v20  ;;  %1163 = vmatpush.bf16.xpose.msrb.mxu3 %v1153_v51  ;;  %v1468_v25 = vpop.permute.xlu0 %1467 }
 0x30d   : > { %v1491_v56 = vsel %vm793_vm11, %v1468_v25, 0 }
 0x30f   : > { %1081 = vmatpush.bf16.msrb.mxu0 %v1057_v32  ;;  %2578 = vmatpush.bf16.msrb.mxu1 %v1057_v32 }
 0x310   : > { %2579 = vmatpush.bf16.msra.mxu2 %v1057_v32 }
 0x313   : > { %1082 = vmatpush.bf16.msrb.mxu0 %v1055_v34  ;;  %2580 = vmatpush.bf16.msrb.mxu1 %v1055_v34 }
 0x314   : > { %2581 = vmatpush.bf16.msra.mxu2 %v1055_v34  ;;  %1164 = vmatpush.bf16.xpose.msrb.mxu3 %v1150_v55  ;;  %v1803_v37 = vpop.permute.xlu0 %1802 }
 0x315   : > { %v1826_v50 = vsel %vm793_vm11, %v1803_v37, 0  ;;  %v773_v37 = vld [vmem:[#allocation10] sm:$0xff] }
 0x317   : > { %1083 = vmatpush.bf16.msrb.mxu0 %v1053_v49  ;;  %2582 = vmatpush.bf16.msrb.mxu1 %v1053_v49 }
 0x318   : > { %2583 = vmatpush.bf16.msra.mxu2 %v1053_v49 }
 0x31c   : > { %1497 = vmatpush.bf16.xpose.msrb.mxu2 %v1491_v56  ;;  %1165 = vmatpush.bf16.xpose.msrb.mxu3 %v1147_v57 }
 0x323   : > { %2525 = vmatmul.msk.bf16.vlgmr.msrb.gmra.mxu3 %vm793_vm11, %v1119_v33 }
 0x324   : > { %1832 = vmatpush.bf16.xpose.msra.mxu3 %v1826_v50  ;;  %1498 = vmatpush.bf16.xpose.msrb.mxu2 %v1488_v59 }
 0x32c   : > { %1833 = vmatpush.bf16.xpose.msra.mxu3 %v1823_v60  ;;  %1499 = vmatpush.bf16.xpose.msrb.mxu2 %v1485_v8  ;;  %v3806_v8 = vld [vmem:[#allocation11] sm:$0xff] }
 0x333   : > { %2526 = vmatmul.msk.bf16.gmra.mxu3 %vm793_vm11, %v1121_v31 }
 0x334   : > { %1834 = vmatpush.bf16.xpose.msra.mxu3 %v1820_v61  ;;  %1500 = vmatpush.bf16.xpose.msrb.mxu2 %v1482_v63  ;;  %v1107_v63 = vld [vmem:[#allocation10 + $0x48] sm:$0xff] }
 0x33c   : > { %1835 = vmatpush.bf16.xpose.msra.mxu3 %v1817_v0 }
 0x343   : > { %2527 = vmatmul.msk.bf16.gmra.mxu3 %vm793_vm11, %v1123_v54 }
 0x350   : > { %v3759_v2 = vpop.f32.mrf.mxu1 }
 0x351   : > { %v828_v59 = vadd.f32 %v3759_v2, %v773_v37 }
 0x353   : > { %2528 = vmatmul.msk.bf16.gmra.mxu3 %vm793_vm11, %v1125_v3  ;;  %v3809_v53 = vadd.f32 %v828_v59, %v3806_v8 }
 0x355   : > { %v856_v2 = vsel %vm855_vm12, %v3809_v53, -inf }
 0x358   : > { %v3762_v6 = vpop.f32.mrf.mxu1 }
 0x360   : > { %v3764_v7 = vpop.f32.mrf.mxu1 }
 0x363   : > { %2541 = vmatmul.msk.bf16.vlgmr.msra.gmra.mxu3 %vm793_vm11, %v1789_v48 }
 0x368   : > { %v3767_v9 = vpop.f32.mrf.mxu1 }
 0x370   : > { %v837_v11 = vpop.f32.mrf.mxu1 }
 0x371   : > { %v838_v40 = vadd.f32 %v837_v11, %v777_v10  ;;  %v3817_v11 = vld [vmem:[#allocation11 + $0x8] sm:$0xff] }
 0x373   : > { %v851_v15 = vadd.f32 %v838_v40, %v3769_v12 }
 0x375   : > { %v868_v35 = vsel %vm855_vm12, %v851_v15, -inf }
 0x376   : > { %869 = vmax.xlane.f32.xlu1 %v868_v35 }
 0x378   : > { %v839_v17 = vpop.f32.mrf.mxu1 }
 0x379   : > { %v840_v21 = vadd.f32 %v839_v17, %v778_v16 }
 0x37b   : > { %v852_v22 = vadd.f32 %v840_v21, %v3773_v18 }
 0x37d   : > { %v871_v23 = vsel %vm855_vm12, %v852_v22, -inf }
 0x37e   : > { %872 = vmax.xlane.f32.xlu0 %v871_v23 }
 0x380   : > { %v842_v26 = vpop.f32.mrf.mxu1 }
 0x381   : > { %v843_v28 = vadd.f32 %v842_v26, %v779_v24  ;;  %v774_v26 = vld [vmem:[#allocation10 + $0x8] sm:$0xff] }
 0x383   : > { %v853_v29 = vadd.f32 %v843_v28, %v3777_v27  ;;  %v830_v28 = vadd.f32 %v3762_v6, %v774_v26 }
 0x385   : > { %v874_v30 = vsel %vm855_vm12, %v853_v29, -inf }
 0x386   : > { %875 = vmax.xlane.f32.xlu2 %v874_v30  ;;  %v1108_v30 = vld [vmem:[#allocation10 + $0x50] sm:$0xff] }
 0x388   : > { %v844_v31 = vpop.f32.mrf.mxu1 }
 0x389   : > { %v845_v32 = vadd.f32 %v844_v31, %v780_v52  ;;  %v1106_v52 = vld [vmem:[#allocation10 + $0x40] sm:$0xff] }
 0x38b   : > { %v854_v33 = vadd.f32 %v845_v32, %v3781_v39 }
 0x38d   : > { %v877_v34 = vsel %vm855_vm12, %v854_v33, -inf }
 0x38e   : > { %878 = vmax.xlane.f32.xlu1 %v877_v34 }
 0x392   : > { %1457 = vrot.lane.b32.xlu0 %v3684_v5, %s3298_s12 }
 0x39e   : > { %1792 = vrot.lane.b32.xlu2 %v3684_v5, %s3299_s13 }
 0x3a6   : > { %v3791_v38 = vpop.f32.mrf.mxu3 }
 0x3a7   : > { %1790 = vrot.lane.b32.xlu1 %v3678_v44, %s3299_s13  ;;  %v1168_v34 = vadd.f32 %v3791_v38, %v1106_v52 }
 0x3a9   : > { %v3848_v6 = vadd.f32 %v1168_v34, %v3806_v8 }
 0x3ab   : > { %v1195_v38 = vsel %vm855_vm12, %v3848_v6, -inf }
 0x3ae   : > { %v1169_v48 = vpop.f32.mrf.mxu3 }
 0x3af   : > { %v1170_v3 = vadd.f32 %v1169_v48, %v1107_v63 }
 0x3b1   : > { %v3820_v40 = vadd.f32 %v1170_v3, %v3817_v11 }
 0x3b3   : > { %v1198_v17 = vsel %vm855_vm12, %v3820_v40, -inf }
 0x3b6   : > { %v1172_v55 = vpop.f32.mrf.mxu3 }
 0x3b7   : > { %v1173_v31 = vadd.f32 %v1172_v55, %v1108_v30 }
 0x3be   : > { %v1174_v61 = vpop.f32.mrf.mxu3 }
 0x3c6   : > { %v1177_v35 = vpop.f32.mrf.mxu3 }
 0x3e9   : > { %v870_v36 = vpop.xlane.xlu1 %869 }
 0x3ea   : > { %v884_v41 = vsub.f32 %v851_v15, %v870_v36  ;;  %v1110_v15 = vld [vmem:[#allocation10 + $0x60] sm:$0xff] }
 0x3eb   : > { %v1178_v16 = vadd.f32 %v1177_v35, %v1110_v15 }
 0x3ec   : > { %v896_v43 = vmul.f32 1.442695, %v884_v41  ;;  %v1111_v41 = vld [vmem:[#allocation10 + $0x68] sm:$0xff] }
 0x3ee   : > { %2833 = vpow2.f32 %v896_v43  ;;  %v1109_v43 = vld [vmem:[#allocation10 + $0x58] sm:$0xff] }
 0x3ef   : > { %v1175_v48 = vadd.f32 %v1174_v61, %v1109_v43 }
 0x3f1   : > { %v873_v45 = vpop.xlane.xlu0 %872 }
 0x3f2   : > { %v885_v46 = vsub.f32 %v852_v22, %v873_v45  ;;  %v3827_v22 = vadd.f32 %v1178_v16, %v3769_v12 }
 0x3f4   : > { %v3793_v47 = vpop.eup %2833  ;;  %v898_v49 = vmul.f32 1.442695, %v885_v46  ;;  %v1207_v23 = vsel %vm855_vm12, %v3827_v22, -inf }
 0x3f5   : > { %v916_v20 = vsel %vm855_vm12, %v3793_v47, 0.0 }
 0x3f6   : > { %2835 = vpow2.f32 %v898_v49  ;;  %917 = vadd.xlane.f32.xlu0 %v916_v20 }
 0x3f9   : > { %v876_v5 = vpop.xlane.xlu2 %875 }
 0x3fa   : > { %v886_v51 = vsub.f32 %v853_v29, %v876_v5  ;;  %v3837_v29 = vadd.f32 %v830_v28, %v3817_v11  ;;  %v775_v5 = vld [vmem:[#allocation10 + $0x10] sm:$0xff] }
 0x3fc   : > { %v3797_v44 = vpop.eup %2835  ;;  %v900_v25 = vmul.f32 1.442695, %v886_v51  ;;  %v859_v32 = vsel %vm855_vm12, %v3837_v29, -inf  ;;  %v3859_v51 = vld [vmem:[#allocation11 + $0x18] sm:$0xff] }
 0x3fd   : > { %v919_v54 = vsel %vm855_vm12, %v3797_v44, 0.0 }
 0x3fe   : > { %2837 = vpow2.f32 %v900_v25  ;;  %920 = vadd.xlane.f32.xlu1 %v919_v54  ;;  %v3862_v25 = vadd.f32 %v1175_v48, %v3859_v51  ;;  %v833_v54 = vadd.f32 %v3764_v7, %v775_v5 }
 0x401   : > { %v879_v56 = vpop.xlane.xlu1 %878  ;;  %v1793_v24 = vpop.permute.xlu2 %1792 }
 0x402   : > { %v887_v57 = vsub.f32 %v854_v33, %v879_v56  ;;  %v1179_v33 = vpop.f32.mrf.mxu3  ;;  %v1204_v56 = vsel %vm855_vm12, %v3862_v25, -inf }
 0x403   : > { %v1180_v45 = vadd.f32 %v1179_v33, %v1111_v41 }
 0x404   : > { %v3801_v50 = vpop.eup %2837  ;;  %v902_v58 = vmul.f32 1.442695, %v887_v57  ;;  %v1113_v57 = vld [vmem:[#allocation10 + $0x78] sm:$0xff]  ;;  %v3879_v63 = vpop.permute.xlu0 %1457 }
 0x405   : > { %v922_v60 = vsel %vm855_vm12, %v3801_v50, 0.0  ;;  %v3857_v20 = vadd.f32 %v1180_v45, %v3773_v18 }
 0x406   : > { %2839 = vpow2.f32 %v902_v58  ;;  %923 = vadd.xlane.f32.xlu2 %v922_v60 }
 0x407   : > { %v1210_v55 = vsel %vm855_vm12, %v3857_v20, -inf }
 0x40a   : > { %v3852_v49 = vpop.f32.mrf.mxu3 }
 0x40c   : > { %v3811_v0 = vpop.eup %2839 }
 0x40d   : > { %v925_v10 = vsel %vm855_vm12, %v3811_v0, 0.0 }
 0x40e   : > { %926 = vadd.xlane.f32.xlu0 %v925_v10  ;;  %857 = vmax.xlane.f32.xlu2 %v856_v2 }
 0x412   : > { %v1184_v58 = vpop.f32.mrf.mxu3 }
 0x413   : > { %v1185_v59 = vadd.f32 %v1184_v58, %v1113_v57 }
 0x415   : > { %v3875_v7 = vadd.f32 %v1185_v59, %v3781_v39 }
 0x416   : > { %1199 = vmax.xlane.f32.xlu2 %v1198_v17 }
 0x417   : > { %1459 = vrot.lane.b32.xlu1 %v3692_v14, %s3298_s12  ;;  %v1216_v61 = vsel %vm855_vm12, %v3875_v7, -inf }
 0x419   : > { %v1791_v21 = vpop.permute.xlu1 %1790 }
 0x41a   : > { %2542 = vmatmul.msk.bf16.gmra.mxu3 %vm793_vm11, %v1791_v21 }
 0x41e   : > { %1208 = vmax.xlane.f32.xlu2 %v1207_v23 }
 0x422   : > { %1794 = vrot.lane.b32.xlu0 %v3692_v14, %s3299_s13  ;;  %v3842_v14 = vld [vmem:[#allocation11 + $0x10] sm:$0xff]  ;;  %s4737_s13 = sld [smem:[#allocation36_spill]] }
 0x423   : > { %v3845_v36 = vadd.f32 %v1173_v31, %v3842_v14  ;;  %v3870_v37 = vadd.f32 %v833_v54, %v3842_v14 }
 0x425   : > { %v1201_v46 = vsel %vm855_vm12, %v3845_v36, -inf  ;;  %v862_v60 = vsel %vm855_vm12, %v3870_v37, -inf }
 0x42a   : > { %2543 = vmatmul.msk.bf16.gmra.mxu3 %vm793_vm11, %v1793_v24 }
 0x441   : > { %860 = vmax.xlane.f32.xlu1 %v859_v32 }
 0x449   : > { %1202 = vmax.xlane.f32.xlu1 %v1201_v46 }
 0x44c   : > { %1196 = vmax.xlane.f32.xlu0 %v1195_v38 }
 0x451   : > { %1211 = vmax.xlane.f32.xlu1 %v1210_v55 }
 0x454   : > { %1205 = vmax.xlane.f32.xlu0 %v1204_v56 }
 0x459   : > { %863 = vmax.xlane.f32.xlu1 %v862_v60 }
 0x461   : > { %1217 = vmax.xlane.f32.xlu1 %v1216_v61 }
 0x469   : > { %v918_v3 = vpop.xlane.xlu0 %917 }
 0x46a   : > { %2841 = vrcp.f32 %v918_v3  ;;  %v999_v26 = vand.u32 2147483648, %v918_v3  ;;  %vm993_vm14 = vweird.f32 %v918_v3  ;;  %v997_v30 = vand.u32 2147483647, %v918_v3 }
 0x46c   : > { %v1000_v41 = vor.u32 1.1754944e-38, %v999_v26  ;;  %vm998_vm3 = vcmp.eq.f32.partialorder %v997_v30, 8.507059e+37 }
 0x470   : > { %v2842_v10 = vpop.eup %2841 }
 0x471   : > { %v989_v2 = vmul.f32 %v2842_v10, %v918_v3  ;;  %v921_v15 = vpop.xlane.xlu1 %920  ;;  %vm994_vm13 = vweird.f32 %v2842_v10 }
 0x472   : > { %2843 = vrcp.f32 %v921_v15  ;;  %vm3883_vm15 = vmor %vm993_vm14, %vm994_vm13  ;;  %v1014_v32 = vand.u32 2147483648, %v921_v15  ;;  %v1012_v33 = vand.u32 2147483647, %v921_v15  ;;  %vm1008_vm2 = vweird.f32 %v921_v15 }
 0x473   : > { %v990_v35 = vsub.f32 1.0, %v989_v2 }
 0x474   : > { %v1015_v46 = vor.u32 1.1754944e-38, %v1014_v32  ;;  %vm1013_vm5 = vcmp.eq.f32.partialorder %v1012_v33, 8.507059e+37 }
 0x475   : > { %v991_v16 = vmul.f32 %v2842_v10, %v990_v35 }
 0x477   : > { %v992_v24 = vadd.f32 %v2842_v10, %v991_v16 }
 0x478   : > { %v2844_v17 = vpop.eup %2843 }
 0x479   : > { %v1004_v21 = vmul.f32 %v2844_v17, %v921_v15  ;;  %v924_v23 = vpop.xlane.xlu2 %923  ;;  %vm1009_vm1 = vweird.f32 %v2844_v17  ;;  %v996_v34 = vsel %vm3883_vm15, %v2842_v10, %v992_v24 }
 0x47a   : > { %2845 = vrcp.f32 %v924_v23  ;;  %1397 = vrot.lane.b32.xlu1 %v3690_v13, %s3300_s14  ;;  %vm1010_vm4 = vmor %vm1008_vm2, %vm1009_vm1  ;;  %v1001_v54 = vsel %vm998_vm3, %v1000_v41, %v996_v34  ;;  %v1029_v16 = vand.u32 2147483648, %v924_v23  ;;  %vm1023_vm7 = vweird.f32 %v924_v23 }
 0x47b   : > { %v1005_v28 = vsub.f32 1.0, %v1004_v21  ;;  %v1002_v59 = vmul.f32 %v3793_v47, %v1001_v54  ;;  %v1027_v21 = vand.u32 2147483647, %v924_v23 }
 0x47d   : > { %v1006_v31 = vmul.f32 %v2844_v17, %v1005_v28  ;;  %vm1028_vm10 = vcmp.eq.f32.partialorder %v1027_v21, 8.507059e+37 }
 0x47f   : > { %v1007_v43 = vadd.f32 %v2844_v17, %v1006_v31  ;;  %v1030_v31 = vor.u32 1.1754944e-38, %v1029_v16 }
 0x480   : > { %v2846_v45 = vpop.eup %2845 }
 0x481   : > { %v1019_v48 = vmul.f32 %v2846_v45, %v924_v23  ;;  %v927_v38 = vpop.xlane.xlu0 %926  ;;  %v858_v5 = vpop.xlane.xlu2 %857  ;;  %v1011_v55 = vsel %vm1010_vm4, %v2844_v17, %v1007_v43  ;;  %vm1024_vm6 = vweird.f32 %v2846_v45  ;;  %v776_v17 = vld [vmem:[#allocation10 + $0x18] sm:$0xff] }
 0x482   : > { %2847 = vrcp.f32 %v927_v38  ;;  %1393 = vrot.lane.b32.xlu1 %v3676_v62, %s3300_s14  ;;  %v880_v57 = vsub.f32 %v3809_v53, %v858_v5  ;;  %v1016_v58 = vsel %vm1013_vm5, %v1015_v46, %v1011_v55  ;;  %vm3895_vm8 = vmor %vm1023_vm7, %vm1024_vm6  ;;  %v1044_v47 = vand.u32 2147483648, %v927_v38  ;;  %v1837_v55 = vpop.f32.mrf.mxu3 }
 0x483   : > { %v1020_v56 = vsub.f32 1.0, %v1019_v48  ;;  %v1017_v60 = vmul.f32 %v3797_v44, %v1016_v58  ;;  %v1042_v28 = vand.u32 2147483647, %v927_v38  ;;  %v835_v52 = vadd.f32 %v3767_v9, %v776_v17 }
 0x484   : > { %v888_v3 = vmul.f32 1.442695, %v880_v57  ;;  %vm1038_vm13 = vweird.f32 %v927_v38  ;;  %v1045_v33 = vor.u32 1.1754944e-38, %v1044_v47 }
 0x485   : > { %v1021_v61 = vmul.f32 %v2846_v45, %v1020_v56  ;;  %v1050_v10 = vpack.c.bf16 %v1017_v60, %v1002_v59  ;;  %vm1043_vm15 = vcmp.eq.f32.partialorder %v1042_v28, 8.507059e+37  ;;  %v3907_v43 = vadd.f32 %v835_v52, %v3859_v51  ;;  %v1112_v59 = vld [vmem:[#allocation10 + $0x70] sm:$0xff] }
 0x486   : > { %2849 = vpow2.f32 %v888_v3 }
 0x487   : > { %2523 = vmatmul.msk.bf16.vlgmr.msra.gmra.mxu2 %vm855_vm12, %v1050_v10  ;;  %v1022_v15 = vadd.f32 %v2846_v45, %v1021_v61 }
 0x488   : > { %v2848_v2 = vpop.eup %2847 }
 0x489   : > { %v1034_v35 = vmul.f32 %v2848_v2, %v927_v38  ;;  %vm1039_vm9 = vweird.f32 %v2848_v2  ;;  %v1026_v30 = vsel %vm3895_vm8, %v2846_v45, %v1022_v15  ;;  %v865_v38 = vsel %vm855_vm12, %v3907_v43, -inf  ;;  %v1460_v54 = vpop.permute.xlu1 %1459  ;;  %v1200_v58 = vpop.xlane.xlu2 %1199 }
 0x48a   : > { %vm1040_vm14 = vmor %vm1038_vm13, %vm1039_vm9  ;;  %v1031_v34 = vsel %vm1028_vm10, %v1030_v31, %v1026_v30  ;;  %v1220_v61 = vsub.f32 %v3820_v40, %v1200_v58  ;;  %v1783_v30 = vld [vmem:[#allocation10 + $0xd8] sm:$0xff] }
 0x48b   : > { %v1035_v53 = vsub.f32 1.0, %v1034_v35  ;;  %v1032_v45 = vmul.f32 %v3801_v50, %v1031_v34 }
 0x48c   : > { %v3899_v44 = vpop.eup %2849  ;;  %v1229_v15 = vmul.f32 1.442695, %v1220_v61 }
 0x48d   : > { %v1036_v26 = vmul.f32 %v2848_v2, %v1035_v53  ;;  %v904_v23 = vsel %vm855_vm12, %v3899_v44, 0.0 }
 0x48e   : > { %905 = vadd.xlane.f32.xlu0 %v904_v23 }
 0x48f   : > { %v1037_v32 = vadd.f32 %v2848_v2, %v1036_v26  ;;  %v1780_v26 = vld [vmem:[#allocation10 + $0xc0] sm:$0xff] }
 0x491   : > { %v1041_v41 = vsel %vm1040_vm14, %v2848_v2, %v1037_v32 }
 0x492   : > { %v1046_v46 = vsel %vm1043_vm15, %v1045_v33, %v1041_v41 }
 0x493   : > { %v1047_v9 = vmul.f32 %v3811_v0, %v1046_v46  ;;  %v3920_v0 = vpop.f32.mrf.mxu3 }
 0x494   : > { %v1795_v48 = vpop.permute.xlu0 %1794 }
 0x495   : > { %2544 = vmatmul.msk.bf16.gmra.mxu3 %vm793_vm11, %v1795_v48  ;;  %v1051_v5 = vpack.c.bf16 %v1047_v9, %v1032_v45 }
 0x496   : > { %866 = vmax.xlane.f32.xlu0 %v865_v38 }
 0x497   : > { %2524 = vmatmul.msk.bf16.gmra.mxu2 %vm855_vm12, %v1051_v5 }
 0x49d   : > { %v3929_v2 = vpop.f32.mrf.mxu3 }
 0x4a5   : > { %v1844_v24 = vpop.f32.mrf.mxu3 }
 0x4a6   : > { %v1845_v32 = vadd.f32 %v1844_v24, %v1783_v30 }
 0x4a7   : > { %2533 = vmatmul.msk.bf16.vlgmr.msrb.gmra.mxu2 %vm793_vm11, %v3757_v1  ;;  %v1183_v1 = vadd.f32 %v3852_v49, %v1112_v59 }
 0x4a8   : > { %v3957_v45 = vadd.f32 %v1845_v32, %v3859_v51  ;;  %v1786_v32 = vld [vmem:[#allocation10 + $0xf0] sm:$0xff] }
 0x4a9   : > { %v3932_v35 = vadd.f32 %v1183_v1, %v3777_v27  ;;  %v1781_v1 = vld [vmem:[#allocation10 + $0xc8] sm:$0xff] }
 0x4aa   : > { %v1874_v48 = vsel %vm855_vm12, %v3957_v45, -inf }
 0x4b4   : > { %v861_v56 = vpop.xlane.xlu1 %860 }
 0x4b5   : > { %v881_v50 = vsub.f32 %v3837_v29, %v861_v56 }
 0x4b7   : > { %v890_v57 = vmul.f32 1.442695, %v881_v50  ;;  %2534 = vmatmul.msk.bf16.gmra.mxu2 %vm793_vm11, %v3738_v42 }
 0x4b9   : > { %2851 = vpow2.f32 %v890_v57 }
 0x4bc   : > { %v1203_v16 = vpop.xlane.xlu1 %1202 }
 0x4bf   : > { %v3922_v60 = vpop.eup %2851  ;;  %v1197_v3 = vpop.xlane.xlu0 %1196 }
 0x4c0   : > { %v1219_v10 = vsub.f32 %v3848_v6, %v1197_v3  ;;  %v907_v29 = vsel %vm855_vm12, %v3922_v60, 0.0  ;;  %v1213_v6 = vsel %vm855_vm12, %v3932_v35, -inf }
 0x4c1   : > { %908 = vadd.xlane.f32.xlu2 %v907_v29  ;;  %v1209_v29 = vpop.xlane.xlu2 %1208 }
 0x4c2   : > { %v1227_v42 = vmul.f32 1.442695, %v1219_v10  ;;  %v1840_v10 = vadd.f32 %v3920_v0, %v1781_v1 }
 0x4c4   : > { %2853 = vpow2.f32 %v1227_v42  ;;  %v1212_v28 = vpop.xlane.xlu1 %1211  ;;  %v3985_v42 = vadd.f32 %v1840_v10, %v3817_v11 }
 0x4c5   : > { %2855 = vpow2.f32 %v1229_v15  ;;  %v1224_v23 = vsub.f32 %v3857_v20, %v1212_v28  ;;  %v1782_v15 = vld [vmem:[#allocation10 + $0xd0] sm:$0xff] }
 0x4c7   : > { %v1206_v40 = vpop.xlane.xlu0 %1205  ;;  %2535 = vmatmul.msk.bf16.gmra.mxu2 %vm793_vm11, %v3879_v63  ;;  %v1838_v63 = vadd.f32 %v1837_v55, %v1780_v26  ;;  %v1237_v46 = vmul.f32 1.442695, %v1224_v23  ;;  %v1785_v55 = vld [vmem:[#allocation10 + $0xe8] sm:$0xff]  ;;  %v1784_v26 = vld [vmem:[#allocation10 + $0xe0] sm:$0xff] }
 0x4c8   : > { %v1222_v17 = vsub.f32 %v3862_v25, %v1206_v40  ;;  %v1221_v25 = vsub.f32 %v3845_v36, %v1203_v16  ;;  %v1847_v36 = vpop.f32.mrf.mxu3  ;;  %v1843_v16 = vadd.f32 %v3929_v2, %v1782_v15  ;;  %v1868_v40 = vsel %vm855_vm12, %v3985_v42, -inf }
 0x4c9   : > { %1214 = vmax.xlane.f32.xlu2 %v1213_v6  ;;  %v3954_v41 = vadd.f32 %v1838_v63, %v3806_v8  ;;  %v1848_v28 = vadd.f32 %v1847_v36, %v1784_v26 }
 0x4ca   : > { %v3939_v49 = vpop.eup %2853  ;;  %v1233_v21 = vmul.f32 1.442695, %v1222_v17  ;;  %v1231_v33 = vmul.f32 1.442695, %v1221_v25 }
 0x4cb   : > { %v1243_v53 = vsel %vm855_vm12, %v3939_v49, 0.0  ;;  %v3943_v47 = vpop.eup %2855  ;;  %v1865_v20 = vsel %vm855_vm12, %v3954_v41, -inf }
 0x4cc   : > { %2857 = vpow2.f32 %v1233_v21  ;;  %1244 = vadd.xlane.f32.xlu0 %v1243_v53  ;;  %v1246_v52 = vsel %vm855_vm12, %v3943_v47, 0.0  ;;  %v864_v9 = vpop.xlane.xlu1 %863  ;;  %v3994_v21 = vadd.f32 %v1843_v16, %v3842_v14 }
 0x4cd   : > { %2859 = vpow2.f32 %v1231_v33  ;;  %v882_v0 = vsub.f32 %v3870_v37, %v864_v9  ;;  %v4005_v37 = vadd.f32 %v1848_v28, %v3769_v12 }
 0x4ce   : > { %2861 = vpow2.f32 %v1237_v46  ;;  %v1871_v53 = vsel %vm855_vm12, %v3994_v21, -inf }
 0x4cf   : > { %v1877_v36 = vsel %vm855_vm12, %v4005_v37, -inf }
 0x4d0   : > { %v1849_v56 = vpop.f32.mrf.mxu3 }
 0x4d1   : > { %1247 = vadd.xlane.f32.xlu2 %v1246_v52  ;;  %v1850_v50 = vadd.f32 %v1849_v56, %v1785_v55 }
 0x4d2   : > { %v3948_v31 = vpop.eup %2857 }
 0x4d3   : > { %v1252_v34 = vsel %vm855_vm12, %v3948_v31, 0.0  ;;  %v3964_v5 = vpop.eup %2859  ;;  %v3977_v59 = vadd.f32 %v1850_v50, %v3773_v18  ;;  %v1223_v18 = vsub.f32 %v3827_v22, %v1209_v29  ;;  %v892_v22 = vmul.f32 1.442695, %v882_v0 }
 0x4d4   : > { %1253 = vadd.xlane.f32.xlu1 %v1252_v34  ;;  %v3966_v38 = vpop.eup %2861  ;;  %v3974_v58 = vpop.xlane.xlu1 %1217 }
 0x4d5   : > { %v1258_v57 = vsel %vm855_vm12, %v3966_v38, 0.0  ;;  %v1880_v61 = vsel %vm855_vm12, %v3977_v59, -inf  ;;  %v1235_v6 = vmul.f32 1.442695, %v1223_v18 }
 0x4d7   : > { %2536 = vmatmul.msk.bf16.gmra.mxu2 %vm793_vm11, %v1460_v54  ;;  %v1249_v54 = vsel %vm855_vm12, %v3964_v5, 0.0  ;;  %2863 = vpow2.f32 %v1235_v6 }
 0x4d8   : > { %2865 = vpow2.f32 %v892_v22 }
 0x4d9   : > { %1866 = vmax.xlane.f32.xlu2 %v1865_v20  ;;  %v1787_v20 = vld [vmem:[#allocation10 + $0xf8] sm:$0xff] }
 0x4dc   : > { %1875 = vmax.xlane.f32.xlu1 %v1874_v48 }
 0x4dd   : > { %v3999_v2 = vpop.eup %2863 }
 0x4de   : > { %v1255_v63 = vsel %vm855_vm12, %v3999_v2, 0.0  ;;  %v4007_v23 = vpop.eup %2865 }
 0x4e0   : > { %1395 = vrot.lane.b32.xlu0 %v3682_v4, %s3300_s14 }
 0x4e1   : > { %1250 = vadd.xlane.f32.xlu2 %v1249_v54 }
 0x4e4   : > { %1259 = vadd.xlane.f32.xlu1 %v1258_v57 }
 0x4ec   : > { %v1398_v3 = vpop.permute.xlu1 %1397  ;;  %1881 = vmax.xlane.f32.xlu1 %v1880_v61 }
 0x4ed   : > { %1419 = vmatpush.bf16.msra.mxu0 %v1398_v3 }
 0x4f9   : > { %1391 = vrot.lane.b32.xlu2 %v3698_v19, %s3300_s14 }
 0x501   : > { %v3991_v17 = vpop.xlane.xlu0 %905 }
 0x502   : > { %vm933_vm3 = vweird.f32 %v3991_v17  ;;  %v937_v28 = vand.u32 2147483647, %v3991_v17 }
 0x504   : > { %vm938_vm7 = vcmp.eq.f32.partialorder %v937_v28, 8.507059e+37 }
 0x509   : > { %v867_v24 = vpop.xlane.xlu0 %866 }
 0x50a   : > { %1869 = vmax.xlane.f32.xlu0 %v1868_v40  ;;  %v883_v25 = vsub.f32 %v3907_v43, %v867_v24  ;;  %v4009_v33 = vpop.f32.mrf.mxu2  ;;  %v910_v43 = vsel %vm855_vm12, %v4007_v23, 0.0 }
 0x50c   : > { %v894_v30 = vmul.f32 1.442695, %v883_v25 }
 0x50e   : > { %2867 = vpow2.f32 %v894_v30 }
 0x50f   : > { %2869 = vrcp.f32 %v3991_v17 }
 0x512   : > { %1872 = vmax.xlane.f32.xlu0 %v1871_v53  ;;  %v4025_v54 = vpop.f32.mrf.mxu2  ;;  %v939_v53 = vand.u32 2147483648, %v3991_v17 }
 0x514   : > { %v4018_v12 = vpop.eup %2867 }
 0x515   : > { %v913_v56 = vsel %vm855_vm12, %v4018_v12, 0.0  ;;  %v2870_v50 = vpop.eup %2869 }
 0x516   : > { %v929_v61 = vmul.f32 %v2870_v50, %v3991_v17  ;;  %vm934_vm1 = vweird.f32 %v2870_v50 }
 0x517   : > { %vm4046_vm4 = vmor %vm933_vm3, %vm934_vm1 }
 0x518   : > { %v1852_v52 = vpop.f32.mrf.mxu3  ;;  %v930_v10 = vsub.f32 1.0, %v929_v61 }
 0x519   : > { %v1853_v34 = vadd.f32 %v1852_v52, %v1786_v32 }
 0x51a   : > { %1256 = vadd.xlane.f32.xlu0 %v1255_v63  ;;  %v4033_v3 = vpop.f32.mrf.mxu2  ;;  %v931_v15 = vmul.f32 %v2870_v50, %v930_v10  ;;  %v4044_v63 = vpop.permute.xlu1 %1393 }
 0x51b   : > { %v4016_v46 = vadd.f32 %v1853_v34, %v3777_v27  ;;  %v940_v34 = vor.u32 1.1754944e-38, %v939_v53 }
 0x51c   : > { %v932_v0 = vadd.f32 %v2870_v50, %v931_v15 }
 0x51d   : > { %v1883_v55 = vsel %vm855_vm12, %v4016_v46, -inf }
 0x51e   : > { %v936_v32 = vsel %vm4046_vm4, %v2870_v50, %v932_v0 }
 0x520   : > { %v1854_v9 = vpop.f32.mrf.mxu3 }
 0x521   : > { %v1855_v48 = vadd.f32 %v1854_v9, %v1787_v20  ;;  %v941_v9 = vsel %vm938_vm7, %v940_v34, %v936_v32 }
 0x522   : > { %911 = vadd.xlane.f32.xlu2 %v910_v43  ;;  %1878 = vmax.xlane.f32.xlu0 %v1877_v36  ;;  %v942_v61 = vmul.f32 %v3899_v44, %v941_v9 }
 0x523   : > { %v4028_v27 = vadd.f32 %v1855_v48, %v3781_v39  ;;  %v4036_v39 = vpop.f32.mrf.mxu2 }
 0x525   : > { %v1886_v57 = vsel %vm855_vm12, %v4028_v27, -inf }
 0x52a   : > { %1884 = vmax.xlane.f32.xlu2 %v1883_v55  ;;  %914 = vadd.xlane.f32.xlu0 %v913_v56 }
 0x52b   : > { %v4059_v50 = vpop.f32.mrf.mxu2 }
 0x532   : > { %1887 = vmax.xlane.f32.xlu0 %v1886_v57 }
 0x533   : > { %v4075_v0 = vpop.f32.mrf.mxu2 }
 0x534   : > { %v909_v1 = vpop.xlane.xlu2 %908 }
 0x535   : > { %2871 = vrcp.f32 %v909_v1  ;;  %v954_v25 = vand.u32 2147483648, %v909_v1  ;;  %vm948_vm5 = vweird.f32 %v909_v1 }
 0x537   : > { %v955_v43 = vor.u32 1.1754944e-38, %v954_v25 }
 0x53b   : > { %v2872_v29 = vpop.eup %2871 }
 0x53c   : > { %v944_v18 = vmul.f32 %v2872_v29, %v909_v1  ;;  %v1215_v16 = vpop.xlane.xlu2 %1214  ;;  %vm949_vm2 = vweird.f32 %v2872_v29 }
 0x53d   : > { %v1225_v40 = vsub.f32 %v3932_v35, %v1215_v16  ;;  %v952_v35 = vand.u32 2147483647, %v909_v1  ;;  %vm950_vm6 = vmor %vm948_vm5, %vm949_vm2 }
 0x53e   : > { %v945_v6 = vsub.f32 1.0, %v944_v18 }
 0x53f   : > { %v1239_v22 = vmul.f32 1.442695, %v1225_v40  ;;  %v4039_v24 = vpop.xlane.xlu0 %1244  ;;  %vm953_vm8 = vcmp.eq.f32.partialorder %v952_v35, 8.507059e+37 }
 0x540   : > { %v946_v26 = vmul.f32 %v2872_v29, %v945_v6  ;;  %2873 = vrcp.f32 %v4039_v24  ;;  %v1278_v35 = vand.u32 2147483648, %v4039_v24  ;;  %vm1272_vm15 = vweird.f32 %v4039_v24 }
 0x541   : > { %2875 = vpow2.f32 %v1239_v22  ;;  %v1276_v30 = vand.u32 2147483647, %v4039_v24 }
 0x542   : > { %v947_v52 = vadd.f32 %v2872_v29, %v946_v26  ;;  %1732 = vrot.lane.b32.xlu2 %v3690_v13, %s3301_s9 }
 0x543   : > { %vm1277_vm3 = vcmp.eq.f32.partialorder %v1276_v30, 8.507059e+37 }
 0x544   : > { %v951_v17 = vsel %vm950_vm6, %v2872_v29, %v947_v52  ;;  %v1248_v36 = vpop.xlane.xlu2 %1247 }
 0x545   : > { %2877 = vrcp.f32 %v1248_v36  ;;  %v956_v48 = vsel %vm953_vm8, %v955_v43, %v951_v17  ;;  %vm1287_vm10 = vweird.f32 %v1248_v36  ;;  %v1293_v6 = vand.u32 2147483648, %v1248_v36 }
 0x546   : > { %v2874_v20 = vpop.eup %2873  ;;  %2067 = vrot.lane.b32.xlu0 %v3690_v13, %s3302_s27  ;;  %v957_v1 = vmul.f32 %v3922_v60, %v956_v48  ;;  %v1291_v26 = vand.u32 2147483647, %v1248_v36 }
 0x547   : > { %v4056_v55 = vpop.eup %2875  ;;  %v1268_v56 = vmul.f32 %v2874_v20, %v4039_v24  ;;  %v4065_v29 = vpop.xlane.xlu1 %1253  ;;  %vm1273_vm13 = vweird.f32 %v2874_v20  ;;  %v1294_v34 = vor.u32 1.1754944e-38, %v1293_v6 }
 0x548   : > { %v1261_v57 = vsel %vm855_vm12, %v4056_v55, 0.0  ;;  %v1048_v15 = vpack.c.bf16 %v957_v1, %v942_v61  ;;  %2879 = vrcp.f32 %v4065_v29  ;;  %vm1274_vm1 = vmor %vm1272_vm15, %vm1273_vm13  ;;  %vm1292_vm2 = vcmp.eq.f32.partialorder %v1291_v26, 8.507059e+37  ;;  %v4083_v24 = vpop.f32.mrf.mxu2 }
 0x549   : > { %v1269_v10 = vsub.f32 1.0, %v1268_v56  ;;  %1262 = vadd.xlane.f32.xlu1 %v1261_v57  ;;  %vm1317_vm8 = vweird.f32 %v4065_v29 }
 0x54a   : > { %1728 = vrot.lane.b32.xlu2 %v3676_v62, %s3301_s9  ;;  %2521 = vmatmul.msk.bf16.vlgmr.msrb.gmra.mxu0 %vm855_vm12, %v1048_v15 }
 0x54b   : > { %v2878_v13 = vpop.eup %2877  ;;  %v1270_v40 = vmul.f32 %v2874_v20, %v1269_v10 }
 0x54c   : > { %v1283_v18 = vmul.f32 %v2878_v13, %v1248_v36  ;;  %v4069_v16 = vpop.xlane.xlu2 %1866  ;;  %vm1288_vm9 = vweird.f32 %v2878_v13  ;;  %v1279_v36 = vor.u32 1.1754944e-38, %v1278_v35 }
 0x54d   : > { %v1271_v53 = vadd.f32 %v2874_v20, %v1270_v40  ;;  %vm1289_vm14 = vmor %vm1287_vm10, %vm1288_vm9 }
 0x54e   : > { %v1284_v44 = vsub.f32 1.0, %v1283_v18  ;;  %2065 = vrot.lane.b32.xlu0 %v3682_v4, %s3302_s27  ;;  %v2880_v28 = vpop.eup %2879 }
 0x54f   : > { %v1275_v17 = vsel %vm1274_vm1, %v2874_v20, %v1271_v53  ;;  %v1313_v43 = vmul.f32 %v2880_v28, %v4065_v29  ;;  %vm1318_vm5 = vweird.f32 %v2880_v28  ;;  %v1321_v53 = vand.u32 2147483647, %v4065_v29 }
 0x550   : > { %v1285_v60 = vmul.f32 %v2878_v13, %v1284_v44  ;;  %v1280_v48 = vsel %vm1277_vm3, %v1279_v36, %v1275_v17  ;;  %vm1319_vm9 = vmor %vm1317_vm8, %vm1318_vm5 }
 0x551   : > { %v1314_v57 = vsub.f32 1.0, %v1313_v43  ;;  %v1281_v1 = vmul.f32 %v3939_v49, %v1280_v48  ;;  %v1323_v49 = vand.u32 2147483648, %v4065_v29  ;;  %vm1322_vm13 = vcmp.eq.f32.partialorder %v1321_v53, 8.507059e+37  ;;  %v1446_v48 = vld [vmem:[#allocation10 + $0x88] sm:$0xff] }
 0x552   : > { %v1286_v22 = vadd.f32 %v2878_v13, %v1285_v60  ;;  %v1396_v25 = vpop.permute.xlu0 %1395 }
 0x553   : > { %1420 = vmatpush.bf16.msra.mxu0 %v1396_v25  ;;  %v1315_v20 = vmul.f32 %v2880_v28, %v1314_v57  ;;  %v1889_v25 = vsub.f32 %v3954_v41, %v4069_v16  ;;  %v1324_v30 = vor.u32 1.1754944e-38, %v1323_v49  ;;  %v1445_v41 = vld [vmem:[#allocation10 + $0x80] sm:$0xff] }
 0x554   : > { %v1290_v52 = vsel %vm1289_vm14, %v2878_v13, %v1286_v22  ;;  %v1251_v32 = vpop.xlane.xlu2 %1250 }
 0x555   : > { %2881 = vrcp.f32 %v1251_v32  ;;  %v1295_v9 = vsel %vm1292_vm2, %v1294_v34, %v1290_v52  ;;  %v1316_v44 = vadd.f32 %v2880_v28, %v1315_v20  ;;  %vm1302_vm6 = vweird.f32 %v1251_v32 }
 0x556   : > { %v1296_v56 = vmul.f32 %v3943_v47, %v1295_v9  ;;  %v1308_v47 = vand.u32 2147483648, %v1251_v32  ;;  %v1306_v6 = vand.u32 2147483647, %v1251_v32  ;;  %v1448_v9 = vld [vmem:[#allocation10 + $0x98] sm:$0xff] }
 0x557   : > { %1421 = vmatpush.bf16.msra.mxu0 %v4044_v63  ;;  %v1226_v63 = vsub.f32 %v3875_v7, %v3974_v58  ;;  %v1509_v58 = vpop.f32.mrf.mxu2  ;;  %v1320_v35 = vsel %vm1319_vm9, %v2880_v28, %v1316_v44  ;;  %v1503_v28 = vadd.f32 %v4059_v50, %v1445_v41 }
 0x558   : > { %v1387_v18 = vpack.c.bf16 %v1296_v56, %v1281_v1  ;;  %v1309_v7 = vor.u32 1.1754944e-38, %v1308_v47  ;;  %vm1307_vm10 = vcmp.eq.f32.partialorder %v1306_v6, 8.507059e+37  ;;  %v1510_v56 = vadd.f32 %v1509_v58, %v1448_v9  ;;  %v1451_v6 = vld [vmem:[#allocation10 + $0xb0] sm:$0xff] }
 0x559   : > { %v1241_v26 = vmul.f32 1.442695, %v1226_v63 }
 0x55b   : > { %v2882_v61 = vpop.eup %2881  ;;  %2883 = vpow2.f32 %v1241_v26 }
 0x55c   : > { %v1298_v10 = vmul.f32 %v2882_v61, %v1251_v32  ;;  %v1392_v13 = vpop.permute.xlu2 %1391  ;;  %vm1303_vm4 = vweird.f32 %v2882_v61  ;;  %v1325_v32 = vsel %vm1322_vm13, %v1324_v30, %v1320_v35  ;;  %v2962_v35 = vld [vmem:[#allocation11 + $0x30] sm:$0xff] }
 0x55d   : > { %1422 = vmatpush.bf16.msra.mxu0 %v1392_v13  ;;  %vm1304_vm7 = vmor %vm1302_vm6, %vm1303_vm4  ;;  %v1326_v29 = vmul.f32 %v3948_v31, %v1325_v32  ;;  %v4109_v31 = vadd.f32 %v1503_v28, %v3806_v8  ;;  %v1449_v13 = vld [vmem:[#allocation10 + $0xa0] sm:$0xff] }
 0x55e   : > { %v1299_v15 = vsub.f32 1.0, %v1298_v10  ;;  %v4117_v10 = vadd.f32 %v1510_v56, %v3859_v51 }
 0x55f   : > { %v1512_v16 = vpop.f32.mrf.mxu2  ;;  %v1530_v1 = vsel %vm855_vm12, %v4109_v31, -inf }
 0x560   : > { %v1300_v40 = vmul.f32 %v2882_v61, %v1299_v15  ;;  %2529 = vmatmul.msk.bf16.vlgmr.msra.gmra.mxu0 %vm855_vm12, %v1387_v18  ;;  %v1447_v18 = vld [vmem:[#allocation10 + $0x90] sm:$0xff] }
 0x561   : > { %v4100_v43 = vpop.eup %2883  ;;  %v1508_v51 = vadd.f32 %v4083_v24, %v1447_v18  ;;  %v1452_v18 = vld [vmem:[#allocation10 + $0xb8] sm:$0xff] }
 0x562   : > { %v1301_v60 = vadd.f32 %v2882_v61, %v1300_v40  ;;  %1730 = vrot.lane.b32.xlu1 %v3682_v4, %s3301_s9  ;;  %v1897_v4 = vmul.f32 1.442695, %v1889_v25  ;;  %v1264_v36 = vsel %vm855_vm12, %v4100_v43, 0.0  ;;  %v1513_v40 = vadd.f32 %v1512_v16, %v1449_v13 }
 0x564   : > { %v1305_v22 = vsel %vm1304_vm7, %v2882_v61, %v1301_v60  ;;  %2885 = vpow2.f32 %v1897_v4  ;;  %v1505_v61 = vadd.f32 %v4075_v0, %v1446_v48  ;;  %v1539_v0 = vsel %vm855_vm12, %v4117_v10, -inf }
 0x565   : > { %v1310_v52 = vsel %vm1307_vm10, %v1309_v7, %v1305_v22 }
 0x566   : > { %v1311_v34 = vmul.f32 %v3964_v5, %v1310_v52  ;;  %v4122_v15 = vadd.f32 %v1505_v61, %v3817_v11  ;;  %v2961_v11 = vld [vmem:[#allocation11 + $0x20] sm:$0xff] }
 0x567   : > { %v1514_v50 = vpop.f32.mrf.mxu2  ;;  %v4132_v60 = vadd.f32 %v2961_v11, %v1513_v40 }
 0x568   : > { %v1388_v17 = vpack.c.bf16 %v1326_v29, %v1311_v34  ;;  %v1533_v47 = vsel %vm855_vm12, %v4122_v15, -inf  ;;  %v1450_v29 = vld [vmem:[#allocation10 + $0xa8] sm:$0xff] }
 0x569   : > { %v1542_v58 = vsel %vm855_vm12, %v4132_v60, -inf  ;;  %v1515_v28 = vadd.f32 %v1514_v50, %v1450_v29 }
 0x56a   : > { %2063 = vrot.lane.b32.xlu1 %v3676_v62, %s3302_s27  ;;  %v4106_v5 = vpop.eup %2885  ;;  %v1876_v62 = vpop.xlane.xlu1 %1875 }
 0x56b   : > { %v1913_v57 = vsel %vm855_vm12, %v4106_v5, 0.0  ;;  %v1892_v63 = vsub.f32 %v3957_v45, %v1876_v62  ;;  %v4137_v45 = vadd.f32 %v1508_v51, %v3842_v14 }
 0x56d   : > { %v1903_v53 = vmul.f32 1.442695, %v1892_v63  ;;  %v1536_v25 = vsel %vm855_vm12, %v4137_v45, -inf }
 0x56f   : > { %v1517_v49 = vpop.f32.mrf.mxu2 }
 0x570   : > { %2530 = vmatmul.msk.bf16.gmra.mxu0 %vm855_vm12, %v1388_v17  ;;  %v1518_v24 = vadd.f32 %v1517_v49, %v1451_v6 }
 0x572   : > { %v4119_v8 = vpop.xlane.xlu1 %1259  ;;  %v4147_v14 = vadd.f32 %v2962_v35, %v1518_v24 }
 0x573   : > { %1265 = vadd.xlane.f32.xlu2 %v1264_v36  ;;  %2887 = vrcp.f32 %v4119_v8  ;;  %vm1347_vm15 = vweird.f32 %v4119_v8  ;;  %v1351_v50 = vand.u32 2147483647, %v4119_v8 }
 0x574   : > { %2889 = vpow2.f32 %v1903_v53  ;;  %v1548_v4 = vsel %vm855_vm12, %v4147_v14, -inf }
 0x575   : > { %vm1352_vm4 = vcmp.eq.f32.partialorder %v1351_v50, 8.507059e+37 }
 0x577   : > { %v1519_v40 = vpop.f32.mrf.mxu2 }
 0x578   : > { %1914 = vadd.xlane.f32.xlu0 %v1913_v57  ;;  %v1353_v57 = vand.u32 2147483648, %v4119_v8  ;;  %v1520_v6 = vadd.f32 %v1519_v40, %v1452_v18 }
 0x579   : > { %v4139_v26 = vpop.eup %2887 }
 0x57a   : > { %v4149_v32 = vpop.eup %2889  ;;  %vm1348_vm14 = vweird.f32 %v4139_v26 }
 0x57b   : > { %1531 = vmax.xlane.f32.xlu2 %v1530_v1  ;;  %v1922_v41 = vsel %vm855_vm12, %v4149_v32, 0.0  ;;  %v2963_v1 = vld [vmem:[#allocation11 + $0x28] sm:$0xff]  ;;  %vm4172_vm1 = vmor %vm1347_vm15, %vm1348_vm14 }
 0x57c   : > { %v4170_v13 = vadd.f32 %v2963_v1, %v1515_v28 }
 0x57d   : > { %v1870_v20 = vpop.xlane.xlu0 %1869 }
 0x57e   : > { %v1890_v44 = vsub.f32 %v3985_v42, %v1870_v20  ;;  %v1343_v42 = vmul.f32 %v4139_v26, %v4119_v8  ;;  %v1545_v49 = vsel %vm855_vm12, %v4170_v13, -inf }
 0x580   : > { %1540 = vmax.xlane.f32.xlu0 %v1539_v0  ;;  %v1899_v7 = vmul.f32 1.442695, %v1890_v44  ;;  %v1344_v52 = vsub.f32 1.0, %v1343_v42  ;;  %v1354_v44 = vor.u32 1.1754944e-38, %v1353_v57 }
 0x582   : > { %2891 = vpow2.f32 %v1899_v7  ;;  %v1345_v17 = vmul.f32 %v4139_v26, %v1344_v52 }
 0x583   : > { %1534 = vmax.xlane.f32.xlu2 %v1533_v47 }
 0x584   : > { %v1346_v56 = vadd.f32 %v4139_v26, %v1345_v17 }
 0x585   : > { %v4134_v22 = vpop.xlane.xlu0 %1872 }
 0x586   : > { %v1350_v47 = vsel %vm4172_vm1, %v4139_v26, %v1346_v56 }
 0x588   : > { %1543 = vmax.xlane.f32.xlu0 %v1542_v58  ;;  %v4153_v34 = vpop.eup %2891 }
 0x589   : > { %v1916_v36 = vsel %vm855_vm12, %v4153_v34, 0.0 }
 0x58b   : > { %1537 = vmax.xlane.f32.xlu2 %v1536_v25  ;;  %v1355_v25 = vsel %vm1352_vm4, %v1354_v44, %v1350_v47 }
 0x58c   : > { %v1356_v52 = vmul.f32 %v3966_v38, %v1355_v25 }
 0x58d   : > { %v1257_v30 = vpop.xlane.xlu0 %1256 }
 0x58e   : > { %2893 = vrcp.f32 %v1257_v30  ;;  %v1338_v63 = vand.u32 2147483648, %v1257_v30  ;;  %v1336_v51 = vand.u32 2147483647, %v1257_v30  ;;  %vm1332_vm3 = vweird.f32 %v1257_v30 }
 0x590   : > { %1549 = vmax.xlane.f32.xlu0 %v1548_v4  ;;  %v1339_v53 = vor.u32 1.1754944e-38, %v1338_v63  ;;  %vm1337_vm6 = vcmp.eq.f32.partialorder %v1336_v51, 8.507059e+37  ;;  %v2964_v4 = vld [vmem:[#allocation11 + $0x38] sm:$0xff] }
 0x591   : > { %v4186_v29 = vadd.f32 %v2964_v4, %v1520_v6 }
 0x593   : > { %1923 = vadd.xlane.f32.xlu2 %v1922_v41 }
 0x594   : > { %v2894_v16 = vpop.eup %2893  ;;  %1917 = vadd.xlane.f32.xlu1 %v1916_v36 }
 0x595   : > { %v1328_v9 = vmul.f32 %v2894_v16, %v1257_v30  ;;  %v4160_v62 = vpop.xlane.xlu0 %1878  ;;  %v4162_v48 = vpop.xlane.xlu2 %911  ;;  %vm1333_vm2 = vweird.f32 %v2894_v16 }
 0x596   : > { %2895 = vrcp.f32 %v4162_v48  ;;  %vm1334_vm5 = vmor %vm1332_vm3, %vm1333_vm2  ;;  %vm963_vm8 = vweird.f32 %v4162_v48  ;;  %v967_v38 = vand.u32 2147483647, %v4162_v48 }
 0x597   : > { %v1329_v61 = vsub.f32 1.0, %v1328_v9 }
 0x598   : > { %vm968_vm13 = vcmp.eq.f32.partialorder %v967_v38, 8.507059e+37 }
 0x599   : > { %v1330_v0 = vmul.f32 %v2894_v16, %v1329_v61 }
 0x59b   : > { %v1331_v11 = vadd.f32 %v2894_v16, %v1330_v0 }
 0x59c   : > { %v2896_v8 = vpop.eup %2895  ;;  %1546 = vmax.xlane.f32.xlu1 %v1545_v49 }
 0x59d   : > { %v959_v24 = vmul.f32 %v2896_v8, %v4162_v48  ;;  %v915_v7 = vpop.xlane.xlu0 %914  ;;  %v4182_v58 = vpop.xlane.xlu2 %1884  ;;  %v1335_v42 = vsel %vm1334_vm5, %v2894_v16, %v1331_v11  ;;  %v1551_v16 = vsel %vm855_vm12, %v4186_v29, -inf  ;;  %vm964_vm7 = vweird.f32 %v2896_v8 }
 0x59e   : > { %2897 = vrcp.f32 %v915_v7  ;;  %v1340_v35 = vsel %vm1337_vm6, %v1339_v53, %v1335_v42  ;;  %vm965_vm9 = vmor %vm963_vm8, %vm964_vm7  ;;  %v984_v61 = vand.u32 2147483648, %v915_v7  ;;  %v982_v20 = vand.u32 2147483647, %v915_v7  ;;  %v4199_v53 = vpop.xlane.xlu1 %1881 }
 0x59f   : > { %v960_v26 = vsub.f32 1.0, %v959_v24  ;;  %v1341_v30 = vmul.f32 %v3999_v2, %v1340_v35  ;;  %v969_v2 = vand.u32 2147483648, %v4162_v48  ;;  %vm978_vm14 = vweird.f32 %v915_v7 }
 0x5a0   : > { %v985_v0 = vor.u32 1.1754944e-38, %v984_v61  ;;  %vm983_vm1 = vcmp.eq.f32.partialorder %v982_v20, 8.507059e+37 }
 0x5a1   : > { %v961_v17 = vmul.f32 %v2896_v8, %v960_v26  ;;  %v1389_v41 = vpack.c.bf16 %v1356_v52, %v1341_v30  ;;  %v970_v18 = vor.u32 1.1754944e-38, %v969_v2 }
 0x5a3   : > { %2531 = vmatmul.msk.bf16.gmra.mxu0 %vm855_vm12, %v1389_v41  ;;  %v962_v36 = vadd.f32 %v2896_v8, %v961_v17 }
 0x5a4   : > { %v2898_v28 = vpop.eup %2897  ;;  %1552 = vmax.xlane.f32.xlu1 %v1551_v16 }
 0x5a5   : > { %v974_v9 = vmul.f32 %v2898_v28, %v915_v7  ;;  %v1733_v56 = vpop.permute.xlu2 %1732  ;;  %v966_v50 = vsel %vm965_vm9, %v2896_v8, %v962_v36  ;;  %vm979_vm10 = vweird.f32 %v2898_v28  ;;  %v4196_v11 = vpop.xlane.xlu0 %1887 }
 0x5a6   : > { %1754 = vmatpush.bf16.msra.mxu1 %v1733_v56  ;;  %vm980_vm15 = vmor %vm978_vm14, %vm979_vm10  ;;  %v971_v63 = vsel %vm968_vm13, %v970_v18, %v966_v50 }
 0x5a7   : > { %v975_v57 = vsub.f32 1.0, %v974_v9  ;;  %v972_v44 = vmul.f32 %v4007_v23, %v971_v63 }
 0x5a9   : > { %v976_v1 = vmul.f32 %v2898_v28, %v975_v57 }
 0x5ab   : > { %v977_v40 = vadd.f32 %v2898_v28, %v976_v1  ;;  %v1891_v1 = vsub.f32 %v3994_v21, %v4134_v22 }
 0x5ad   : > { %v981_v51 = vsel %vm980_vm15, %v2898_v28, %v977_v40  ;;  %v1729_v23 = vpop.permute.xlu2 %1728 }
 0x5ae   : > { %v986_v47 = vsel %vm983_vm1, %v985_v0, %v981_v51 }
 0x5af   : > { %v987_v48 = vmul.f32 %v4018_v12, %v986_v47 }
 0x5b1   : > { %v1049_v8 = vpack.c.bf16 %v987_v48, %v972_v44  ;;  %v1901_v48 = vmul.f32 1.442695, %v1891_v1 }
 0x5b3   : > { %2522 = vmatmul.msk.bf16.vlgmr.msrb.gmra.mxu1 %vm855_vm12, %v1049_v8 }
 0x5b8   : > { %v2068_v6 = vpop.permute.xlu0 %2067 }
 0x5b9   : > { %2089 = vmatpush.bf16.msrb.mxu0 %v2068_v6 }
 0x5bc   : > { %v1263_v7 = vpop.xlane.xlu1 %1262 }
 0x5bd   : > { %2899 = vrcp.f32 %v1263_v7  ;;  %v1368_v38 = vand.u32 2147483648, %v1263_v7  ;;  %vm1362_vm3 = vweird.f32 %v1263_v7  ;;  %v1366_v61 = vand.u32 2147483647, %v1263_v7 }
 0x5bf   : > { %v1369_v47 = vor.u32 1.1754944e-38, %v1368_v38  ;;  %vm1367_vm6 = vcmp.eq.f32.partialorder %v1366_v61, 8.507059e+37 }
 0x5c0   : > { %v2066_v49 = vpop.permute.xlu0 %2065 }
 0x5c1   : > { %2090 = vmatpush.bf16.msrb.mxu0 %v2066_v49 }
 0x5c3   : > { %v2900_v35 = vpop.eup %2899 }
 0x5c4   : > { %v1358_v30 = vmul.f32 %v2900_v35, %v1263_v7  ;;  %vm1363_vm2 = vweird.f32 %v2900_v35 }
 0x5c5   : > { %vm4216_vm4 = vmor %vm1362_vm3, %vm1363_vm2 }
 0x5c6   : > { %v1359_v4 = vsub.f32 1.0, %v1358_v30 }
 0x5c7   : > { %v4201_v24 = vpop.f32.mrf.mxu0 }
 0x5c8   : > { %v1360_v41 = vmul.f32 %v2900_v35, %v1359_v4 }
 0x5ca   : > { %v1361_v9 = vadd.f32 %v2900_v35, %v1360_v41 }
 0x5cc   : > { %v1365_v51 = vsel %vm4216_vm4, %v2900_v35, %v1361_v9 }
 0x5cd   : > { %v1370_v8 = vsel %vm1367_vm6, %v1369_v47, %v1365_v51 }
 0x5ce   : > { %v1371_v35 = vmul.f32 %v4056_v55, %v1370_v8 }
 0x5cf   : > { %v4203_v42 = vpop.f32.mrf.mxu0 }
 0x5d4   : > { %v1731_v25 = vpop.permute.xlu1 %1730 }
 0x5d5   : > { %1755 = vmatpush.bf16.msra.mxu1 %v1731_v25 }
 0x5d9   : > { %1756 = vmatpush.bf16.msra.mxu1 %v1729_v23 }
 0x5dc   : > { %v2064_v12 = vpop.permute.xlu1 %2063 }
 0x5dd   : > { %v4205_v26 = vpop.f32.mrf.mxu0  ;;  %2091 = vmatpush.bf16.msrb.mxu0 %v2064_v12  ;;  %v1894_v12 = vsub.f32 %v3977_v59, %v4199_v53 }
 0x5df   : > { %v1907_v9 = vmul.f32 1.442695, %v1894_v12 }
 0x5e5   : > { %v4207_v52 = vpop.f32.mrf.mxu0 }
 0x5e6   : > { %v1266_v17 = vpop.xlane.xlu2 %1265 }
 0x5e7   : > { %2901 = vrcp.f32 %v1266_v17  ;;  %v1383_v18 = vand.u32 2147483648, %v1266_v17  ;;  %v1381_v63 = vand.u32 2147483647, %v1266_v17  ;;  %vm1377_vm7 = vweird.f32 %v1266_v17 }
 0x5e9   : > { %v1384_v21 = vor.u32 1.1754944e-38, %v1383_v18  ;;  %vm1382_vm9 = vcmp.eq.f32.partialorder %v1381_v63, 8.507059e+37 }
 0x5eb   : > { %v4209_v28 = vpop.xlane.xlu0 %1914 }
 0x5ec   : > { %vm1942_vm13 = vweird.f32 %v4209_v28 }
 0x5ed   : > { %v2902_v16 = vpop.eup %2901  ;;  %v4211_v36 = vpop.f32.mrf.mxu0 }
 0x5ee   : > { %v1373_v56 = vmul.f32 %v2902_v16, %v1266_v17  ;;  %v1532_v2 = vpop.xlane.xlu2 %1531  ;;  %vm1378_vm5 = vweird.f32 %v2902_v16 }
 0x5ef   : > { %v1554_v57 = vsub.f32 %v4109_v31, %v1532_v2  ;;  %vm1379_vm8 = vmor %vm1377_vm7, %vm1378_vm5 }
 0x5f0   : > { %v1374_v50 = vsub.f32 1.0, %v1373_v56 }
 0x5f1   : > { %v1562_v40 = vmul.f32 1.442695, %v1554_v57 }
 0x5f2   : > { %v1375_v0 = vmul.f32 %v2902_v16, %v1374_v50 }
 0x5f3   : > { %2903 = vpow2.f32 %v1562_v40  ;;  %v1541_v31 = vpop.xlane.xlu0 %1540 }
 0x5f4   : > { %v1376_v44 = vadd.f32 %v2902_v16, %v1375_v0  ;;  %2905 = vpow2.f32 %v1901_v48  ;;  %v1557_v17 = vsub.f32 %v4117_v10, %v1541_v31 }
 0x5f5   : > { %v4222_v22 = vpop.f32.mrf.mxu0  ;;  %2907 = vrcp.f32 %v4209_v28 }
 0x5f6   : > { %v2766_v6 = vpack.i.bf16 %v4222_v22, %v4211_v36  ;;  %v1535_v49 = vpop.xlane.xlu2 %1534  ;;  %v1380_v7 = vsel %vm1379_vm8, %v2902_v16, %v1376_v44  ;;  %v1568_v59 = vmul.f32 1.442695, %v1557_v17  ;;  %v2572_v36 = vld [vmem:[#allocation8 + $0x8] sm:$0xff] }
 0x5f7   : > { %v1555_v25 = vsub.f32 %v4122_v15, %v1535_v49  ;;  %v1385_v23 = vsel %vm1382_vm9, %v1384_v21, %v1380_v7  ;;  %v1948_v7 = vand.u32 2147483648, %v4209_v28  ;;  %2278 = vmatpush.bf16.msra.mxu2 %v2572_v36 }
 0x5f8   : > { %v1386_v30 = vmul.f32 %v4100_v43, %v1385_v23  ;;  %v1946_v23 = vand.u32 2147483647, %v4209_v28 }
 0x5f9   : > { %v4231_v4 = vpop.eup %2903  ;;  %v1564_v41 = vmul.f32 1.442695, %v1555_v25 }
 0x5fa   : > { %v1578_v16 = vsel %vm855_vm12, %v4231_v4, 0.0  ;;  %v1390_v15 = vpack.c.bf16 %v1386_v30, %v1371_v35  ;;  %v4238_v53 = vpop.eup %2905  ;;  %v1895_v30 = vsub.f32 %v4016_v46, %v4182_v58  ;;  %vm1947_vm1 = vcmp.eq.f32.partialorder %v1946_v23, 8.507059e+37 }
 0x5fb   : > { %2909 = vpow2.f32 %v1564_v41  ;;  %1579 = vadd.xlane.f32.xlu1 %v1578_v16  ;;  %v1544_v55 = vpop.xlane.xlu0 %1543  ;;  %v2908_v10 = vpop.eup %2907  ;;  %v1919_v61 = vsel %vm855_vm12, %v4238_v53, 0.0 }
 0x5fc   : > { %2532 = vmatmul.msk.bf16.gmra.mxu0 %vm855_vm12, %v1390_v15  ;;  %2911 = vpow2.f32 %v1907_v9  ;;  %v1558_v2 = vsub.f32 %v4132_v60, %v1544_v55  ;;  %v1938_v1 = vmul.f32 %v2908_v10, %v4209_v28  ;;  %vm1943_vm10 = vweird.f32 %v2908_v10 }
 0x5fd   : > { %2913 = vpow2.f32 %v1568_v59  ;;  %vm1944_vm14 = vmor %vm1942_vm13, %vm1943_vm10  ;;  %v1909_v28 = vmul.f32 1.442695, %v1895_v30 }
 0x5fe   : > { %v1538_v43 = vpop.xlane.xlu2 %1537  ;;  %v1939_v60 = vsub.f32 1.0, %v1938_v1 }
 0x5ff   : > { %v1556_v56 = vsub.f32 %v4137_v45, %v1538_v43  ;;  %v1570_v45 = vmul.f32 1.442695, %v1558_v2 }
 0x600   : > { %v1940_v31 = vmul.f32 %v2908_v10, %v1939_v60  ;;  %v1896_v60 = vsub.f32 %v4028_v27, %v4196_v11 }
 0x601   : > { %v4242_v38 = vpop.eup %2909  ;;  %v1566_v57 = vmul.f32 1.442695, %v1556_v56 }
 0x602   : > { %v1581_v50 = vsel %vm855_vm12, %v4242_v38, 0.0  ;;  %v4249_v20 = vpop.eup %2911  ;;  %v1941_v21 = vadd.f32 %v2908_v10, %v1940_v31 }
 0x603   : > { %2915 = vpow2.f32 %v1566_v57  ;;  %1920 = vadd.xlane.f32.xlu1 %v1919_v61  ;;  %1582 = vadd.xlane.f32.xlu2 %v1581_v50  ;;  %v4251_v18 = vpop.eup %2913  ;;  %v1928_v63 = vsel %vm855_vm12, %v4249_v20, 0.0  ;;  %v1550_v31 = vpop.xlane.xlu0 %1549 }
 0x604   : > { %2917 = vpow2.f32 %v1570_v45  ;;  %v1587_v51 = vsel %vm855_vm12, %v4251_v18, 0.0  ;;  %v1945_v16 = vsel %vm1944_vm14, %v2908_v10, %v1941_v21  ;;  %v1560_v21 = vsub.f32 %v4147_v14, %v1550_v31 }
 0x606   : > { %v4322_v14 = vpop.xlane.xlu2 %1923 }
 0x607   : > { %v1918_v40 = vpop.xlane.xlu1 %1917  ;;  %vm1987_vm6 = vweird.f32 %v4322_v14 }
 0x608   : > { %2919 = vrcp.f32 %v1918_v40  ;;  %v1963_v17 = vand.u32 2147483648, %v1918_v40  ;;  %v1961_v9 = vand.u32 2147483647, %v1918_v40  ;;  %vm1957_vm2 = vweird.f32 %v1918_v40 }
 0x609   : > { %v4253_v0 = vpop.eup %2915 }
 0x60a   : > { %v1584_v47 = vsel %vm855_vm12, %v4253_v0, 0.0  ;;  %v4261_v44 = vpop.eup %2917  ;;  %v1964_v43 = vor.u32 1.1754944e-38, %v1963_v17  ;;  %vm1962_vm4 = vcmp.eq.f32.partialorder %v1961_v9, 8.507059e+37 }
 0x60b   : > { %1929 = vadd.xlane.f32.xlu1 %v1928_v63  ;;  %1588 = vadd.xlane.f32.xlu2 %v1587_v51  ;;  %v1590_v35 = vsel %vm855_vm12, %v4261_v44, 0.0 }
 0x60c   : > { %1585 = vadd.xlane.f32.xlu0 %v1584_v47 }
 0x60e   : > { %v2920_v48 = vpop.eup %2919 }
 0x60f   : > { %v1953_v8 = vmul.f32 %v2920_v48, %v1918_v40  ;;  %v1547_v49 = vpop.xlane.xlu1 %1546  ;;  %vm1958_vm15 = vweird.f32 %v2920_v48  ;;  %v1911_v40 = vmul.f32 1.442695, %v1896_v60 }
 0x610   : > { %v1559_v25 = vsub.f32 %v4170_v13, %v1547_v49  ;;  %v1949_v13 = vor.u32 1.1754944e-38, %v1948_v7  ;;  %vm1959_vm3 = vmor %vm1957_vm2, %vm1958_vm15  ;;  %v1574_v49 = vmul.f32 1.442695, %v1560_v21 }
 0x611   : > { %v1954_v12 = vsub.f32 1.0, %v1953_v8 }
 0x612   : > { %v1572_v41 = vmul.f32 1.442695, %v1559_v25  ;;  %v1950_v55 = vsel %vm1947_vm1, %v1949_v13, %v1945_v16 }
 0x613   : > { %1591 = vadd.xlane.f32.xlu1 %v1590_v35  ;;  %v1955_v15 = vmul.f32 %v2920_v48, %v1954_v12  ;;  %v4272_v2 = vmul.f32 %v4106_v5, %v1950_v55 }
 0x614   : > { %2921 = vpow2.f32 %v1572_v41 }
 0x615   : > { %v1956_v59 = vadd.f32 %v2920_v48, %v1955_v15  ;;  %2923 = vpow2.f32 %v1909_v28 }
 0x617   : > { %v1960_v56 = vsel %vm1959_vm3, %v2920_v48, %v1956_v59  ;;  %v1553_v46 = vpop.xlane.xlu1 %1552  ;;  %v1893_v48 = vsub.f32 %v4005_v37, %v4160_v62  ;;  %v2751_v37 = vpack.i.bf16 %v4207_v52, %v4205_v26 }
 0x618   : > { %v1965_v58 = vsel %vm1962_vm4, %v1964_v43, %v1960_v56  ;;  %v1561_v61 = vsub.f32 %v4186_v29, %v1553_v46 }
 0x619   : > { %v4275_v10 = vmul.f32 %v4153_v34, %v1965_v58  ;;  %v1905_v8 = vmul.f32 1.442695, %v1893_v48 }
 0x61a   : > { %v4277_v57 = vpop.eup %2921  ;;  %v1576_v45 = vmul.f32 1.442695, %v1561_v61 }
 0x61b   : > { %v1593_v50 = vsel %vm855_vm12, %v4277_v57, 0.0  ;;  %v2057_v1 = vpack.c.bf16 %v4275_v10, %v4272_v2  ;;  %v4286_v5 = vpop.eup %2923  ;;  %v1991_v10 = vand.u32 2147483647, %v4322_v14 }
 0x61c   : > { %1594 = vadd.xlane.f32.xlu1 %v1593_v50  ;;  %2925 = vpow2.f32 %v1576_v45  ;;  %v1931_v29 = vsel %vm855_vm12, %v4286_v5, 0.0 }
 0x61d   : > { %2927 = vpow2.f32 %v1911_v40 }
 0x61e   : > { %2929 = vpow2.f32 %v1905_v8 }
 0x61f   : > { %2931 = vpow2.f32 %v1574_v49 }
 0x620   : > { %1726 = vrot.lane.b32.xlu0 %v3698_v19, %s3301_s9  ;;  %v4288_v34 = vpop.f32.mrf.mxu0  ;;  %s4738_s9 = smov %s4737_s13 }
 0x621   : > { %s3173_s5 = scalar_lea.hbm %s4738_s9, 512 }
 0x622   : > { %v4296_v63 = vpop.eup %2925 }
 0x623   : > { %2061 = vrot.lane.b32.xlu2 %v3698_v19, %s3302_s27  ;;  %v1599_v27 = vsel %vm855_vm12, %v4296_v63, 0.0  ;;  %v4304_v11 = vpop.eup %2927  ;;  %s2333_s27 = scalar_lea.hbm %s4737_s13, %s2565_s26 }
 0x624   : > { %1932 = vadd.xlane.f32.xlu1 %v1931_v29  ;;  %v1934_v19 = vsel %vm855_vm12, %v4304_v11, 0.0  ;;  %v4311_v7 = vpop.eup %2929 }
 0x625   : > { %v4313_v25 = vpop.eup %2931  ;;  %v1925_v23 = vsel %vm855_vm12, %v4311_v7, 0.0 }
 0x626   : > { %v1596_v12 = vsel %vm855_vm12, %v4313_v25, 0.0 }
 0x628   : > { %v4298_v51 = vpop.f32.mrf.mxu0 }
 0x629   : > { %v2781_v47 = vpack.i.bf16 %v4298_v51, %v4288_v34 }
 0x62c   : > { %1600 = vadd.xlane.f32.xlu1 %v1599_v27 }
 0x634   : > { %1935 = vadd.xlane.f32.xlu1 %v1934_v19 }
 0x64a   : > { %1926 = vadd.xlane.f32.xlu0 %v1925_v23 }
 0x64c   : > { %1597 = vadd.xlane.f32.xlu2 %v1596_v12 }
 0x64d   : > { %2752 = vrot.lane.b32.xlu1 %v2751_v37, %s3303_s1 }
 0x66e   : > { %v4324_v62 = vpop.xlane.xlu1 %1579 }
 0x66f   : > { %2933 = vrcp.f32 %v4324_v62  ;;  %vm1607_vm9 = vweird.f32 %v4324_v62  ;;  %v1611_v49 = vand.u32 2147483647, %v4324_v62  ;;  %v1613_v23 = vand.u32 2147483648, %v4324_v62 }
 0x670   : > { %2935 = vrcp.f32 %v4322_v14 }
 0x671   : > { %vm1612_vm4 = vcmp.eq.f32.partialorder %v1611_v49, 8.507059e+37 }
 0x675   : > { %v4331_v17 = vpop.eup %2933 }
 0x676   : > { %v4328_v35 = vpop.xlane.xlu1 %1920  ;;  %v1583_v30 = vpop.xlane.xlu2 %1582  ;;  %v1603_v52 = vmul.f32 %v4331_v17, %v4324_v62  ;;  %vm1608_vm7 = vweird.f32 %v4331_v17 }
 0x677   : > { %2937 = vrcp.f32 %v4328_v35  ;;  %v4333_v26 = vpop.eup %2935  ;;  %v1628_v31 = vand.u32 2147483648, %v1583_v30  ;;  %vm1622_vm8 = vweird.f32 %v1583_v30  ;;  %v1626_v21 = vand.u32 2147483647, %v1583_v30  ;;  %vm4387_vm15 = vmor %vm1607_vm9, %vm1608_vm7 }
 0x678   : > { %2939 = vrcp.f32 %v1583_v30  ;;  %v1983_v59 = vmul.f32 %v4333_v26, %v4322_v14  ;;  %v1604_v43 = vsub.f32 1.0, %v1603_v52  ;;  %vm1988_vm14 = vweird.f32 %v4333_v26 }
 0x679   : > { %vm1972_vm1 = vweird.f32 %v4328_v35  ;;  %v1976_v2 = vand.u32 2147483647, %v4328_v35  ;;  %vm1627_vm2 = vcmp.eq.f32.partialorder %v1626_v21, 8.507059e+37 }
 0x67a   : > { %v1984_v58 = vsub.f32 1.0, %v1983_v59  ;;  %v1605_v50 = vmul.f32 %v4331_v17, %v1604_v43 }
 0x67b   : > { %vm1977_vm7 = vcmp.eq.f32.partialorder %v1976_v2, 8.507059e+37 }
 0x67c   : > { %v1985_v19 = vmul.f32 %v4333_v26, %v1984_v58  ;;  %v1606_v48 = vadd.f32 %v4331_v17, %v1605_v50 }
 0x67d   : > { %v4337_v41 = vpop.eup %2937 }
 0x67e   : > { %v2940_v16 = vpop.eup %2939  ;;  %v1968_v15 = vmul.f32 %v4337_v41, %v4328_v35  ;;  %v4341_v9 = vpop.xlane.xlu1 %1929  ;;  %vm1973_vm10 = vweird.f32 %v4337_v41  ;;  %v1986_v62 = vadd.f32 %v4333_v26, %v1985_v19  ;;  %v1610_v43 = vsel %vm4387_vm15, %v4331_v17, %v1606_v48 }
 0x67f   : > { %v4343_v13 = vpop.xlane.xlu2 %1588  ;;  %v1618_v28 = vmul.f32 %v2940_v16, %v1583_v30  ;;  %v4347_v55 = vpop.xlane.xlu0 %1585  ;;  %vm1623_vm5 = vweird.f32 %v2940_v16  ;;  %vm4401_vm3 = vmor %vm1972_vm1, %vm1973_vm10 }
 0x680   : > { %2941 = vrcp.f32 %v4347_v55  ;;  %v1969_v46 = vsub.f32 1.0, %v1968_v15  ;;  %vm4368_vm13 = vmor %vm1622_vm8, %vm1623_vm5  ;;  %vm1992_vm8 = vcmp.eq.f32.partialorder %v1991_v10, 8.507059e+37  ;;  %vm1637_vm10 = vweird.f32 %v4347_v55 }
 0x681   : > { %v1619_v56 = vsub.f32 1.0, %v1618_v28  ;;  %2943 = vrcp.f32 %v4343_v13  ;;  %v1629_v28 = vor.u32 1.1754944e-38, %v1628_v31  ;;  %vm4412_vm5 = vmor %vm1987_vm6, %vm1988_vm14  ;;  %v1641_v59 = vand.u32 2147483647, %v4347_v55 }
 0x682   : > { %v1970_v45 = vmul.f32 %v4337_v41, %v1969_v46  ;;  %v1990_v31 = vsel %vm4412_vm5, %v4333_v26, %v1986_v62  ;;  %v1658_v62 = vand.u32 2147483648, %v4343_v13  ;;  %vm1652_vm14 = vweird.f32 %v4343_v13 }
 0x683   : > { %v1620_v61 = vmul.f32 %v2940_v16, %v1619_v56  ;;  %v1614_v56 = vor.u32 1.1754944e-38, %v1613_v23  ;;  %vm1642_vm1 = vcmp.eq.f32.partialorder %v1641_v59, 8.507059e+37 }
 0x684   : > { %v1971_v37 = vadd.f32 %v4337_v41, %v1970_v45 }
 0x685   : > { %v1621_v60 = vadd.f32 %v2940_v16, %v1620_v61  ;;  %v1615_v45 = vsel %vm1612_vm4, %v1614_v56, %v1610_v43  ;;  %v1659_v56 = vor.u32 1.1754944e-38, %v1658_v62 }
 0x686   : > { %v4353_v29 = vpop.xlane.xlu1 %1591  ;;  %v4355_v27 = vpop.eup %2941 }
 0x687   : > { %v2062_v40 = vpop.permute.xlu2 %2061  ;;  %v4361_v8 = vpop.eup %2943  ;;  %v1625_v30 = vsel %vm4368_vm13, %v2940_v16, %v1621_v60  ;;  %v1633_v52 = vmul.f32 %v4355_v27, %v4347_v55  ;;  %v1978_v16 = vand.u32 2147483648, %v4328_v35  ;;  %v1975_v35 = vsel %vm4401_vm3, %v4337_v41, %v1971_v37 }
 0x688   : > { %2092 = vmatpush.bf16.msrb.mxu0 %v2062_v40  ;;  %v1648_v15 = vmul.f32 %v4361_v8, %v4343_v13  ;;  %v1630_v58 = vsel %vm1627_vm2, %v1629_v28, %v1625_v30  ;;  %vm1638_vm6 = vweird.f32 %v4355_v27  ;;  %vm1653_vm9 = vweird.f32 %v4361_v8 }
 0x689   : > { %v1634_v61 = vsub.f32 1.0, %v1633_v52  ;;  %v1979_v60 = vor.u32 1.1754944e-38, %v1978_v16  ;;  %v1631_v40 = vmul.f32 %v4242_v38, %v1630_v58  ;;  %vm4437_vm13 = vmor %vm1637_vm10, %vm1638_vm6  ;;  %v1656_v16 = vand.u32 2147483647, %v4343_v13 }
 0x68a   : > { %v1649_v17 = vsub.f32 1.0, %v1648_v15  ;;  %v1643_v15 = vand.u32 2147483648, %v4347_v55  ;;  %vm1654_vm15 = vmor %vm1652_vm14, %vm1653_vm9  ;;  %vm2017_vm14 = vweird.f32 %v4341_v9 }
 0x68b   : > { %2545 = vmatmul.msk.bf16.vlgmr.msrb.gmra.mxu0 %vm855_vm12, %v2057_v1  ;;  %v1993_v1 = vand.u32 2147483648, %v4322_v14  ;;  %v1980_v48 = vsel %vm1977_vm7, %v1979_v60, %v1975_v35  ;;  %v1616_v14 = vmul.f32 %v4231_v4, %v1615_v45  ;;  %v1635_v21 = vmul.f32 %v4355_v27, %v1634_v61 }
 0x68c   : > { %v1650_v49 = vmul.f32 %v4361_v8, %v1649_v17  ;;  %v1981_v37 = vmul.f32 %v4238_v53, %v1980_v48  ;;  %vm1657_vm2 = vcmp.eq.f32.partialorder %v1656_v16, 8.507059e+37 }
 0x68d   : > { %v1994_v41 = vor.u32 1.1754944e-38, %v1993_v1  ;;  %v1722_v12 = vpack.c.bf16 %v1631_v40, %v1616_v14  ;;  %v1636_v26 = vadd.f32 %v4355_v27, %v1635_v21  ;;  %v1644_v1 = vor.u32 1.1754944e-38, %v1643_v15 }
 0x68e   : > { %v1651_v30 = vadd.f32 %v4361_v8, %v1650_v49 }
 0x68f   : > { %v4417_v19 = vpop.xlane.xlu1 %1594  ;;  %v1995_v38 = vsel %vm1992_vm8, %v1994_v41, %v1990_v31  ;;  %v1640_v2 = vsel %vm4437_vm13, %v4355_v27, %v1636_v26  ;;  %vm1667_vm8 = vweird.f32 %v4353_v29 }
 0x690   : > { %2945 = vrcp.f32 %v4417_v19  ;;  %v1996_v4 = vmul.f32 %v4149_v32, %v1995_v38  ;;  %v1655_v10 = vsel %vm1654_vm15, %v4361_v8, %v1651_v30  ;;  %v1645_v13 = vsel %vm1642_vm1, %v1644_v1, %v1640_v2 }
 0x691   : > { %2947 = vrcp.f32 %v4353_v29  ;;  %v1660_v46 = vsel %vm1657_vm2, %v1659_v56, %v1655_v10  ;;  %v1646_v17 = vmul.f32 %v4253_v0, %v1645_v13  ;;  %v1688_v40 = vand.u32 2147483648, %v4417_v19 }
 0x692   : > { %v1727_v23 = vpop.permute.xlu0 %1726  ;;  %v2058_v28 = vpack.c.bf16 %v1996_v4, %v1981_v37  ;;  %v1661_v35 = vmul.f32 %v4251_v18, %v1660_v46  ;;  %vm1682_vm5 = vweird.f32 %v4417_v19  ;;  %v1686_v41 = vand.u32 2147483647, %v4417_v19 }
 0x693   : > { %1757 = vmatpush.bf16.msra.mxu1 %v1727_v23  ;;  %v1673_v0 = vand.u32 2147483648, %v4353_v29  ;;  %v1671_v18 = vand.u32 2147483647, %v4353_v29  ;;  %2949 = vrcp.f32 %v4341_v9  ;;  %v1689_v14 = vor.u32 1.1754944e-38, %v1688_v40 }
 0x694   : > { %v1723_v27 = vpack.c.bf16 %v1661_v35, %v1646_v17  ;;  %vm1687_vm9 = vcmp.eq.f32.partialorder %v1686_v41, 8.507059e+37 }
 0x695   : > { %v1674_v49 = vor.u32 1.1754944e-38, %v1673_v0  ;;  %vm1672_vm10 = vcmp.eq.f32.partialorder %v1671_v18, 8.507059e+37 }
 0x696   : > { %2537 = vmatmul.msk.bf16.vlgmr.msra.gmra.mxu1 %vm855_vm12, %v1722_v12  ;;  %v2946_v52 = vpop.eup %2945 }
 0x697   : > { %v2948_v43 = vpop.eup %2947  ;;  %v1678_v32 = vmul.f32 %v2946_v52, %v4417_v19  ;;  %v4453_v60 = vpop.xlane.xlu1 %1932  ;;  %vm1683_vm3 = vweird.f32 %v2946_v52 }
 0x698   : > { %v1663_v55 = vmul.f32 %v2948_v43, %v4353_v29  ;;  %vm1668_vm4 = vweird.f32 %v2948_v43  ;;  %vm1684_vm7 = vmor %vm1682_vm5, %vm1683_vm3 }
 0x699   : > { %v1679_v58 = vsub.f32 1.0, %v1678_v32  ;;  %vm1669_vm6 = vmor %vm1667_vm8, %vm1668_vm4  ;;  %v2950_v37 = vpop.eup %2949  ;;  %v2021_v32 = vand.u32 2147483647, %v4341_v9 }
 0x69a   : > { %v1664_v61 = vsub.f32 1.0, %v1663_v55  ;;  %v2013_v29 = vmul.f32 %v2950_v37, %v4341_v9  ;;  %vm2018_vm13 = vweird.f32 %v2950_v37 }
 0x69b   : > { %2546 = vmatmul.msk.bf16.gmra.mxu0 %vm855_vm12, %v2058_v28  ;;  %v1680_v50 = vmul.f32 %v2946_v52, %v1679_v58  ;;  %v2023_v28 = vand.u32 2147483648, %v4341_v9  ;;  %vm2019_vm15 = vmor %vm2017_vm14, %vm2018_vm13  ;;  %vm2022_vm1 = vcmp.eq.f32.partialorder %v2021_v32, 8.507059e+37 }
 0x69c   : > { %v1665_v45 = vmul.f32 %v2948_v43, %v1664_v61 }
 0x69d   : > { %v1681_v8 = vadd.f32 %v2946_v52, %v1680_v50  ;;  %v2024_v55 = vor.u32 1.1754944e-38, %v2023_v28 }
 0x69e   : > { %v1666_v31 = vadd.f32 %v2948_v43, %v1665_v45 }
 0x69f   : > { %v1685_v48 = vsel %vm1684_vm7, %v2946_v52, %v1681_v8  ;;  %v1601_v38 = vpop.xlane.xlu1 %1600  ;;  %v2014_v52 = vsub.f32 1.0, %v2013_v29 }
 0x6a0   : > { %v1670_v21 = vsel %vm1669_vm6, %v2948_v43, %v1666_v31  ;;  %v1690_v23 = vsel %vm1687_vm9, %v1689_v14, %v1685_v48  ;;  %2951 = vrcp.f32 %v1601_v38  ;;  %vm1712_vm3 = vweird.f32 %v1601_v38 }
 0x6a1   : > { %v1675_v12 = vsel %vm1672_vm10, %v1674_v49, %v1670_v21  ;;  %v1691_v19 = vmul.f32 %v4277_v57, %v1690_v23  ;;  %v2015_v53 = vmul.f32 %v2950_v37, %v2014_v52  ;;  %2953 = vrcp.f32 %v4453_v60 }
 0x6a2   : > { %v1676_v26 = vmul.f32 %v4261_v44, %v1675_v12  ;;  %v1716_v45 = vand.u32 2147483647, %v1601_v38 }
 0x6a3   : > { %v2016_v16 = vadd.f32 %v2950_v37, %v2015_v53 }
 0x6a4   : > { %v1724_v30 = vpack.c.bf16 %v1691_v19, %v1676_v26  ;;  %vm1717_vm6 = vcmp.eq.f32.partialorder %v1716_v45, 8.507059e+37  ;;  %v4518_v45 = vpop.f32.mrf.mxu1 }
 0x6a5   : > { %v2020_v56 = vsel %vm2019_vm15, %v2950_v37, %v2016_v16 }
 0x6a6   : > { %2538 = vmatmul.msk.bf16.gmra.mxu1 %vm855_vm12, %v1723_v27  ;;  %v4467_v4 = vpop.eup %2951  ;;  %v2025_v50 = vsel %vm2022_vm1, %v2024_v55, %v2020_v56  ;;  %v1718_v27 = vand.u32 2147483648, %v1601_v38 }
 0x6a7   : > { %v1708_v15 = vmul.f32 %v4467_v4, %v1601_v38  ;;  %v4470_v62 = vpop.xlane.xlu1 %1935  ;;  %v4475_v43 = vpop.eup %2953  ;;  %vm1713_vm2 = vweird.f32 %v4467_v4  ;;  %v2026_v52 = vmul.f32 %v4249_v20, %v2025_v50 }
 0x6a8   : > { %2955 = vrcp.f32 %v4470_v62  ;;  %v2028_v9 = vmul.f32 %v4475_v43, %v4453_v60  ;;  %vm4488_vm4 = vmor %vm1712_vm3, %vm1713_vm2  ;;  %v1719_v12 = vor.u32 1.1754944e-38, %v1718_v27  ;;  %vm2033_vm2 = vweird.f32 %v4475_v43  ;;  %v1439_v50 = vpop.f32.mrf.mxu0 }
 0x6a9   : > { %v1709_v59 = vsub.f32 1.0, %v1708_v15  ;;  %vm2047_vm3 = vweird.f32 %v4470_v62  ;;  %v2051_v56 = vand.u32 2147483647, %v4470_v62 }
 0x6aa   : > { %v2029_v38 = vsub.f32 1.0, %v2028_v9 }
 0x6ab   : > { %v1710_v2 = vmul.f32 %v4467_v4, %v1709_v59 }
 0x6ac   : > { %v2030_v16 = vmul.f32 %v4475_v43, %v2029_v38  ;;  %v4520_v27 = vpop.f32.mrf.mxu1 }
 0x6ad   : > { %v1711_v58 = vadd.f32 %v4467_v4, %v1710_v2 }
 0x6ae   : > { %v4480_v10 = vpop.eup %2955 }
 0x6af   : > { %v2043_v61 = vmul.f32 %v4480_v10, %v4470_v62  ;;  %v1715_v14 = vsel %vm4488_vm4, %v4467_v4, %v1711_v58  ;;  %vm2048_vm1 = vweird.f32 %v4480_v10 }
 0x6b0   : > { %v1720_v15 = vsel %vm1717_vm6, %v1719_v12, %v1715_v14  ;;  %vm2049_vm4 = vmor %vm2047_vm3, %vm2048_vm1 }
 0x6b1   : > { %v2044_v18 = vsub.f32 1.0, %v2043_v61 }
 0x6b3   : > { %v2045_v4 = vmul.f32 %v4480_v10, %v2044_v18 }
 0x6b5   : > { %v2046_v2 = vadd.f32 %v4480_v10, %v2045_v4 }
 0x6b6   : > { %2539 = vmatmul.msk.bf16.gmra.mxu1 %vm855_vm12, %v1724_v30 }
 0x6b7   : > { %v2050_v55 = vsel %vm2049_vm4, %v4480_v10, %v2046_v2 }
 0x6bd   : > { %v1927_v57 = vpop.xlane.xlu0 %1926 }
 0x6be   : > { %2957 = vrcp.f32 %v1927_v57  ;;  %v2008_v8 = vand.u32 2147483648, %v1927_v57  ;;  %v2006_v41 = vand.u32 2147483647, %v1927_v57  ;;  %vm2002_vm7 = vweird.f32 %v1927_v57 }
 0x6bf   : > { %v1598_v44 = vpop.xlane.xlu2 %1597 }
 0x6c0   : > { %2959 = vrcp.f32 %v1598_v44  ;;  %v1703_v48 = vand.u32 2147483648, %v1598_v44  ;;  %v1701_v23 = vand.u32 2147483647, %v1598_v44  ;;  %v2009_v19 = vor.u32 1.1754944e-38, %v2008_v8 }
 0x6c1   : > { %vm2007_vm10 = vcmp.eq.f32.partialorder %v2006_v41, 8.507059e+37  ;;  %vm1697_vm13 = vweird.f32 %v1598_v44 }
 0x6c2   : > { %v1704_v29 = vor.u32 1.1754944e-38, %v1703_v48  ;;  %vm1702_vm15 = vcmp.eq.f32.partialorder %v1701_v23, 8.507059e+37 }
 0x6c4   : > { %v2958_v1 = vpop.eup %2957 }
 0x6c5   : > { %v1998_v13 = vmul.f32 %v2958_v1, %v1927_v57  ;;  %vm2003_vm5 = vweird.f32 %v2958_v1 }
 0x6c6   : > { %v2960_v46 = vpop.eup %2959  ;;  %vm2004_vm9 = vmor %vm2002_vm7, %vm2003_vm5  ;;  %vm2032_vm5 = vweird.f32 %v4453_v60 }
 0x6c7   : > { %v1999_v17 = vsub.f32 1.0, %v1998_v13  ;;  %v1693_v35 = vmul.f32 %v2960_v46, %v1598_v44  ;;  %vm1698_vm8 = vweird.f32 %v2960_v46  ;;  %v1721_v44 = vmul.f32 %v4296_v63, %v1720_v15  ;;  %vm2034_vm7 = vmor %vm2032_vm5, %vm2033_vm2 }
 0x6c8   : > { %vm1699_vm14 = vmor %vm1697_vm13, %vm1698_vm8  ;;  %v2038_v63 = vand.u32 2147483648, %v4453_v60  ;;  %vm2052_vm8 = vcmp.eq.f32.partialorder %v2051_v56, 8.507059e+37 }
 0x6c9   : > { %v2000_v31 = vmul.f32 %v2958_v1, %v1999_v17  ;;  %v1694_v0 = vsub.f32 1.0, %v1693_v35 }
 0x6ca   : > { %v2039_v58 = vor.u32 1.1754944e-38, %v2038_v63 }
 0x6cb   : > { %v2001_v21 = vadd.f32 %v2958_v1, %v2000_v31  ;;  %v1695_v49 = vmul.f32 %v2960_v46, %v1694_v0 }
 0x6cd   : > { %v1696_v37 = vadd.f32 %v2960_v46, %v1695_v49  ;;  %v2005_v26 = vsel %vm2004_vm9, %v2958_v1, %v2001_v21  ;;  %v2053_v1 = vand.u32 2147483648, %v4470_v62  ;;  %vm2227_vm9 = vcmask 195584  }
 0x6ce   : > { %v2010_v30 = vsel %vm2007_vm10, %v2009_v19, %v2005_v26 }
 0x6cf   : > { %v2011_v53 = vmul.f32 %v4311_v7, %v2010_v30  ;;  %v1700_v57 = vsel %vm1699_vm14, %v2960_v46, %v1696_v37  ;;  %v2031_v7 = vadd.f32 %v4475_v43, %v2030_v16  ;;  %v2054_v13 = vor.u32 1.1754944e-38, %v2053_v1  ;;  %v2753_v30 = vpop.permute.xlu1 %2752 }
 0x6d0   : > { %v1705_v59 = vsel %vm1702_vm15, %v1704_v29, %v1700_v57  ;;  %v2754_v15 = vunpack.i.l.bf16 %v2753_v30 }
 0x6d1   : > { %v2059_v28 = vpack.c.bf16 %v2026_v52, %v2011_v53  ;;  %v1706_v32 = vmul.f32 %v4313_v25, %v1705_v59  ;;  %v2036_v25 = vand.u32 2147483647, %v4453_v60  ;;  %v2035_v46 = vsel %vm2034_vm7, %v4475_v43, %v2031_v7  ;;  %v1441_v60 = vpop.f32.mrf.mxu0 }
 0x6d2   : > { %v2055_v61 = vsel %vm2052_vm8, %v2054_v13, %v2050_v55  ;;  %v2796_v23 = vpack.i.bf16 %v1441_v60, %v1439_v50  ;;  %v2755_v52 = vunpack.i.h.bf16 %v2753_v30 }
 0x6d3   : > { %2547 = vmatmul.msk.bf16.gmra.mxu0 %vm855_vm12, %v2059_v28  ;;  %v1725_v20 = vpack.c.bf16 %v1721_v44, %v1706_v32  ;;  %vm2037_vm6 = vcmp.eq.f32.partialorder %v2036_v25, 8.507059e+37  ;;  %v2056_v9 = vmul.f32 %v4304_v11, %v2055_v61  ;;  %v2210_v28 = vsel %vm793_vm11, %v4201_v24, %v2754_v15 }
 0x6d4   : > { %v2040_v62 = vsel %vm2037_vm6, %v2039_v58, %v2035_v46  ;;  %v2211_v16 = vsel %vm793_vm11, %v4203_v42, %v2755_v52 }
 0x6d5   : > { %2540 = vmatmul.msk.bf16.gmra.mxu1 %vm855_vm12, %v1725_v20  ;;  %v2041_v17 = vmul.f32 %v4286_v5, %v2040_v62 }
 0x6d7   : > { %v2060_v35 = vpack.c.bf16 %v2056_v9, %v2041_v17 }
 0x6e3   : > { %2548 = vmatmul.msk.bf16.gmra.mxu0 %vm855_vm12, %v2060_v35  ;;  %vm2218_vm12 = vcmask 130048  }
 0x708   : > { %v2094_v10 = vpop.f32.mrf.mxu0 }
 0x710   : > { %v2096_v8 = vpop.f32.mrf.mxu0 }
 0x711   : > { %v2761_v43 = vpack.i.bf16 %v2096_v8, %v2094_v10 }
 0x713   : > { %2762 = vrot.lane.b32.xlu2 %v2761_v43, %s3304_s25  ;;  %v1759_v40 = vpop.f32.mrf.mxu1 }
 0x718   : > { %v2099_v5 = vpop.f32.mrf.mxu0 }
 0x71b   : > { %v1761_v31 = vpop.f32.mrf.mxu1 }
 0x71c   : > { %v2756_v11 = vpack.i.bf16 %v1761_v31, %v1759_v40 }
 0x71e   : > { %2757 = vrot.lane.b32.xlu0 %v2756_v11, %s3305_s7 }
 0x720   : > { %v2101_v0 = vpop.f32.mrf.mxu0 }
 0x721   : > { %v2776_v48 = vpack.i.bf16 %v2101_v0, %v2099_v5 }
 0x723   : > { %v1764_v41 = vpop.f32.mrf.mxu1 }
 0x726   : > { %2767 = vrot.lane.b32.xlu0 %v2766_v6, %s3303_s1 }
 0x72b   : > { %v1766_v18 = vpop.f32.mrf.mxu1 }
 0x72c   : > { %v2771_v14 = vpack.i.bf16 %v1766_v18, %v1764_v41 }
 0x72e   : > { %2772 = vrot.lane.b32.xlu1 %v2771_v14, %s3305_s7  ;;  %2777 = vrot.lane.b32.xlu0 %v2776_v48, %s3304_s25 }
 0x733   : > { %v1769_v21 = vpop.f32.mrf.mxu1 }
 0x736   : > { %2782 = vrot.lane.b32.xlu1 %v2781_v47, %s3303_s1  ;;  %v2571_v47 = vld [vmem:[#allocation8] sm:$0xff] }
 0x737   : > { %2279 = vmatpush.bf16.msra.mxu2 %v2571_v47 }
 0x73b   : > { %v1771_v49 = vpop.f32.mrf.mxu1 }
 0x73c   : > { %v2786_v38 = vpack.i.bf16 %v1771_v49, %v1769_v21 }
 0x73e   : > { %2797 = vrot.lane.b32.xlu1 %v2796_v23, %s3303_s1  ;;  %2787 = vrot.lane.b32.xlu2 %v2786_v38, %s3305_s7 }
 0x750   : > { %v2104_v22 = vpop.f32.mrf.mxu0 }
 0x752   : > { %v1774_v6 = vpop.f32.mrf.mxu1 }
 0x758   : > { %v2106_v12 = vpop.f32.mrf.mxu0 }
 0x759   : > { %v2791_v19 = vpack.i.bf16 %v2106_v12, %v2104_v22 }
 0x75a   : > { %v1776_v37 = vpop.f32.mrf.mxu1 }
 0x75b   : > { %2792 = vrot.lane.b32.xlu0 %v2791_v19, %s3304_s25  ;;  %v2801_v26 = vpack.i.bf16 %v1776_v37, %v1774_v6 }
 0x75d   : > { %2802 = vrot.lane.b32.xlu2 %v2801_v26, %s3305_s7  ;;  %s2336_s7 = sshll.u32 %s2333_s27, 4  ;;  %s2337_s7 = int_to_ptr.hbm [resolvable:$true] %s2336_s7 }
 0x75e   : > { %s3167_s21 = sshra.s32 %s2337_s7, 4  ;;  %s3168_s21 = int_to_ptr.hbm [resolvable:$true] %s3167_s21 }
 0x75f   : > { %p3174_p11 = scmp.lt.s32.totalorder %s3168_s21, %s4738_s9 }
 0x760   : > { %v2109_v29 = vpop.f32.mrf.mxu0 }
 0x768   : > { %v2111_v34 = vpop.f32.mrf.mxu0 }
 0x769   : > { %v2806_v51 = vpack.i.bf16 %v2111_v34, %v2109_v29 }
 0x76b   : > { %2807 = vrot.lane.b32.xlu0 %v2806_v51, %s3304_s25  ;;  %s2334_s25 = sshll.u32 %s4577_s28, 4  ;;  %s2335_s25 = int_to_ptr.vmem [resolvable:$true] %s2334_s25 }
 0x76d   : > { %v2763_v4 = vpop.permute.xlu2 %2762 }
 0x76e   : > { %v2765_v32 = vunpack.i.h.bf16 %v2763_v4  ;;  %v2764_v44 = vunpack.i.l.bf16 %v2763_v4  ;;  %v2965_v4 = vld [vmem:[%s3534_s8] sm:$0xff] }
 0x790   : > { %v2758_v53 = vpop.permute.xlu0 %2757 }
 0x791   : > { %v2760_v57 = vunpack.i.h.bf16 %v2758_v53  ;;  %v2759_v59 = vunpack.i.l.bf16 %v2758_v53 }
 0x793   : > { %v2220_v2 = vsel %vm2218_vm12, %v2211_v16, %v2760_v57  ;;  %v2219_v20 = vsel %vm2218_vm12, %v2210_v28, %v2759_v59  ;;  %v2966_v16 = vld [vmem:[%s3534_s8 + $0x8] sm:$0xff] }
 0x794   : > { %v2228_v1 = vsel %vm2227_vm9, %v2219_v20, %v2764_v44  ;;  %v2229_v7 = vsel %vm2227_vm9, %v2220_v2, %v2765_v32  ;;  %v2967_v2 = vld [vmem:[%s3534_s8 + $0x10] sm:$0xff] }
 0x795   : > { %v2236_v56 = vpack.c.bf16 %v2229_v7, %v2228_v1 }
 0x797   : > { %2557 = vmatmul.msk.bf16.vlgmr.msra.gmra.mxu2 %vm476_vm0, %v2236_v56  ;;  %v2968_v56 = vld [vmem:[%s3534_s8 + $0x18] sm:$0xff] }
 0x798   : > { %v2768_v63 = vpop.permute.xlu0 %2767  ;;  %v2788_v31 = vpop.permute.xlu2 %2787 }
 0x799   : > { %v2770_v25 = vunpack.i.h.bf16 %v2768_v63  ;;  %v2769_v55 = vunpack.i.l.bf16 %v2768_v63  ;;  %v2790_v11 = vunpack.i.h.bf16 %v2788_v31  ;;  %v2789_v5 = vunpack.i.l.bf16 %v2788_v31 }
 0x79b   : > { %v2213_v62 = vsel %vm793_vm11, %v4520_v27, %v2770_v25  ;;  %v2212_v9 = vsel %vm793_vm11, %v4518_v45, %v2769_v55 }
 0x7a0   : > { %v2773_v42 = vpop.permute.xlu1 %2772  ;;  %v2778_v13 = vpop.permute.xlu0 %2777 }
 0x7a1   : > { %v2775_v46 = vunpack.i.h.bf16 %v2773_v42  ;;  %v2774_v24 = vunpack.i.l.bf16 %v2773_v42  ;;  %v2780_v58 = vunpack.i.h.bf16 %v2778_v13  ;;  %v2779_v61 = vunpack.i.l.bf16 %v2778_v13  ;;  %v2969_v42 = vld [vmem:[%s3534_s8 + $0x20] sm:$0xff] }
 0x7a3   : > { %v2222_v17 = vsel %vm2218_vm12, %v2213_v62, %v2775_v46  ;;  %v2221_v35 = vsel %vm2218_vm12, %v2212_v9, %v2774_v24 }
 0x7a4   : > { %v2230_v50 = vsel %vm2227_vm9, %v2221_v35, %v2779_v61  ;;  %v2231_v60 = vsel %vm2227_vm9, %v2222_v17, %v2780_v58  ;;  %v2970_v58 = vld [vmem:[%s3534_s8 + $0x28] sm:$0xff]  ;;  %v2971_v17 = vld [vmem:[%s3534_s8 + $0x30] sm:$0xff] }
 0x7a5   : > { %v2237_v10 = vpack.c.bf16 %v2231_v60, %v2230_v50 }
 0x7a7   : > { %2558 = vmatmul.msk.bf16.gmra.mxu2 %vm476_vm0, %v2237_v10  ;;  %v2972_v10 = vld [vmem:[%s3534_s8 + $0x38] sm:$0xff] }
 0x7a8   : > { %v2783_v8 = vpop.permute.xlu1 %2782 }
 0x7a9   : > { %v2785_v43 = vunpack.i.h.bf16 %v2783_v8  ;;  %v2784_v40 = vunpack.i.l.bf16 %v2783_v8 }
 0x7ab   : > { %v2215_v27 = vsel %vm793_vm11, %v4025_v54, %v2785_v43  ;;  %v2214_v45 = vsel %vm793_vm11, %v4009_v33, %v2784_v40 }
 0x7ac   : > { %v2223_v48 = vsel %vm2218_vm12, %v2214_v45, %v2789_v5  ;;  %v2224_v14 = vsel %vm2218_vm12, %v2215_v27, %v2790_v11 }
 0x7b0   : > { %v2798_v54 = vpop.permute.xlu1 %2797 }
 0x7b1   : > { %v2800_v36 = vunpack.i.h.bf16 %v2798_v54  ;;  %v2799_v33 = vunpack.i.l.bf16 %v2798_v54 }
 0x7b3   : > { %v2217_v19 = vsel %vm793_vm11, %v4036_v39, %v2800_v36  ;;  %v2216_v37 = vsel %vm793_vm11, %v4033_v3, %v2799_v33  ;;  %v2814_v39 = vld [vmem:[%s4733_s23] ss:$0 sm:$0xff]  ;;  %s3169_s23 = scalar_lea.hbm %s3168_s21, 64 }
 0x7b4   : > { %p3170_p1 = scmp.ne.s32.totalorder %s3168_s21, %s3169_s23  ;;  %p3175_p12 = scmp.lt.s32.totalorder %s3173_s5, %s3169_s23 }
 0x7b6   : > { %p3171_p4 = pnand %p3170_p1, %p3489_p3  ;;  %p3176_p13 = por %p3175_p12, %p3174_p11 }
 0x7b7   : > { %v2803_v38 = vpop.permute.xlu2 %2802 }
 0x7b8   : > { %v2805_v22 = vunpack.i.h.bf16 %v2803_v38  ;;  %v2804_v6 = vunpack.i.l.bf16 %v2803_v38  ;;  %p3172_p8 = pneg %p3171_p4 }
 0x7ba   : > { %v2226_v34 = vsel %vm2218_vm12, %v2217_v19, %v2805_v22  ;;  %v2225_v51 = vsel %vm2218_vm12, %v2216_v37, %v2804_v6  ;;  %p3177_p0 = pnand %p3176_p13, %p3172_p8 }
 0x7cd   : > { %v2793_v41 = vpop.permute.xlu0 %2792 }
 0x7ce   : > { %v2795_v0 = vunpack.i.h.bf16 %v2793_v41  ;;  %v2794_v18 = vunpack.i.l.bf16 %v2793_v41 }
 0x7d0   : > { %v2232_v21 = vsel %vm2227_vm9, %v2223_v48, %v2794_v18  ;;  %v2233_v49 = vsel %vm2227_vm9, %v2224_v14, %v2795_v0 }
 0x7d1   : > { %v2238_v23 = vpack.c.bf16 %v2233_v49, %v2232_v21 }
 0x7d3   : > { %2559 = vmatmul.msk.bf16.gmra.mxu2 %vm476_vm0, %v2238_v23 }
 0x7dd   : > { %v2808_v12 = vpop.permute.xlu0 %2807 }
 0x7de   : > { %v2810_v26 = vunpack.i.h.bf16 %v2808_v12  ;;  %v2809_v29 = vunpack.i.l.bf16 %v2808_v12 }
 0x7e0   : > { %v2234_v47 = vsel %vm2227_vm9, %v2225_v51, %v2809_v29  ;;  %v2235_v30 = vsel %vm2227_vm9, %v2226_v34, %v2810_v26 }
 0x7e1   : > { %v2239_v52 = vpack.c.bf16 %v2235_v30, %v2234_v47 }
 0x7e3   : > { %2560 = vmatmul.msk.bf16.gmra.mxu2 %vm476_vm0, %v2239_v52 }
 0x81a   : > { %v2281_v3 = vpop.f32.mrf.mxu2 }
 0x81b   : > { %v2282_v15 = vadd.f32 %v2814_v39, %v2281_v3 }
 0x81d   : > { %v2301_v53 = vadd.f32 %v2965_v4, %v2282_v15 }
 0x81f   : > { %2309 = vst.msk [vmem:[%s4577_s28] sm:$0xff] %vm476_vm0, %v2301_v53 }
 0x822   : > { %v2283_v57 = vpop.f32.mrf.mxu2 }
 0x823   : > { %v2284_v59 = vadd.f32 %v2814_v39, %v2283_v57 }
 0x825   : > { %v2302_v28 = vadd.f32 %v2966_v16, %v2284_v59 }
 0x827   : > { %2310 = vst.msk [vmem:[%s4577_s28 + $0x8] sm:$0xff] %vm476_vm0, %v2302_v28 }
 0x82a   : > { %v2286_v32 = vpop.f32.mrf.mxu2 }
 0x82b   : > { %v2287_v44 = vadd.f32 %v2814_v39, %v2286_v32 }
 0x82d   : > { %v2303_v20 = vadd.f32 %v2967_v2, %v2287_v44 }
 0x82f   : > { %2311 = vst.msk [vmem:[%s4577_s28 + $0x10] sm:$0xff] %vm476_vm0, %v2303_v20 }
 0x832   : > { %v2288_v1 = vpop.f32.mrf.mxu2 }
 0x833   : > { %v2289_v7 = vadd.f32 %v2814_v39, %v2288_v1 }
 0x835   : > { %v2304_v63 = vadd.f32 %v2968_v56, %v2289_v7 }
 0x837   : > { %2312 = vst.msk [vmem:[%s4577_s28 + $0x18] sm:$0xff] %vm476_vm0, %v2304_v63 }
 0x856   : > { %v2291_v25 = vpop.f32.mrf.mxu2 }
 0x857   : > { %v2292_v55 = vadd.f32 %v2814_v39, %v2291_v25 }
 0x859   : > { %v2305_v13 = vadd.f32 %v2969_v42, %v2292_v55 }
 0x85b   : > { %2313 = vst.msk [vmem:[%s4577_s28 + $0x20] sm:$0xff] %vm476_vm0, %v2305_v13 }
 0x85e   : > { %v2293_v46 = vpop.f32.mrf.mxu2 }
 0x85f   : > { %v2294_v24 = vadd.f32 %v2814_v39, %v2293_v46 }
 0x861   : > { %v2306_v61 = vadd.f32 %v2970_v58, %v2294_v24 }
 0x863   : > { %2314 = vst.msk [vmem:[%s4577_s28 + $0x28] sm:$0xff] %vm476_vm0, %v2306_v61 }
 0x866   : > { %v2296_v62 = vpop.f32.mrf.mxu2 }
 0x867   : > { %v2297_v9 = vadd.f32 %v2814_v39, %v2296_v62 }
 0x869   : > { %v2307_v35 = vadd.f32 %v2971_v17, %v2297_v9 }
 0x86b   : > { %2315 = vst.msk [vmem:[%s4577_s28 + $0x30] sm:$0xff] %vm476_vm0, %v2307_v35 }
 0x86e   : > { %v2298_v50 = vpop.f32.mrf.mxu2 }
 0x86f   : > { %v2299_v60 = vadd.f32 %v2814_v39, %v2298_v50 }
 0x871   : > { %v2308_v8 = vadd.f32 %v2972_v10, %v2299_v60 }
 0x873   : > { %2316 = vst.msk [vmem:[%s4577_s28 + $0x38] sm:$0xff] %vm476_vm0, %v2308_v8 }
 0x874   : > { %3180 = shalt.err (!%p3177_p0)
}
 0x875   : > { %s3306_s3 = smov 128   ;;  %s3307_s8 = smov 256  }
 0x876   : > { %2606 = dma.vmem_to_hbm [thread:$0]  (%p3489_p3), %s2335_s25, 1024, %s2337_s7, %s2318_s16, %s3306_s3, %s3307_s8, %s3303_s1  }
 0x877 PF: > { %s4740_s28 = sld [smem:[#allocation19_spill]]  ;;  %p2643_p5 = scmp.ge.s32.totalorder %s3279_s18, 2 }
 0x879   : > { %p2629_p7 = pnand %p2643_p5, %p3427_p6 }
 0x87b   : > { %p2630_p9 = pneg %p2629_p7 }
 0x87d   : > { %s2351_s6 = sand.u32 1, %s4740_s28  }
 0x87e   : > { %s2352_s26 = scalar_lea.sflag [#allocation4], %s2351_s6 }
 0x87f   : > { %3238 = dma.done.wait (%p2630_p9), %s2352_s26, 1024  }
 0x880   : > { %3240 = vsyncadd (%p2630_p9), %s2352_s26, 4294966272  ;;  %s28_s18 = sadd.s32 1, %s3279_s18   ;;  %s4742_s13 = sld [smem:[#allocation23_spill]] }
 0x881   : > { %p25_p2 = scmp.ge.s32.totalorder %s28_s18, 10   ;;  %s4743_s1 = sld [smem:[#allocation25_spill]] }
 0x882   : > { %s4744_s16 = sld [smem:[#allocation27_spill]]  ;;  %s4745_s22 = smov %s4762_s30 }
 0x883   : > { %s4746_s30 = smov %s3247_s10  ;;  %s4747_s10 = smov %s3251_s11 }
 0x884   : > { %s4748_s11 = smov %s3517_s2  ;;  %s4749_s12 = smov %s3267_s15 }
 0x885   : > { %s4750_s14 = smov %s3275_s17  ;;  %s4752_s17 = smov %s4745_s22 }
 0x886   :  { %27 = sbr.rel (!%p25_p2) target bundleno = 21 (0x15), region = 124 }
 0x887   : > { %s4751_s15 = smov %s4743_s1 }
 0x88b   :  { %2358 = vsyncpa [#allocation3], 1 }
 0x88c   :  { %2360 = vsyncpa [#allocation3 + $0x1], 1 }
 0x88d   :  { %2361 = vsyncpa [#allocation6], 1 }
 0x88e   :  { %2362 = vsyncpa [#allocation9], 1 }
 0x88f   :  { %2363 = vsyncpa [#allocation12], 1 }
 0x890   :  { %2364 = vsyncpa [#allocation4], 1 }
 0x891   :  { %2366 = vsyncpa [#allocation4 + $0x1], 1 }

</bundles_post_ra>
